<compile_context>
chip_gen: v5e
topology: v5e:2x2
jax: 0.10.0
libtpu: 0.0.40
codegen_flags: <defaults>
</compile_context>

<pallas_src>
import functools
import math

import jax
import jax.numpy as jnp
from jax.experimental import pallas as pl
from jax.experimental.pallas import tpu as pltpu

# Logical (PyTorch) dims and lane-padded dims.
_H1, _H2, _H3, _OUT = 800, 400, 50, 1
_H1P, _H2P, _H3P, _OUTP = 896, 512, 128, 128


def _round_up(x, m):
    return (x + m - 1) // m * m


def _cdiv(a, b):
    return -(-a // b)


def _device_kind():
    try:
        return jax.devices()[0].device_kind.lower()
    except Exception:
        return ""


def _num_tensorcores_per_chip():
    kind = _device_kind()
    # v7x (and v4 / v5p megacore) expose 2 TensorCores per chip.
    if "v7" in kind or "v4" in kind or "v5p" in kind:
        return 2
    return 1


def _default_epilogue_dtype():
    kind = _device_kind()
    # v6e / v7x have a native bf16 VALU; v5e and older do not.
    if "v6" in kind or "v7" in kind:
        return jnp.bfloat16
    return jnp.float32


def _mlp_kernel(x_ref, w1_ref, b1_ref, w2_ref, b2_ref, w3_ref, b3_ref,
                w4_ref, b4_ref, o_ref, *, cdt, n_chunks):
    """One batch tile of the 4-layer MLP.

    Dots run in bf16 on the MXU with f32 accumulation.  Bias-add / LeakyReLU
    run in `cdt` (bf16 on v6e/v7x, f32 on v5e).  The tile is split into
    `n_chunks` independent row chunks so MXU work of one chunk can co-issue
    with VPU epilogue work of the other.  Weights/biases are lane-padded with
    exact zeros, so the real logit (column 0 of the output) is unaffected.
    """
    w1, w2, w3, w4 = w1_ref[...], w2_ref[...], w3_ref[...], w4_ref[...]
    b1 = b1_ref[...].astype(cdt)
    b2 = b2_ref[...].astype(cdt)
    b3 = b3_ref[...].astype(cdt)
    b4 = b4_ref[...]  # final bias-add stays f32

    def lrelu(v):
        return jnp.where(v > 0, v, 0.2 * v)

    def chain(x):
        if x.dtype != jnp.bfloat16:
            x = x.astype(jnp.bfloat16)
        h = jnp.dot(x, w1, preferred_element_type=jnp.float32).astype(cdt) + b1
        h = lrelu(h).astype(jnp.bfloat16)
        h = jnp.dot(h, w2, preferred_element_type=jnp.float32).astype(cdt) + b2
        h = lrelu(h).astype(jnp.bfloat16)
        h = jnp.dot(h, w3, preferred_element_type=jnp.float32).astype(cdt) + b3
        h = lrelu(h).astype(jnp.bfloat16)
        # Lane-dense (rows, 128) result; the real logit lives in column 0.
        return jnp.dot(h, w4, preferred_element_type=jnp.float32) + b4

    tb = x_ref.shape[0]
    if n_chunks > 1 and tb % n_chunks == 0 and (tb // n_chunks) % 16 == 0:
        c = tb // n_chunks
        for j in range(n_chunks):  # unrolled at trace time; chunks independent
            o_ref[j * c:(j + 1) * c, :] = chain(x_ref[j * c:(j + 1) * c, :])
    else:
        o_ref[...] = chain(x_ref[...])


def _choose_tile(batch, tile_batch, num_cores):
    """Batch tile TB (multiple of 16) that minimizes padding, with >= num_cores
    grid steps when possible so the 'parallel' axis shards across cores."""
    n_tiles = max(1, _cdiv(batch, tile_batch))
    tb = _round_up(_cdiv(batch, n_tiles), 16)
    while num_cores > 1 and _round_up(batch, tb) // tb < num_cores and tb > 16:
        tb = _round_up(_cdiv(tb, 2), 16)
    return tb, _round_up(batch, tb)


def feature_discriminator_forward(x, params, *, tile_batch=512,
                                  epilogue_dtype=None):
    """x: (B, L) f32 or bf16.  params: dict from init_params.  Returns (B, 1) f32."""
    if epilogue_dtype is None:
        epilogue_dtype = _default_epilogue_dtype()

    B, L = x.shape
    Lp = params["w1"].shape[0]  # layer-1 contraction dim, 128-aligned
    assert L <= Lp, (L, Lp)

    num_cores = _num_tensorcores_per_chip()
    TB, B_pad = _choose_tile(B, tile_batch, num_cores)

    pad_rows, pad_cols = B_pad - B, Lp - L
    if pad_rows or pad_cols:
        x = jnp.pad(x, ((0, pad_rows), (0, pad_cols)))

    grid = (B_pad // TB,)
    n_chunks = 2 if TB >= 256 else 1

    args = (
        x,
        params["w1"], params["b1"],
        params["w2"], params["b2"],
        params["w3"], params["b3"],
        params["w4"], params["b4"],
    )

    # Advisory cost estimate (padded flops; params fetched once).
    flops = 2 * B_pad * (Lp * _H1P + _H1P * _H2P + _H2P * _H3P + _H3P * _OUTP)
    param_bytes = sum(int(a.size) * a.dtype.itemsize for a in args[1:])
    bytes_accessed = (param_bytes + B_pad * Lp * x.dtype.itemsize
                      + B_pad * _OUTP * 4)

    kernel = functools.partial(_mlp_kernel, cdt=epilogue_dtype,
                               n_chunks=n_chunks)

    def _build(param_pipeline_mode):
        def _resident(shape):
            # Full-array block, constant index map -> stays VMEM-resident.
            if param_pipeline_mode is None:
                return pl.BlockSpec(shape, lambda i: (0, 0))
            return pl.BlockSpec(shape, lambda i: (0, 0),
                                pipeline_mode=param_pipeline_mode)

        in_specs = [pl.BlockSpec((TB, Lp), lambda i: (i, 0))] + [
            _resident(a.shape) for a in args[1:]
        ]
        return pl.pallas_call(
            kernel,
            out_shape=jax.ShapeDtypeStruct((B_pad, _OUTP), jnp.float32),
            grid=grid,
            in_specs=in_specs,
            out_specs=pl.BlockSpec((TB, _OUTP), lambda i: (i, 0)),
            compiler_params=pltpu.CompilerParams(
                dimension_semantics=("parallel",)),
            cost_estimate=pl.CostEstimate(
                flops=flops, transcendentals=0, bytes_accessed=bytes_accessed),
        )

    try:
        # Constant-index params don't need double buffers -> single-buffer them.
        out = _build(pl.Buffered(buffer_count=1))(*args)
    except Exception:
        # Fallback: some Pallas versions reject pipeline_mode on pallas_call
        # inputs; the default double buffering is functionally identical.
        out = _build(None)(*args)

    return out[:B, :1]


def init_params(length_of_feature, key):
    """PyTorch nn.Linear-style init (uniform +-1/sqrt(fan_in)), zero-padded to
    lane-friendly shapes.  Weights stored (in, out) in bf16 for the MXU; biases
    kept f32 (cast to the epilogue dtype inside the kernel).  Padded rows/cols
    are exact zeros, so the real output (column 0 of layer 4) is unaffected."""
    l_pad = _round_up(length_of_feature, 128)
    dims = [
        # (fan_in, fan_out, padded_in, padded_out)
        (length_of_feature, _H1, l_pad, _H1P),
        (_H1, _H2, _H1P, _H2P),
        (_H2, _H3, _H2P, _H3P),
        (_H3, _OUT, _H3P, _OUTP),
    ]
    params = {}
    for i, (fan_in, fan_out, in_pad, out_pad) in enumerate(dims, start=1):
        key, kw, kb = jax.random.split(key, 3)
        bound = 1.0 / math.sqrt(fan_in)
        w = jax.random.uniform(kw, (fan_in, fan_out), jnp.float32, -bound, bound)
        b = jax.random.uniform(kb, (1, fan_out), jnp.float32, -bound, bound)
        w_pad = jnp.zeros((in_pad, out_pad), jnp.float32).at[:fan_in, :fan_out].set(w)
        b_pad = jnp.zeros((1, out_pad), jnp.float32).at[:, :fan_out].set(b)
        params[f"w{i}"] = w_pad.astype(jnp.bfloat16)  # MXU operand
        params[f"b{i}"] = b_pad                        # f32 master
    return params


def reference_forward(x, params, *, epilogue_dtype=jnp.float32):
    """Pure-JAX reference with the same bf16-dot / epilogue numerics as the kernel."""
    Lp = params["w1"].shape[0]
    if x.shape[1] != Lp:
        x = jnp.pad(x, ((0, 0), (0, Lp - x.shape[1])))
    h = x.astype(jnp.bfloat16)
    for i in (1, 2, 3):
        h = jnp.dot(h, params[f"w{i}"],
                    preferred_element_type=jnp.float32).astype(epilogue_dtype)
        h = h + params[f"b{i}"].astype(epilogue_dtype)
        h = jnp.where(h > 0, h, 0.2 * h).astype(jnp.bfloat16)
    out = (jnp.dot(h, params["w4"], preferred_element_type=jnp.float32)
           + params["b4"])
    return out[:, :1]


def reference_forward_f32(x, params):
    """Full-f32 evaluation of the (bf16-stored) weights — loose sanity check."""
    Lp = params["w1"].shape[0]
    if x.shape[1] != Lp:
        x = jnp.pad(x, ((0, 0), (0, Lp - x.shape[1])))
    h = x.astype(jnp.float32)
    for i in (1, 2, 3):
        h = jnp.dot(h, params[f"w{i}"].astype(jnp.float32)) + params[f"b{i}"]
        h = jnp.where(h > 0, h, 0.2 * h)
    out = jnp.dot(h, params["w4"].astype(jnp.float32)) + params["b4"]
    return out[:, :1]


if __name__ == "__main__":
    key = jax.random.PRNGKey(0)
    k_params, k_x = jax.random.split(key)

    batch = 8
    length_of_feature = 32

    params = init_params(length_of_feature, k_params)
    x = jax.random.normal(k_x, (batch, length_of_feature), jnp.float32)

    cdt = _default_epilogue_dtype()
    out = feature_discriminator_forward(x, params, epilogue_dtype=cdt)
    out = jax.block_until_ready(out)
    assert out.shape == (batch, 1), out.shape

    # Reference with identical low-precision pipeline.
    ref = reference_forward(x, params, epilogue_dtype=cdt)
    assert jnp.allclose(out, ref, atol=2e-2, rtol=2e-2), (out, ref)

    # Loose check against an all-f32 evaluation (guards gross bf16 drift).
    ref32 = reference_forward_f32(x, params)
    assert jnp.allclose(out, ref32, atol=5e-2, rtol=5e-2), (out, ref32)

    print("KERNEL_OK")
</pallas_src>

<mosaic_0001>
module attributes {stable_mosaic.version = 11 : i64} {
  func.func @_mlp_kernel(%arg0: i32, %arg1: memref<16x128xf32, #tpu.memory_space<vmem>>, %arg2: memref<128x896xbf16, #tpu.memory_space<vmem>>, %arg3: memref<1x896xf32, #tpu.memory_space<vmem>>, %arg4: memref<896x512xbf16, #tpu.memory_space<vmem>>, %arg5: memref<1x512xf32, #tpu.memory_space<vmem>>, %arg6: memref<512x128xbf16, #tpu.memory_space<vmem>>, %arg7: memref<1x128xf32, #tpu.memory_space<vmem>>, %arg8: memref<128x128xbf16, #tpu.memory_space<vmem>>, %arg9: memref<1x128xf32, #tpu.memory_space<vmem>>, %arg10: memref<16x128xf32, #tpu.memory_space<vmem>>) attributes {dimension_semantics = [#tpu.dimension_semantics<parallel>], iteration_bounds = array<i64: 1>, scalar_prefetch = 0 : i64, scratch_operands = 0 : i64, tpu.core_type = #tpu.core_type<tc>, window_params = [{transform_indices = @transform_0, window_bounds = array<i64: 16, 128>}, {pipeline_mode = #tpu.pipeline_mode<synchronous>, transform_indices = @transform_1, window_bounds = array<i64: 128, 896>}, {pipeline_mode = #tpu.pipeline_mode<synchronous>, transform_indices = @transform_2, window_bounds = array<i64: 1, 896>}, {pipeline_mode = #tpu.pipeline_mode<synchronous>, transform_indices = @transform_3, window_bounds = array<i64: 896, 512>}, {pipeline_mode = #tpu.pipeline_mode<synchronous>, transform_indices = @transform_4, window_bounds = array<i64: 1, 512>}, {pipeline_mode = #tpu.pipeline_mode<synchronous>, transform_indices = @transform_5, window_bounds = array<i64: 512, 128>}, {pipeline_mode = #tpu.pipeline_mode<synchronous>, transform_indices = @transform_6, window_bounds = array<i64: 1, 128>}, {pipeline_mode = #tpu.pipeline_mode<synchronous>, transform_indices = @transform_7, window_bounds = array<i64: 128, 128>}, {pipeline_mode = #tpu.pipeline_mode<synchronous>, transform_indices = @transform_8, window_bounds = array<i64: 1, 128>}, {transform_indices = @transform_9, window_bounds = array<i64: 16, 128>}]} {
    %c0 = arith.constant 0 : index
    %c0_0 = arith.constant 0 : index
    %0 = vector.load %arg2[%c0, %c0_0] : memref<128x896xbf16, #tpu.memory_space<vmem>>, vector<128x896xbf16>
    %c0_1 = arith.constant 0 : index
    %c0_2 = arith.constant 0 : index
    %1 = vector.load %arg4[%c0_1, %c0_2] : memref<896x512xbf16, #tpu.memory_space<vmem>>, vector<896x512xbf16>
    %c0_3 = arith.constant 0 : index
    %c0_4 = arith.constant 0 : index
    %2 = vector.load %arg6[%c0_3, %c0_4] : memref<512x128xbf16, #tpu.memory_space<vmem>>, vector<512x128xbf16>
    %c0_5 = arith.constant 0 : index
    %c0_6 = arith.constant 0 : index
    %3 = vector.load %arg8[%c0_5, %c0_6] : memref<128x128xbf16, #tpu.memory_space<vmem>>, vector<128x128xbf16>
    %c0_7 = arith.constant 0 : index
    %c0_8 = arith.constant 0 : index
    %4 = vector.load %arg3[%c0_7, %c0_8] : memref<1x896xf32, #tpu.memory_space<vmem>>, vector<1x896xf32>
    %c0_9 = arith.constant 0 : index
    %c0_10 = arith.constant 0 : index
    %5 = vector.load %arg5[%c0_9, %c0_10] : memref<1x512xf32, #tpu.memory_space<vmem>>, vector<1x512xf32>
    %c0_11 = arith.constant 0 : index
    %c0_12 = arith.constant 0 : index
    %6 = vector.load %arg7[%c0_11, %c0_12] : memref<1x128xf32, #tpu.memory_space<vmem>>, vector<1x128xf32>
    %c0_13 = arith.constant 0 : index
    %c0_14 = arith.constant 0 : index
    %7 = vector.load %arg9[%c0_13, %c0_14] : memref<1x128xf32, #tpu.memory_space<vmem>>, vector<1x128xf32>
    %c0_15 = arith.constant 0 : index
    %c0_16 = arith.constant 0 : index
    %8 = vector.load %arg1[%c0_15, %c0_16] : memref<16x128xf32, #tpu.memory_space<vmem>>, vector<16x128xf32>
    %9 = arith.truncf %8 : vector<16x128xf32> to vector<16x128xbf16>
    %cst = arith.constant dense<0.000000e+00> : vector<16x896xf32>
    %10 = tpu.matmul %9, %0, %cst {dimension_numbers = #tpu.dot_dimension_numbers<[1], [0], [0], [1], [0, 0, 1, 1], [], []>} : vector<16x128xbf16>, vector<128x896xbf16>, vector<16x896xf32> -> vector<16x896xf32>
    %11 = vector.broadcast %4 : vector<1x896xf32> to vector<16x896xf32>
    %12 = arith.addf %10, %11 : vector<16x896xf32>
    %cst_17 = arith.constant 0.000000e+00 : f32
    %13 = vector.broadcast %cst_17 : f32 to vector<16x896xf32>
    %14 = arith.cmpf ogt, %12, %13 : vector<16x896xf32>
    %cst_18 = arith.constant 2.000000e-01 : f32
    %15 = vector.broadcast %cst_18 : f32 to vector<16x896xf32>
    %16 = arith.mulf %15, %12 : vector<16x896xf32>
    %17 = arith.select %14, %12, %16 : vector<16x896xi1>, vector<16x896xf32>
    %18 = arith.truncf %17 : vector<16x896xf32> to vector<16x896xbf16>
    %cst_19 = arith.constant dense<0.000000e+00> : vector<16x512xf32>
    %19 = tpu.matmul %18, %1, %cst_19 {dimension_numbers = #tpu.dot_dimension_numbers<[1], [0], [0], [1], [0, 0, 1, 1], [], []>} : vector<16x896xbf16>, vector<896x512xbf16>, vector<16x512xf32> -> vector<16x512xf32>
    %20 = vector.broadcast %5 : vector<1x512xf32> to vector<16x512xf32>
    %21 = arith.addf %19, %20 : vector<16x512xf32>
    %cst_20 = arith.constant 0.000000e+00 : f32
    %22 = vector.broadcast %cst_20 : f32 to vector<16x512xf32>
    %23 = arith.cmpf ogt, %21, %22 : vector<16x512xf32>
    %cst_21 = arith.constant 2.000000e-01 : f32
    %24 = vector.broadcast %cst_21 : f32 to vector<16x512xf32>
    %25 = arith.mulf %24, %21 : vector<16x512xf32>
    %26 = arith.select %23, %21, %25 : vector<16x512xi1>, vector<16x512xf32>
    %27 = arith.truncf %26 : vector<16x512xf32> to vector<16x512xbf16>
    %cst_22 = arith.constant dense<0.000000e+00> : vector<16x128xf32>
    %28 = tpu.matmul %27, %2, %cst_22 {dimension_numbers = #tpu.dot_dimension_numbers<[1], [0], [0], [1], [0, 0, 1, 1], [], []>} : vector<16x512xbf16>, vector<512x128xbf16>, vector<16x128xf32> -> vector<16x128xf32>
    %29 = vector.broadcast %6 : vector<1x128xf32> to vector<16x128xf32>
    %30 = arith.addf %28, %29 : vector<16x128xf32>
    %cst_23 = arith.constant 0.000000e+00 : f32
    %31 = vector.broadcast %cst_23 : f32 to vector<16x128xf32>
    %32 = arith.cmpf ogt, %30, %31 : vector<16x128xf32>
    %cst_24 = arith.constant 2.000000e-01 : f32
    %33 = vector.broadcast %cst_24 : f32 to vector<16x128xf32>
    %34 = arith.mulf %33, %30 : vector<16x128xf32>
    %35 = arith.select %32, %30, %34 : vector<16x128xi1>, vector<16x128xf32>
    %36 = arith.truncf %35 : vector<16x128xf32> to vector<16x128xbf16>
    %cst_25 = arith.constant dense<0.000000e+00> : vector<16x128xf32>
    %37 = tpu.matmul %36, %3, %cst_25 {dimension_numbers = #tpu.dot_dimension_numbers<[1], [0], [0], [1], [0, 0, 1, 1], [], []>} : vector<16x128xbf16>, vector<128x128xbf16>, vector<16x128xf32> -> vector<16x128xf32>
    %38 = vector.broadcast %7 : vector<1x128xf32> to vector<16x128xf32>
    %39 = arith.addf %37, %38 : vector<16x128xf32>
    %c0_26 = arith.constant 0 : index
    %c0_27 = arith.constant 0 : index
    %40 = vector.load %arg10[%c0_26, %c0_27] : memref<16x128xf32, #tpu.memory_space<vmem>>, vector<16x128xf32>
    tpu.vector_store %arg10[%c0_26, %c0_27], %39 {strides = array<i32>} : memref<16x128xf32, #tpu.memory_space<vmem>>, vector<16x128xf32>,
    return
  }
  func.func @transform_0(%arg0: i32) -> (i32, i32) {
    %c0_i32 = arith.constant 0 : i32
    %c0_i32_0 = arith.constant 0 : i32
    return %arg0, %c0_i32 : i32, i32
  }
  func.func @transform_1(%arg0: i32) -> (i32, i32) {
    %c0_i32 = arith.constant 0 : i32
    %c0_i32_0 = arith.constant 0 : i32
    %c0_i32_1 = arith.constant 0 : i32
    return %c0_i32, %c0_i32_0 : i32, i32
  }
  func.func @transform_2(%arg0: i32) -> (i32, i32) {
    %c0_i32 = arith.constant 0 : i32
    %c0_i32_0 = arith.constant 0 : i32
    %c0_i32_1 = arith.constant 0 : i32
    return %c0_i32, %c0_i32_0 : i32, i32
  }
  func.func @transform_3(%arg0: i32) -> (i32, i32) {
    %c0_i32 = arith.constant 0 : i32
    %c0_i32_0 = arith.constant 0 : i32
    %c0_i32_1 = arith.constant 0 : i32
    return %c0_i32, %c0_i32_0 : i32, i32
  }
  func.func @transform_4(%arg0: i32) -> (i32, i32) {
    %c0_i32 = arith.constant 0 : i32
    %c0_i32_0 = arith.constant 0 : i32
    %c0_i32_1 = arith.constant 0 : i32
    return %c0_i32, %c0_i32_0 : i32, i32
  }
  func.func @transform_5(%arg0: i32) -> (i32, i32) {
    %c0_i32 = arith.constant 0 : i32
    %c0_i32_0 = arith.constant 0 : i32
    %c0_i32_1 = arith.constant 0 : i32
    return %c0_i32, %c0_i32_0 : i32, i32
  }
  func.func @transform_6(%arg0: i32) -> (i32, i32) {
    %c0_i32 = arith.constant 0 : i32
    %c0_i32_0 = arith.constant 0 : i32
    %c0_i32_1 = arith.constant 0 : i32
    return %c0_i32, %c0_i32_0 : i32, i32
  }
  func.func @transform_7(%arg0: i32) -> (i32, i32) {
    %c0_i32 = arith.constant 0 : i32
    %c0_i32_0 = arith.constant 0 : i32
    %c0_i32_1 = arith.constant 0 : i32
    return %c0_i32, %c0_i32_0 : i32, i32
  }
  func.func @transform_8(%arg0: i32) -> (i32, i32) {
    %c0_i32 = arith.constant 0 : i32
    %c0_i32_0 = arith.constant 0 : i32
    %c0_i32_1 = arith.constant 0 : i32
    return %c0_i32, %c0_i32_0 : i32, i32
  }
  func.func @transform_9(%arg0: i32) -> (i32, i32) {
    %c0_i32 = arith.constant 0 : i32
    %c0_i32_0 = arith.constant 0 : i32
    return %arg0, %c0_i32 : i32, i32
  }
}

module attributes {stable_mosaic.version = 11 : i64} {
  func.func @_mlp_kernel(%arg0: i32, %arg1: memref<16x128xf32, #tpu.memory_space<vmem>>, %arg2: memref<128x896xbf16, #tpu.memory_space<vmem>>, %arg3: memref<1x896xf32, #tpu.memory_space<vmem>>, %arg4: memref<896x512xbf16, #tpu.memory_space<vmem>>, %arg5: memref<1x512xf32, #tpu.memory_space<vmem>>, %arg6: memref<512x128xbf16, #tpu.memory_space<vmem>>, %arg7: memref<1x128xf32, #tpu.memory_space<vmem>>, %arg8: memref<128x128xbf16, #tpu.memory_space<vmem>>, %arg9: memref<1x128xf32, #tpu.memory_space<vmem>>, %arg10: memref<16x128xf32, #tpu.memory_space<vmem>>) attributes {dimension_semantics = [#tpu.dimension_semantics<parallel>], iteration_bounds = array<i64: 1>, scalar_prefetch = 0 : i64, scratch_operands = 0 : i64, tpu.core_type = #tpu.core_type<tc>, window_params = [{transform_indices = @transform_0, window_bounds = array<i64: 16, 128>}, {pipeline_mode = #tpu.pipeline_mode<synchronous>, transform_indices = @transform_1, window_bounds = array<i64: 128, 896>}, {pipeline_mode = #tpu.pipeline_mode<synchronous>, transform_indices = @transform_2, window_bounds = array<i64: 1, 896>}, {pipeline_mode = #tpu.pipeline_mode<synchronous>, transform_indices = @transform_3, window_bounds = array<i64: 896, 512>}, {pipeline_mode = #tpu.pipeline_mode<synchronous>, transform_indices = @transform_4, window_bounds = array<i64: 1, 512>}, {pipeline_mode = #tpu.pipeline_mode<synchronous>, transform_indices = @transform_5, window_bounds = array<i64: 512, 128>}, {pipeline_mode = #tpu.pipeline_mode<synchronous>, transform_indices = @transform_6, window_bounds = array<i64: 1, 128>}, {pipeline_mode = #tpu.pipeline_mode<synchronous>, transform_indices = @transform_7, window_bounds = array<i64: 128, 128>}, {pipeline_mode = #tpu.pipeline_mode<synchronous>, transform_indices = @transform_8, window_bounds = array<i64: 1, 128>}, {transform_indices = @transform_9, window_bounds = array<i64: 16, 128>}]} {
    %c0 = arith.constant 0 : index
    %c0_0 = arith.constant 0 : index
    %0 = vector.load %arg2[%c0, %c0_0] : memref<128x896xbf16, #tpu.memory_space<vmem>>, vector<128x896xbf16>
    %c0_1 = arith.constant 0 : index
    %c0_2 = arith.constant 0 : index
    %1 = vector.load %arg4[%c0_1, %c0_2] : memref<896x512xbf16, #tpu.memory_space<vmem>>, vector<896x512xbf16>
    %c0_3 = arith.constant 0 : index
    %c0_4 = arith.constant 0 : index
    %2 = vector.load %arg6[%c0_3, %c0_4] : memref<512x128xbf16, #tpu.memory_space<vmem>>, vector<512x128xbf16>
    %c0_5 = arith.constant 0 : index
    %c0_6 = arith.constant 0 : index
    %3 = vector.load %arg8[%c0_5, %c0_6] : memref<128x128xbf16, #tpu.memory_space<vmem>>, vector<128x128xbf16>
    %c0_7 = arith.constant 0 : index
    %c0_8 = arith.constant 0 : index
    %4 = vector.load %arg3[%c0_7, %c0_8] : memref<1x896xf32, #tpu.memory_space<vmem>>, vector<1x896xf32>
    %c0_9 = arith.constant 0 : index
    %c0_10 = arith.constant 0 : index
    %5 = vector.load %arg5[%c0_9, %c0_10] : memref<1x512xf32, #tpu.memory_space<vmem>>, vector<1x512xf32>
    %c0_11 = arith.constant 0 : index
    %c0_12 = arith.constant 0 : index
    %6 = vector.load %arg7[%c0_11, %c0_12] : memref<1x128xf32, #tpu.memory_space<vmem>>, vector<1x128xf32>
    %c0_13 = arith.constant 0 : index
    %c0_14 = arith.constant 0 : index
    %7 = vector.load %arg9[%c0_13, %c0_14] : memref<1x128xf32, #tpu.memory_space<vmem>>, vector<1x128xf32>
    %c0_15 = arith.constant 0 : index
    %c0_16 = arith.constant 0 : index
    %8 = vector.load %arg1[%c0_15, %c0_16] : memref<16x128xf32, #tpu.memory_space<vmem>>, vector<16x128xf32>
    %9 = arith.truncf %8 : vector<16x128xf32> to vector<16x128xbf16>
    %cst = arith.constant dense<0.000000e+00> : vector<16x896xf32>
    %10 = tpu.matmul %9, %0, %cst {dimension_numbers = #tpu.dot_dimension_numbers<[1], [0], [0], [1], [0, 0, 1, 1], [], []>} : vector<16x128xbf16>, vector<128x896xbf16>, vector<16x896xf32> -> vector<16x896xf32>
    %11 = vector.broadcast %4 : vector<1x896xf32> to vector<16x896xf32>
    %12 = arith.addf %10, %11 : vector<16x896xf32>
    %cst_17 = arith.constant 0.000000e+00 : f32
    %13 = vector.broadcast %cst_17 : f32 to vector<16x896xf32>
    %14 = arith.cmpf ogt, %12, %13 : vector<16x896xf32>
    %cst_18 = arith.constant 2.000000e-01 : f32
    %15 = vector.broadcast %cst_18 : f32 to vector<16x896xf32>
    %16 = arith.mulf %15, %12 : vector<16x896xf32>
    %17 = arith.select %14, %12, %16 : vector<16x896xi1>, vector<16x896xf32>
    %18 = arith.truncf %17 : vector<16x896xf32> to vector<16x896xbf16>
    %cst_19 = arith.constant dense<0.000000e+00> : vector<16x512xf32>
    %19 = tpu.matmul %18, %1, %cst_19 {dimension_numbers = #tpu.dot_dimension_numbers<[1], [0], [0], [1], [0, 0, 1, 1], [], []>} : vector<16x896xbf16>, vector<896x512xbf16>, vector<16x512xf32> -> vector<16x512xf32>
    %20 = vector.broadcast %5 : vector<1x512xf32> to vector<16x512xf32>
    %21 = arith.addf %19, %20 : vector<16x512xf32>
    %cst_20 = arith.constant 0.000000e+00 : f32
    %22 = vector.broadcast %cst_20 : f32 to vector<16x512xf32>
    %23 = arith.cmpf ogt, %21, %22 : vector<16x512xf32>
    %cst_21 = arith.constant 2.000000e-01 : f32
    %24 = vector.broadcast %cst_21 : f32 to vector<16x512xf32>
    %25 = arith.mulf %24, %21 : vector<16x512xf32>
    %26 = arith.select %23, %21, %25 : vector<16x512xi1>, vector<16x512xf32>
    %27 = arith.truncf %26 : vector<16x512xf32> to vector<16x512xbf16>
    %cst_22 = arith.constant dense<0.000000e+00> : vector<16x128xf32>
    %28 = tpu.matmul %27, %2, %cst_22 {dimension_numbers = #tpu.dot_dimension_numbers<[1], [0], [0], [1], [0, 0, 1, 1], [], []>} : vector<16x512xbf16>, vector<512x128xbf16>, vector<16x128xf32> -> vector<16x128xf32>
    %29 = vector.broadcast %6 : vector<1x128xf32> to vector<16x128xf32>
    %30 = arith.addf %28, %29 : vector<16x128xf32>
    %cst_23 = arith.constant 0.000000e+00 : f32
    %31 = vector.broadcast %cst_23 : f32 to vector<16x128xf32>
    %32 = arith.cmpf ogt, %30, %31 : vector<16x128xf32>
    %cst_24 = arith.constant 2.000000e-01 : f32
    %33 = vector.broadcast %cst_24 : f32 to vector<16x128xf32>
    %34 = arith.mulf %33, %30 : vector<16x128xf32>
    %35 = arith.select %32, %30, %34 : vector<16x128xi1>, vector<16x128xf32>
    %36 = arith.truncf %35 : vector<16x128xf32> to vector<16x128xbf16>
    %cst_25 = arith.constant dense<0.000000e+00> : vector<16x128xf32>
    %37 = tpu.matmul %36, %3, %cst_25 {dimension_numbers = #tpu.dot_dimension_numbers<[1], [0], [0], [1], [0, 0, 1, 1], [], []>} : vector<16x128xbf16>, vector<128x128xbf16>, vector<16x128xf32> -> vector<16x128xf32>
    %38 = vector.broadcast %7 : vector<1x128xf32> to vector<16x128xf32>
    %39 = arith.addf %37, %38 : vector<16x128xf32>
    %c0_26 = arith.constant 0 : index
    %c0_27 = arith.constant 0 : index
    %40 = vector.load %arg10[%c0_26, %c0_27] : memref<16x128xf32, #tpu.memory_space<vmem>>, vector<16x128xf32>
    tpu.vector_store %arg10[%c0_26, %c0_27], %39 {strides = array<i32>} : memref<16x128xf32, #tpu.memory_space<vmem>>, vector<16x128xf32>,
    return
  }
  func.func @transform_0(%arg0: i32) -> (i32, i32) {
    %c0_i32 = arith.constant 0 : i32
    %c0_i32_0 = arith.constant 0 : i32
    return %arg0, %c0_i32 : i32, i32
  }
  func.func @transform_1(%arg0: i32) -> (i32, i32) {
    %c0_i32 = arith.constant 0 : i32
    %c0_i32_0 = arith.constant 0 : i32
    %c0_i32_1 = arith.constant 0 : i32
    return %c0_i32, %c0_i32_0 : i32, i32
  }
  func.func @transform_2(%arg0: i32) -> (i32, i32) {
    %c0_i32 = arith.constant 0 : i32
    %c0_i32_0 = arith.constant 0 : i32
    %c0_i32_1 = arith.constant 0 : i32
    return %c0_i32, %c0_i32_0 : i32, i32
  }
  func.func @transform_3(%arg0: i32) -> (i32, i32) {
    %c0_i32 = arith.constant 0 : i32
    %c0_i32_0 = arith.constant 0 : i32
    %c0_i32_1 = arith.constant 0 : i32
    return %c0_i32, %c0_i32_0 : i32, i32
  }
  func.func @transform_4(%arg0: i32) -> (i32, i32) {
    %c0_i32 = arith.constant 0 : i32
    %c0_i32_0 = arith.constant 0 : i32
    %c0_i32_1 = arith.constant 0 : i32
    return %c0_i32, %c0_i32_0 : i32, i32
  }
  func.func @transform_5(%arg0: i32) -> (i32, i32) {
    %c0_i32 = arith.constant 0 : i32
    %c0_i32_0 = arith.constant 0 : i32
    %c0_i32_1 = arith.constant 0 : i32
    return %c0_i32, %c0_i32_0 : i32, i32
  }
  func.func @transform_6(%arg0: i32) -> (i32, i32) {
    %c0_i32 = arith.constant 0 : i32
    %c0_i32_0 = arith.constant 0 : i32
    %c0_i32_1 = arith.constant 0 : i32
    return %c0_i32, %c0_i32_0 : i32, i32
  }
  func.func @transform_7(%arg0: i32) -> (i32, i32) {
    %c0_i32 = arith.constant 0 : i32
    %c0_i32_0 = arith.constant 0 : i32
    %c0_i32_1 = arith.constant 0 : i32
    return %c0_i32, %c0_i32_0 : i32, i32
  }
  func.func @transform_8(%arg0: i32) -> (i32, i32) {
    %c0_i32 = arith.constant 0 : i32
    %c0_i32_0 = arith.constant 0 : i32
    %c0_i32_1 = arith.constant 0 : i32
    return %c0_i32, %c0_i32_0 : i32, i32
  }
  func.func @transform_9(%arg0: i32) -> (i32, i32) {
    %c0_i32 = arith.constant 0 : i32
    %c0_i32_0 = arith.constant 0 : i32
    return %arg0, %c0_i32 : i32, i32
  }
}

</mosaic_0001>

<bundles_post_ra>
// kernel: tpu_custom_call.1
= control target key start
LH: loop header
LB: loop body
LE: loop exit
PB: predicated region body
PF: predicated region fallthrough
CT: control target
= control target key end

     0   :  { %14 = vsyncpa [#allocation3], 0  ;;  %s4863_s0 = inlined_call_operand.hbm [shape: f32[16,128], index: 0, kind: input, shape index: {}]   ;;  %s4864_s1 = inlined_call_operand.hbm [shape: bf16[128,896], index: 1, kind: input, shape index: {}]   ;;  %s4865_s2 = inlined_call_operand.hbm [shape: f32[1,896], index: 2, kind: input, shape index: {}]   ;;  %s4866_s3 = inlined_call_operand.hbm [shape: bf16[896,512], index: 3, kind: input, shape index: {}]   ;;  %s4867_s4 = inlined_call_operand.hbm [shape: f32[1,512], index: 4, kind: input, shape index: {}]   ;;  %s4868_s5 = inlined_call_operand.hbm [shape: bf16[512,128], index: 5, kind: input, shape index: {}]   ;;  %s4869_s6 = inlined_call_operand.vmem [shape: f32[1,128], index: 6, kind: input, shape index: {}]   ;;  %s4870_s7 = inlined_call_operand.hbm [shape: bf16[128,128], index: 7, kind: input, shape index: {}]   ;;  %s4871_s8 = inlined_call_operand.vmem [shape: f32[1,128], index: 8, kind: input, shape index: {}]   ;;  %s4872_s9 = inlined_call_operand.hbm [shape: f32[16,128], index: 9, kind: output, shape index: {}]  }
   0x1   :  { %15 = vsyncpa [#allocation6], 0 }
   0x2   :  { %16 = vsyncpa [#allocation9], 0 }
   0x3   :  { %17 = vsyncpa [#allocation12], 0  ;;  %s36_s11 = sshll.u32 %s4864_s1, 4  ;;  %s37_s11 = int_to_ptr.hbm [resolvable:$true] %s36_s11 }
   0x4   :  { %18 = vsyncpa [#allocation4], 0  ;;  %s4679_s12 = smov [#allocation5]   ;;  %s60_s16 = sshll.u32 %s4866_s3, 4  ;;  %s61_s16 = int_to_ptr.hbm [resolvable:$true] %s60_s16 }
   0x5   :  { %s38_s13 = sshll.u32 %s4679_s12, 4  ;;  %s4680_s17 = smov 448   ;;  %s39_s13 = int_to_ptr.vmem [resolvable:$true] %s38_s13 }
   0x6   :  { %s4681_s18 = smov 28   ;;  %s4682_s19 = smov [#allocation8]  }
   0x7   :  { %44 = dma.hbm_to_vmem [thread:$0]  %s37_s11, 7168, %s39_s13, [#allocation6], %s4680_s17, %s4680_s17, %s4681_s18  }
   0x8   :  { %s62_s20 = sshll.u32 %s4682_s19, 4  ;;  %s4683_s21 = smov 256   ;;  %s63_s20 = int_to_ptr.vmem [resolvable:$true] %s62_s20 }
   0x9   :  { %s4684_s22 = smov 16   ;;  %s84_s24 = sshll.u32 %s4868_s5, 4  ;;  %s85_s24 = int_to_ptr.hbm [resolvable:$true] %s84_s24 }
   0xa   :  { %68 = dma.hbm_to_vmem [thread:$0]  %s61_s16, 28672, %s63_s20, [#allocation9], %s4683_s21, %s4683_s21, %s4684_s22  }
   0xb   :  { %s4685_s25 = smov [#allocation11]   ;;  %s23_s28 = sshll.u32 %s4863_s0, 4  ;;  %s24_s28 = int_to_ptr.hbm [resolvable:$true] %s23_s28 }
   0xc   :  { %s86_s26 = sshll.u32 %s4685_s25, 4  ;;  %s4686_s29 = smov 64   ;;  %s87_s26 = int_to_ptr.vmem [resolvable:$true] %s86_s26 }
   0xd   :  { %s4687_s30 = smov 4   ;;  %s4688_s10 = smov [#allocation2]  }
   0xe   :  { %92 = dma.hbm_to_vmem [thread:$0]  %s85_s24, 4096, %s87_s26, [#allocation12], %s4686_s29, %s4686_s29, %s4687_s30  }
   0xf   :  { %s25_s11 = sshll.u32 %s4688_s10, 4  ;;  %s4689_s12 = smov 128   ;;  %s26_s11 = int_to_ptr.vmem [resolvable:$true] %s25_s11 }
  0x10   :  { %s4690_s5 = smov 8   ;;  %s50_s0 = sshll.u32 %s4865_s2, 4  ;;  %s51_s0 = int_to_ptr.hbm [resolvable:$true] %s50_s0 }
  0x11   :  { %31 = dma.hbm_to_vmem [thread:$0]  %s24_s28, 256, %s26_s11, [#allocation3], %s4689_s12, %s4689_s12, %s4690_s5  }
  0x12   :  { %s4691_s15 = smov [#allocation7]   ;;  %s74_s19 = sshll.u32 %s4867_s4, 4  ;;  %s75_s19 = int_to_ptr.hbm [resolvable:$true] %s74_s19 }
  0x13   :  { %s52_s16 = sshll.u32 %s4691_s15, 4  ;;  %s4692_s20 = smov [#allocation10]   ;;  %s53_s16 = int_to_ptr.vmem [resolvable:$true] %s52_s16 }
  0x14   :  { %55 = dma.hbm_to_vmem [thread:$0]  %s51_s0, 112, %s53_s16, [#allocation6]  }
  0x15   :  { %s76_s21 = sshll.u32 %s4692_s20, 4  ;;  %s99_s23 = sshll.u32 %s4870_s7, 4  ;;  %s77_s21 = int_to_ptr.vmem [resolvable:$true] %s76_s21  ;;  %s100_s23 = int_to_ptr.hbm [resolvable:$true] %s99_s23 }
  0x16   :  { %79 = dma.hbm_to_vmem [thread:$0]  %s75_s19, 64, %s77_s21, [#allocation9]  }
  0x17   :  { %s4693_s2 = smov [#allocation13]  }
  0x18   :  { %s101_s24 = sshll.u32 %s4693_s2, 4  ;;  %s102_s24 = int_to_ptr.vmem [resolvable:$true] %s101_s24 }
  0x19   :  { %107 = dma.hbm_to_vmem [thread:$0]  %s100_s23, 1024, %s102_s24, [#allocation12], %s4686_s29, %s4686_s29, %s4687_s30  }
  0x1a   :  { %4669 = dma.done.wait [#allocation3], 256  }
  0x1b   :  { %4670 = vsyncadd [#allocation3], 4294967040 }
  0x1c   :  { %4671 = dma.done.wait [#allocation6], 7280  }
  0x1d   :  { %4672 = vsyncadd [#allocation6], 4294960016 }
  0x1e   :  { %4673 = dma.done.wait [#allocation9], 28736  }
  0x1f   :  { %4674 = vsyncadd [#allocation9], 4294938560 }
  0x20   :  { %4675 = dma.done.wait [#allocation12], 5120  }
  0x21   :  { %4676 = vsyncadd [#allocation12], 4294962176  ;;  %v3057_v0 = vld [vmem:[#allocation5 + $0x188] sm:$0xf]  ;;  %v4191_v1 = vld [vmem:[#allocation5 + $0x1a0] sm:$0xf0] }
  0x22   :  { %v4188_v2 = vld [vmem:[#allocation5 + $0x18c] sm:$0xf]  ;;  %v3058_v3 = vor.u32 %v4191_v1, %v3057_v0  ;;  %v3059_v4 = vld [vmem:[#allocation5 + $0x1a4] sm:$0xf0]  ;;  %v3065_v5 = vld [vmem:[#allocation5 + $0x190] sm:$0xf] }
  0x23   :  { %v4192_v6 = vld [vmem:[#allocation5 + $0x1a8] sm:$0xf0]  ;;  %v3062_v7 = vor.u32 %v4188_v2, %v3059_v4  ;;  %v4189_v9 = vld [vmem:[#allocation5 + $0x194] sm:$0xf]  ;;  %v3067_v10 = vld [vmem:[#allocation5 + $0x1ac] sm:$0xf0] }
  0x24   :  { %v3066_v8 = vor.u32 %v4192_v6, %v3065_v5  ;;  %v3029_v11 = vld [vmem:[#allocation5 + $0x150] sm:$0xf]  ;;  %816 = vmatpush.bf16.msra.mxu0 %v3058_v3  ;;  %v3070_v12 = vor.u32 %v4189_v9, %v3067_v10  ;;  %v4184_v13 = vld [vmem:[#allocation5 + $0x168] sm:$0xf0]  ;;  %v4181_v14 = vld [vmem:[#allocation5 + $0x154] sm:$0xf] }
  0x25   :  { %v3031_v15 = vld [vmem:[#allocation5 + $0x16c] sm:$0xf0]  ;;  %830 = vmatpush.bf16.msra.mxu1 %v3062_v7  ;;  %v3030_v16 = vor.u32 %v4184_v13, %v3029_v11  ;;  %v3037_v18 = vld [vmem:[#allocation5 + $0x158] sm:$0xf]  ;;  %v4185_v19 = vld [vmem:[#allocation5 + $0x170] sm:$0xf0] }
  0x26   :  { %844 = vmatpush.bf16.msra.mxu2 %v3066_v8  ;;  %v3034_v17 = vor.u32 %v4181_v14, %v3031_v15  ;;  %v4182_v20 = vld [vmem:[#allocation5 + $0x15c] sm:$0xf]  ;;  %858 = vmatpush.bf16.msra.mxu3 %v3070_v12  ;;  %v3038_v21 = vor.u32 %v4185_v19, %v3037_v18  ;;  %v3039_v22 = vld [vmem:[#allocation5 + $0x174] sm:$0xf0]  ;;  %v4177_v24 = vld [vmem:[#allocation5 + $0x130] sm:$0xf0] }
  0x27   :  { %v3001_v23 = vld [vmem:[#allocation5 + $0x118] sm:$0xf]  ;;  %v3042_v25 = vor.u32 %v4182_v20, %v3039_v22  ;;  %v4174_v26 = vld [vmem:[#allocation5 + $0x11c] sm:$0xf]  ;;  %v3009_v28 = vld [vmem:[#allocation5 + $0x120] sm:$0xf] }
  0x28   :  { %v3003_v27 = vld [vmem:[#allocation5 + $0x134] sm:$0xf0]  ;;  %817 = vmatpush.bf16.msra.mxu0 %v3030_v16  ;;  %v3002_v29 = vor.u32 %v4177_v24, %v3001_v23  ;;  %v4178_v30 = vld [vmem:[#allocation5 + $0x138] sm:$0xf0]  ;;  %v4175_v31 = vld [vmem:[#allocation5 + $0x124] sm:$0xf] }
  0x29   :  { %v3011_v32 = vld [vmem:[#allocation5 + $0x13c] sm:$0xf0]  ;;  %831 = vmatpush.bf16.msra.mxu1 %v3034_v17  ;;  %v3006_v33 = vor.u32 %v4174_v26, %v3003_v27  ;;  %v3010_v34 = vor.u32 %v4178_v30, %v3009_v28  ;;  %v4170_v36 = vld [vmem:[#allocation5 + $0xf8] sm:$0xf0]  ;;  %v4167_v37 = vld [vmem:[#allocation5 + $0xe4] sm:$0xf] }
  0x2a   :  { %845 = vmatpush.bf16.msra.mxu2 %v3038_v21  ;;  %v2973_v35 = vld [vmem:[#allocation5 + $0xe0] sm:$0xf]  ;;  %859 = vmatpush.bf16.msra.mxu3 %v3042_v25  ;;  %v3014_v38 = vor.u32 %v4175_v31, %v3011_v32  ;;  %v2981_v40 = vld [vmem:[#allocation5 + $0xe8] sm:$0xf]  ;;  %v4171_v41 = vld [vmem:[#allocation5 + $0x100] sm:$0xf0] }
  0x2b   :  { %v2975_v39 = vld [vmem:[#allocation5 + $0xfc] sm:$0xf0]  ;;  %v4168_v42 = vld [vmem:[#allocation5 + $0xec] sm:$0xf]  ;;  %v2983_v43 = vld [vmem:[#allocation5 + $0x104] sm:$0xf0]  ;;  %v2974_v44 = vor.u32 %v4170_v36, %v2973_v35  ;;  %v2982_v46 = vor.u32 %v4171_v41, %v2981_v40 }
  0x2c   :  { %818 = vmatpush.bf16.msra.mxu0 %v3002_v29  ;;  %v2978_v45 = vor.u32 %v4167_v37, %v2975_v39  ;;  %v2945_v47 = vld [vmem:[#allocation5 + $0xa8] sm:$0xf]  ;;  %v4163_v48 = vld [vmem:[#allocation5 + $0xc0] sm:$0xf0]  ;;  %v4160_v49 = vld [vmem:[#allocation5 + $0xac] sm:$0xf]  ;;  %v2986_v50 = vor.u32 %v4168_v42, %v2983_v43 }
  0x2d   :  { %832 = vmatpush.bf16.msra.mxu1 %v3006_v33  ;;  %v2947_v51 = vld [vmem:[#allocation5 + $0xc4] sm:$0xf0]  ;;  %v2953_v52 = vld [vmem:[#allocation5 + $0xb0] sm:$0xf]  ;;  %v4164_v53 = vld [vmem:[#allocation5 + $0xc8] sm:$0xf0]  ;;  %v2946_v56 = vor.u32 %v4163_v48, %v2945_v47 }
  0x2e   :  { %846 = vmatpush.bf16.msra.mxu2 %v3010_v34  ;;  %860 = vmatpush.bf16.msra.mxu3 %v3014_v38  ;;  %v4161_v54 = vld [vmem:[#allocation5 + $0xb4] sm:$0xf]  ;;  %v2955_v55 = vld [vmem:[#allocation5 + $0xcc] sm:$0xf0]  ;;  %v2950_v57 = vor.u32 %v4160_v49, %v2947_v51  ;;  %v2954_v58 = vor.u32 %v4164_v53, %v2953_v52  ;;  %v4156_v60 = vld [vmem:[#allocation5 + $0x88] sm:$0xf0] }
  0x2f   :  { %v2917_v59 = vld [vmem:[#allocation5 + $0x70] sm:$0xf]  ;;  %v4153_v61 = vld [vmem:[#allocation5 + $0x74] sm:$0xf]  ;;  %v2958_v62 = vor.u32 %v4161_v54, %v2955_v55  ;;  %v2925_v0 = vld [vmem:[#allocation5 + $0x78] sm:$0xf] }
  0x30   :  { %819 = vmatpush.bf16.msra.mxu0 %v2974_v44  ;;  %v2919_v63 = vld [vmem:[#allocation5 + $0x8c] sm:$0xf0]  ;;  %v4157_v1 = vld [vmem:[#allocation5 + $0x90] sm:$0xf0]  ;;  %v4154_v2 = vld [vmem:[#allocation5 + $0x7c] sm:$0xf]  ;;  %v2918_v4 = vor.u32 %v4156_v60, %v2917_v59 }
  0x31   :  { %833 = vmatpush.bf16.msra.mxu1 %v2978_v45  ;;  %v2927_v3 = vld [vmem:[#allocation5 + $0x94] sm:$0xf0]  ;;  %v2922_v5 = vor.u32 %v4153_v61, %v2919_v63  ;;  %v2926_v6 = vor.u32 %v4157_v1, %v2925_v0  ;;  %v4149_v8 = vld [vmem:[#allocation5 + $0x50] sm:$0xf0]  ;;  %v4146_v9 = vld [vmem:[#allocation5 + $0x3c] sm:$0xf] }
  0x32   :  { %847 = vmatpush.bf16.msra.mxu2 %v2982_v46  ;;  %861 = vmatpush.bf16.msra.mxu3 %v2986_v50  ;;  %v2889_v7 = vld [vmem:[#allocation5 + $0x38] sm:$0xf]  ;;  %v2930_v10 = vor.u32 %v4154_v2, %v2927_v3  ;;  %v2897_v12 = vld [vmem:[#allocation5 + $0x40] sm:$0xf]  ;;  %v4150_v13 = vld [vmem:[#allocation5 + $0x58] sm:$0xf0] }
  0x33   :  { %v2891_v11 = vld [vmem:[#allocation5 + $0x54] sm:$0xf0]  ;;  %v4147_v14 = vld [vmem:[#allocation5 + $0x44] sm:$0xf]  ;;  %v2899_v15 = vld [vmem:[#allocation5 + $0x5c] sm:$0xf0]  ;;  %v2890_v16 = vor.u32 %v4149_v8, %v2889_v7  ;;  %v2898_v20 = vor.u32 %v4150_v13, %v2897_v12 }
  0x34   :  { %820 = vmatpush.bf16.msra.mxu0 %v2946_v56  ;;  %v2861_v17 = vld [vmem:[#allocation5] sm:$0xf]  ;;  %v4142_v18 = vld [vmem:[#allocation5 + $0x18] sm:$0xf0]  ;;  %v2894_v19 = vor.u32 %v4146_v9, %v2891_v11  ;;  %v4139_v21 = vld [vmem:[#allocation5 + $0x4] sm:$0xf]  ;;  %v2902_v24 = vor.u32 %v4147_v14, %v2899_v15 }
  0x35   :  { %834 = vmatpush.bf16.msra.mxu1 %v2950_v57  ;;  %v2863_v22 = vld [vmem:[#allocation5 + $0x1c] sm:$0xf0]  ;;  %v2869_v23 = vld [vmem:[#allocation5 + $0x8] sm:$0xf]  ;;  %v4143_v25 = vld [vmem:[#allocation5 + $0x20] sm:$0xf0]  ;;  %v2862_v31 = vor.u32 %v4142_v18, %v2861_v17 }
  0x36   :  { %848 = vmatpush.bf16.msra.mxu2 %v2954_v58  ;;  %862 = vmatpush.bf16.msra.mxu3 %v2958_v62  ;;  %v4140_v26 = vld [vmem:[#allocation5 + $0xc] sm:$0xf]  ;;  %v2871_v27 = vld [vmem:[#allocation5 + $0x24] sm:$0xf0]  ;;  %v3073_v28 = vld [vmem:[#allocation5 + $0x198] sm:$0xf]  ;;  %v2866_v35 = vor.u32 %v4139_v21, %v2863_v22  ;;  %v2870_v36 = vor.u32 %v4143_v25, %v2869_v23 }
  0x37   :  { %v4193_v29 = vld [vmem:[#allocation5 + $0x1b0] sm:$0xf0]  ;;  %v4190_v30 = vld [vmem:[#allocation5 + $0x19c] sm:$0xf]  ;;  %v3075_v32 = vld [vmem:[#allocation5 + $0x1b4] sm:$0xf0]  ;;  %v2874_v39 = vor.u32 %v4140_v26, %v2871_v27 }
  0x38   :  { %821 = vmatpush.bf16.msra.mxu0 %v2918_v4  ;;  %v3081_v33 = vld [vmem:[#allocation5 + $0x1a0] sm:$0xf]  ;;  %v4194_v34 = vld [vmem:[#allocation5 + $0x1b8] sm:$0xf0]  ;;  %v510_v37 = vld [vmem:[#allocation2] sm:$0xff]  ;;  %v3074_v40 = vor.u32 %v4193_v29, %v3073_v28  ;;  %v3078_v41 = vor.u32 %v4190_v30, %v3075_v32  ;;  %s4694_s26 = smov [#allocation14]  }
  0x39   :  { %835 = vmatpush.bf16.msra.mxu1 %v2922_v5  ;;  %v511_v38 = vld [vmem:[#allocation2 + $0x8] sm:$0xff]  ;;  %v3082_v42 = vor.u32 %v4194_v34, %v3081_v33  ;;  %v3045_v43 = vld [vmem:[#allocation5 + $0x160] sm:$0xf]  ;;  %v4183_v45 = vld [vmem:[#allocation5 + $0x164] sm:$0xf]  ;;  %s2841_s27 = sshll.u32 %s4694_s26, 4  ;;  %s2842_s27 = int_to_ptr.vmem [resolvable:$true] %s2841_s27 }
  0x3a   :  { %849 = vmatpush.bf16.msra.mxu2 %v2926_v6  ;;  %863 = vmatpush.bf16.msra.mxu3 %v2930_v10  ;;  %v4186_v44 = vld [vmem:[#allocation5 + $0x178] sm:$0xf0]  ;;  %v4775_v46 = vpack.c.bf16 %v511_v38, %v510_v37  ;;  %v3047_v47 = vld [vmem:[#allocation5 + $0x17c] sm:$0xf0]  ;;  %v3053_v48 = vld [vmem:[#allocation5 + $0x168] sm:$0xf] }
  0x3b   :  { %v4187_v49 = vld [vmem:[#allocation5 + $0x180] sm:$0xf0]  ;;  %v3046_v50 = vor.u32 %v4186_v44, %v3045_v43  ;;  %v3050_v51 = vor.u32 %v4183_v45, %v3047_v47  ;;  %v3017_v53 = vld [vmem:[#allocation5 + $0x128] sm:$0xf]  ;;  %v4176_v55 = vld [vmem:[#allocation5 + $0x12c] sm:$0xf] }
  0x3c   :  { %822 = vmatpush.bf16.msra.mxu0 %v2890_v16  ;;  %v3054_v52 = vor.u32 %v4187_v49, %v3053_v48  ;;  %v4179_v54 = vld [vmem:[#allocation5 + $0x140] sm:$0xf0]  ;;  %v3019_v56 = vld [vmem:[#allocation5 + $0x144] sm:$0xf0]  ;;  %v3025_v57 = vld [vmem:[#allocation5 + $0x130] sm:$0xf] }
  0x3d   :  { %836 = vmatpush.bf16.msra.mxu1 %v2894_v19  ;;  %v4180_v58 = vld [vmem:[#allocation5 + $0x148] sm:$0xf0]  ;;  %v2989_v59 = vld [vmem:[#allocation5 + $0xf0] sm:$0xf]  ;;  %v3018_v60 = vor.u32 %v4179_v54, %v3017_v53  ;;  %v4169_v62 = vld [vmem:[#allocation5 + $0xf4] sm:$0xf]  ;;  %v3022_v0 = vor.u32 %v4176_v55, %v3019_v56 }
  0x3e   :  { %850 = vmatpush.bf16.msra.mxu2 %v2898_v20  ;;  %864 = vmatpush.bf16.msra.mxu3 %v2902_v24  ;;  %v4172_v61 = vld [vmem:[#allocation5 + $0x108] sm:$0xf0]  ;;  %v2991_v63 = vld [vmem:[#allocation5 + $0x10c] sm:$0xf0]  ;;  %v3026_v1 = vor.u32 %v4180_v58, %v3025_v57  ;;  %v2997_v2 = vld [vmem:[#allocation5 + $0xf8] sm:$0xf] }
  0x3f   :  { %v3197_v3 = vld [vmem:[#allocation8 + $0xe0] sm:$0xf]  ;;  %v4225_v4 = vld [vmem:[#allocation8 + $0xec] sm:$0xf0]  ;;  %v4173_v5 = vld [vmem:[#allocation5 + $0x110] sm:$0xf0]  ;;  %v2990_v9 = vor.u32 %v4172_v61, %v2989_v59  ;;  %v2994_v13 = vor.u32 %v4169_v62, %v2991_v63 }
  0x40   :  { %823 = vmatpush.bf16.msra.mxu0 %v2862_v31  ;;  %v3198_v6 = vor.u32 %v4225_v4, %v3197_v3  ;;  %v3181_v7 = vld [vmem:[#allocation8 + $0xc0] sm:$0xf]  ;;  %v4221_v8 = vld [vmem:[#allocation8 + $0xcc] sm:$0xf0]  ;;  %v4165_v11 = vld [vmem:[#allocation5 + $0xd0] sm:$0xf0]  ;;  %v2998_v14 = vor.u32 %v4173_v5, %v2997_v2 }
  0x41   :  { %837 = vmatpush.bf16.msra.mxu1 %v2866_v35  ;;  %v2961_v10 = vld [vmem:[#allocation5 + $0xb8] sm:$0xf]  ;;  %v3182_v12 = vor.u32 %v4221_v8, %v3181_v7  ;;  %v4162_v15 = vld [vmem:[#allocation5 + $0xbc] sm:$0xf]  ;;  %v3165_v16 = vld [vmem:[#allocation8 + $0xa0] sm:$0xf] }
  0x42   :  { %851 = vmatpush.bf16.msra.mxu2 %v2870_v36  ;;  %865 = vmatpush.bf16.msra.mxu3 %v2874_v39  ;;  %v4217_v17 = vld [vmem:[#allocation8 + $0xac] sm:$0xf0]  ;;  %v2969_v19 = vld [vmem:[#allocation5 + $0xc0] sm:$0xf]  ;;  %v4166_v20 = vld [vmem:[#allocation5 + $0xd8] sm:$0xf0]  ;;  %v2962_v21 = vor.u32 %v4165_v11, %v2961_v10 }
  0x43   :  { %824 = vmatmul.bf16.vlgmr.msra.gmra.mxu0 %v4775_v46  ;;  %v2963_v18 = vld [vmem:[#allocation5 + $0xd4] sm:$0xf0]  ;;  %v2933_v22 = vld [vmem:[#allocation5 + $0x80] sm:$0xf]  ;;  %v4158_v23 = vld [vmem:[#allocation5 + $0x98] sm:$0xf0]  ;;  %v3166_v24 = vor.u32 %v4217_v17, %v3165_v16  ;;  %v2970_v26 = vor.u32 %v4166_v20, %v2969_v19 }
  0x44   :  { %872 = vmatpush.bf16.msrb.mxu0 %v3074_v40  ;;  %838 = vmatmul.bf16.vlgmr.msra.gmra.mxu1 %v4775_v46  ;;  %v2966_v25 = vor.u32 %v4162_v15, %v2963_v18  ;;  %v4155_v27 = vld [vmem:[#allocation5 + $0x84] sm:$0xf]  ;;  %v3149_v28 = vld [vmem:[#allocation8 + $0x80] sm:$0xf]  ;;  %v4213_v29 = vld [vmem:[#allocation8 + $0x8c] sm:$0xf0]  ;;  %v2934_v33 = vor.u32 %v4158_v23, %v2933_v22 }
  0x45   :  { %886 = vmatpush.bf16.msrb.mxu1 %v3078_v41  ;;  %852 = vmatmul.bf16.vlgmr.msra.gmra.mxu2 %v4775_v46  ;;  %v2935_v30 = vld [vmem:[#allocation5 + $0x9c] sm:$0xf0]  ;;  %v2941_v31 = vld [vmem:[#allocation5 + $0x88] sm:$0xf]  ;;  %v4159_v32 = vld [vmem:[#allocation5 + $0xa0] sm:$0xf0]  ;;  %v3150_v36 = vor.u32 %v4213_v29, %v3149_v28 }
  0x46   :  { %900 = vmatpush.bf16.msrb.mxu2 %v3082_v42  ;;  %866 = vmatmul.bf16.vlgmr.msra.gmra.mxu3 %v4775_v46  ;;  %v2905_v34 = vld [vmem:[#allocation5 + $0x48] sm:$0xf]  ;;  %v4151_v35 = vld [vmem:[#allocation5 + $0x60] sm:$0xf0]  ;;  %v2938_v37 = vor.u32 %v4155_v27, %v2935_v30  ;;  %v2942_v38 = vor.u32 %v4159_v32, %v2941_v31  ;;  %v4148_v39 = vld [vmem:[#allocation5 + $0x4c] sm:$0xf] }
  0x47   :  { %2092 = vmatpush.bf16.msrb.mxu3 %v3198_v6  ;;  %v3133_v40 = vld [vmem:[#allocation8 + $0x60] sm:$0xf]  ;;  %v4209_v41 = vld [vmem:[#allocation8 + $0x6c] sm:$0xf0]  ;;  %v2913_v43 = vld [vmem:[#allocation5 + $0x50] sm:$0xf]  ;;  %v2906_v48 = vor.u32 %v4151_v35, %v2905_v34 }
  0x48   :  { %873 = vmatpush.bf16.msrb.mxu0 %v3046_v50  ;;  %v2907_v42 = vld [vmem:[#allocation5 + $0x64] sm:$0xf0]  ;;  %v4152_v44 = vld [vmem:[#allocation5 + $0x68] sm:$0xf0]  ;;  %v2877_v45 = vld [vmem:[#allocation5 + $0x10] sm:$0xf] }
  0x49   :  { %887 = vmatpush.bf16.msrb.mxu1 %v3050_v51  ;;  %v4144_v47 = vld [vmem:[#allocation5 + $0x28] sm:$0xf0]  ;;  %v4141_v49 = vld [vmem:[#allocation5 + $0x14] sm:$0xf]  ;;  %v2879_v50 = vld [vmem:[#allocation5 + $0x2c] sm:$0xf0]  ;;  %v3134_v51 = vor.u32 %v4209_v41, %v3133_v40  ;;  %v2910_v53 = vor.u32 %v4148_v39, %v2907_v42  ;;  %v2914_v54 = vor.u32 %v4152_v44, %v2913_v43 }
  0x4a   :  { %901 = vmatpush.bf16.msrb.mxu2 %v3054_v52  ;;  %v3117_v52 = vld [vmem:[#allocation8 + $0x40] sm:$0xf]  ;;  %v4205_v55 = vld [vmem:[#allocation8 + $0x4c] sm:$0xf0]  ;;  %v4145_v57 = vld [vmem:[#allocation5 + $0x30] sm:$0xf0]  ;;  %v2878_v62 = vor.u32 %v4144_v47, %v2877_v45  ;;  %v2882_v2 = vor.u32 %v4141_v49, %v2879_v50 }
  0x4b   :  { %2093 = vmatpush.bf16.msrb.mxu3 %v3182_v12  ;;  %v2885_v56 = vld [vmem:[#allocation5 + $0x18] sm:$0xf]  ;;  %v3325_v58 = vld [vmem:[#allocation8 + $0x1e0] sm:$0xf]  ;;  %s2843_s29 = sshll.u32 %s4872_s9, 4  ;;  %s2844_s29 = int_to_ptr.hbm [resolvable:$true] %s2843_s29 }
  0x4c   :  { %874 = vmatpush.bf16.msrb.mxu0 %v3018_v60  ;;  %v4257_v59 = vld [vmem:[#allocation8 + $0x1ec] sm:$0xf0]  ;;  %v3453_v60 = vld [vmem:[#allocation8 + $0x2e0] sm:$0xf]  ;;  %v2886_v3 = vor.u32 %v4145_v57, %v2885_v56 }
  0x4d   :  { %888 = vmatpush.bf16.msrb.mxu1 %v3022_v0  ;;  %v4289_v61 = vld [vmem:[#allocation8 + $0x2ec] sm:$0xf0]  ;;  %v3581_v63 = vld [vmem:[#allocation8 + $0x3e0] sm:$0xf]  ;;  %v3326_v4 = vor.u32 %v4257_v59, %v3325_v58 }
  0x4e   :  { %902 = vmatpush.bf16.msrb.mxu2 %v3026_v1  ;;  %v4321_v0 = vld [vmem:[#allocation8 + $0x3ec] sm:$0xf0]  ;;  %v3118_v1 = vor.u32 %v4205_v55, %v3117_v52  ;;  %v3309_v5 = vld [vmem:[#allocation8 + $0x1c0] sm:$0xf]  ;;  %v3454_v6 = vor.u32 %v4289_v61, %v3453_v60 }
  0x4f   :  { %2094 = vmatpush.bf16.msrb.mxu3 %v3166_v24  ;;  %v3101_v7 = vld [vmem:[#allocation8 + $0x20] sm:$0xf]  ;;  %v4201_v8 = vld [vmem:[#allocation8 + $0x2c] sm:$0xf0]  ;;  %v3582_v10 = vor.u32 %v4321_v0, %v3581_v63 }
  0x50   :  { %875 = vmatpush.bf16.msrb.mxu0 %v2990_v9  ;;  %v4253_v9 = vld [vmem:[#allocation8 + $0x1cc] sm:$0xf0]  ;;  %v3437_v11 = vld [vmem:[#allocation8 + $0x2c0] sm:$0xf]  ;;  %v3102_v16 = vor.u32 %v4201_v8, %v3101_v7 }
  0x51   :  { %889 = vmatpush.bf16.msrb.mxu1 %v2994_v13  ;;  %v4285_v12 = vld [vmem:[#allocation8 + $0x2cc] sm:$0xf0]  ;;  %v3565_v13 = vld [vmem:[#allocation8 + $0x3c0] sm:$0xf]  ;;  %v3310_v17 = vor.u32 %v4253_v9, %v3309_v5 }
  0x52   :  { %903 = vmatpush.bf16.msrb.mxu2 %v2998_v14  ;;  %v4317_v14 = vld [vmem:[#allocation8 + $0x3cc] sm:$0xf0]  ;;  %v3293_v15 = vld [vmem:[#allocation8 + $0x1a0] sm:$0xf]  ;;  %v3438_v19 = vor.u32 %v4285_v12, %v3437_v11 }
  0x53   :  { %2095 = vmatpush.bf16.msrb.mxu3 %v3150_v36  ;;  %v4249_v18 = vld [vmem:[#allocation8 + $0x1ac] sm:$0xf0]  ;;  %v3085_v20 = vld [vmem:[#allocation8] sm:$0xf]  ;;  %v3566_v22 = vor.u32 %v4317_v14, %v3565_v13 }
  0x54   :  { %876 = vmatpush.bf16.msrb.mxu0 %v2962_v21  ;;  %v4197_v21 = vld [vmem:[#allocation8 + $0xc] sm:$0xf0]  ;;  %v3421_v23 = vld [vmem:[#allocation8 + $0x2a0] sm:$0xf]  ;;  %v3294_v30 = vor.u32 %v4249_v18, %v3293_v15 }
  0x55   :  { %890 = vmatpush.bf16.msrb.mxu1 %v2966_v25  ;;  %v4281_v24 = vld [vmem:[#allocation8 + $0x2ac] sm:$0xf0]  ;;  %v3549_v25 = vld [vmem:[#allocation8 + $0x3a0] sm:$0xf]  ;;  %v3086_v29 = vor.u32 %v4197_v21, %v3085_v20 }
  0x56   :  { %904 = vmatpush.bf16.msrb.mxu2 %v2970_v26  ;;  %v4313_v26 = vld [vmem:[#allocation8 + $0x3ac] sm:$0xf0]  ;;  %v3709_v27 = vld [vmem:[#allocation8 + $0x4e0] sm:$0xf] }
  0x57   :  { %2096 = vmatpush.bf16.msrb.mxu3 %v3134_v51  ;;  %v4353_v28 = vld [vmem:[#allocation8 + $0x4ec] sm:$0xf0]  ;;  %v3277_v31 = vld [vmem:[#allocation8 + $0x180] sm:$0xf]  ;;  %v3550_v34 = vor.u32 %v4313_v26, %v3549_v25  ;;  %v4223_v25 = vld [vmem:[#allocation8 + $0xe4] sm:$0xf] }
  0x58   :  { %877 = vmatpush.bf16.msrb.mxu0 %v2934_v33  ;;  %v4245_v32 = vld [vmem:[#allocation8 + $0x18c] sm:$0xf0]  ;;  %v3422_v33 = vor.u32 %v4281_v24, %v3421_v23  ;;  %v3405_v35 = vld [vmem:[#allocation8 + $0x280] sm:$0xf]  ;;  %v3199_v26 = vld [vmem:[#allocation8 + $0xf0] sm:$0xf0] }
  0x59   :  { %891 = vmatpush.bf16.msrb.mxu1 %v2938_v37  ;;  %v4277_v36 = vld [vmem:[#allocation8 + $0x28c] sm:$0xf0]  ;;  %v3533_v37 = vld [vmem:[#allocation8 + $0x380] sm:$0xf]  ;;  %v3278_v41 = vor.u32 %v4245_v32, %v3277_v31 }
  0x5a   :  { %905 = vmatpush.bf16.msrb.mxu2 %v2942_v38  ;;  %v3710_v38 = vor.u32 %v4353_v28, %v3709_v27  ;;  %v4309_v39 = vld [vmem:[#allocation8 + $0x38c] sm:$0xf0]  ;;  %v3693_v40 = vld [vmem:[#allocation8 + $0x4c0] sm:$0xf]  ;;  %v3406_v44 = vor.u32 %v4277_v36, %v3405_v35 }
  0x5b   :  { %2097 = vmatpush.bf16.msrb.mxu3 %v3118_v1  ;;  %v3261_v42 = vld [vmem:[#allocation8 + $0x160] sm:$0xf]  ;;  %v4241_v43 = vld [vmem:[#allocation8 + $0x16c] sm:$0xf0]  ;;  %v3534_v45 = vor.u32 %v4309_v39, %v3533_v37  ;;  %v4219_v37 = vld [vmem:[#allocation8 + $0xc4] sm:$0xf] }
  0x5c   :  { %878 = vmatpush.bf16.msrb.mxu0 %v2906_v48  ;;  %v3389_v47 = vld [vmem:[#allocation8 + $0x260] sm:$0xf]  ;;  %v4273_v48 = vld [vmem:[#allocation8 + $0x26c] sm:$0xf0] }
  0x5d   :  { %892 = vmatpush.bf16.msrb.mxu1 %v2910_v53  ;;  %v3517_v49 = vld [vmem:[#allocation8 + $0x360] sm:$0xf]  ;;  %v4305_v51 = vld [vmem:[#allocation8 + $0x36c] sm:$0xf0]  ;;  %v3390_v57 = vor.u32 %v4273_v48, %v3389_v47 }
  0x5e   :  { %906 = vmatpush.bf16.msrb.mxu2 %v2914_v54  ;;  %v3677_v52 = vld [vmem:[#allocation8 + $0x4a0] sm:$0xf]  ;;  %v4345_v53 = vld [vmem:[#allocation8 + $0x4ac] sm:$0xf0]  ;;  %v3262_v54 = vor.u32 %v4241_v43, %v3261_v42  ;;  %v3518_v58 = vor.u32 %v4305_v51, %v3517_v49 }
  0x5f   :  { %2098 = vmatpush.bf16.msrb.mxu3 %v3102_v16  ;;  %v3245_v55 = vld [vmem:[#allocation8 + $0x140] sm:$0xf]  ;;  %v4237_v56 = vld [vmem:[#allocation8 + $0x14c] sm:$0xf0] }
  0x60   :  { %879 = vmatpush.bf16.msrb.mxu0 %v2878_v62  ;;  %v3373_v59 = vld [vmem:[#allocation8 + $0x240] sm:$0xf]  ;;  %v4269_v60 = vld [vmem:[#allocation8 + $0x24c] sm:$0xf0]  ;;  %v3678_v62 = vor.u32 %v4345_v53, %v3677_v52  ;;  %v3167_v52 = vld [vmem:[#allocation8 + $0xb0] sm:$0xf0] }
  0x61   :  { %893 = vmatpush.bf16.msrb.mxu1 %v2882_v2  ;;  %v3501_v61 = vld [vmem:[#allocation8 + $0x340] sm:$0xf]  ;;  %v4301_v63 = vld [vmem:[#allocation8 + $0x34c] sm:$0xf0]  ;;  %v3246_v2 = vor.u32 %v4237_v56, %v3245_v55 }
  0x62   :  { %907 = vmatpush.bf16.msrb.mxu2 %v2886_v3  ;;  %v3661_v0 = vld [vmem:[#allocation8 + $0x480] sm:$0xf]  ;;  %v4341_v1 = vld [vmem:[#allocation8 + $0x48c] sm:$0xf0] }
  0x63   :  { %880 = vmatmul.bf16.vlgmr.msrb.gmra.mxu0 %v4775_v46  ;;  %2099 = vmatpush.bf16.msrb.mxu3 %v3086_v29  ;;  %v3229_v3 = vld [vmem:[#allocation8 + $0x120] sm:$0xf]  ;;  %v4233_v5 = vld [vmem:[#allocation8 + $0x12c] sm:$0xf0]  ;;  %v3662_v9 = vor.u32 %v4341_v1, %v3661_v0  ;;  %v3151_v0 = vld [vmem:[#allocation8 + $0x90] sm:$0xf0] }
  0x64   :  { %2106 = vmatpush.bf16.msra.mxu0 %v3326_v4  ;;  %894 = vmatmul.bf16.vlgmr.msrb.gmra.mxu1 %v4775_v46  ;;  %v3374_v4 = vor.u32 %v4269_v60, %v3373_v59  ;;  %v3357_v7 = vld [vmem:[#allocation8 + $0x220] sm:$0xf]  ;;  %v4265_v8 = vld [vmem:[#allocation8 + $0x22c] sm:$0xf0]  ;;  %v3230_v12 = vor.u32 %v4233_v5, %v3229_v3 }
  0x65   :  { %2120 = vmatpush.bf16.msra.mxu1 %v3454_v6  ;;  %908 = vmatmul.bf16.vlgmr.msrb.gmra.mxu2 %v4775_v46  ;;  %v4349_v46 = vld [vmem:[#allocation8 + $0x4cc] sm:$0xf0]  ;;  %v3502_v6 = vor.u32 %v4301_v63, %v3501_v61  ;;  %v3213_v13 = vld [vmem:[#allocation8 + $0x100] sm:$0xf]  ;;  %v3358_v16 = vor.u32 %v4265_v8, %v3357_v7 }
  0x66   :  { %2134 = vmatpush.bf16.msra.mxu2 %v3582_v10  ;;  %v3694_v50 = vor.u32 %v4349_v46, %v3693_v40  ;;  %v3485_v10 = vld [vmem:[#allocation8 + $0x320] sm:$0xf]  ;;  %v4297_v11 = vld [vmem:[#allocation8 + $0x32c] sm:$0xf0] }
  0x67   :  { %2148 = vmatpush.bf16.msra.mxu3 %v3710_v38  ;;  %v4229_v14 = vld [vmem:[#allocation8 + $0x10c] sm:$0xf0]  ;;  %v3837_v15 = vld [vmem:[#allocation8 + $0x5e0] sm:$0xf]  ;;  %v3486_v18 = vor.u32 %v4297_v11, %v3485_v10  ;;  %v3183_v38 = vld [vmem:[#allocation8 + $0xd0] sm:$0xf0] }
  0x68   :  { %2107 = vmatpush.bf16.msra.mxu0 %v3310_v17  ;;  %v4385_v17 = vld [vmem:[#allocation8 + $0x5ec] sm:$0xf0]  ;;  %v3469_v21 = vld [vmem:[#allocation8 + $0x300] sm:$0xf]  ;;  %v3214_v27 = vor.u32 %v4229_v14, %v3213_v13  ;;  %v3186_v42 = vor.u32 %v4219_v37, %v3183_v38  ;;  %v4207_v10 = vld [vmem:[#allocation8 + $0x64] sm:$0xf] }
  0x69   :  { %2121 = vmatpush.bf16.msra.mxu1 %v3438_v19  ;;  %v3341_v19 = vld [vmem:[#allocation8 + $0x200] sm:$0xf]  ;;  %v4261_v20 = vld [vmem:[#allocation8 + $0x20c] sm:$0xf0]  ;;  %v3838_v29 = vor.u32 %v4385_v17, %v3837_v15 }
  0x6a   :  { %2135 = vmatpush.bf16.msra.mxu2 %v3566_v22  ;;  %v4293_v22 = vld [vmem:[#allocation8 + $0x30c] sm:$0xf0]  ;;  %v3965_v23 = vld [vmem:[#allocation8 + $0x6e0] sm:$0xf]  ;;  %v3342_v28 = vor.u32 %v4261_v20, %v3341_v19 }
  0x6b   :  { %2149 = vmatpush.bf16.msra.mxu3 %v3694_v50  ;;  %v4417_v24 = vld [vmem:[#allocation8 + $0x6ec] sm:$0xf0]  ;;  %v3821_v31 = vld [vmem:[#allocation8 + $0x5c0] sm:$0xf]  ;;  %v4215_v50 = vld [vmem:[#allocation8 + $0xa4] sm:$0xf] }
  0x6c   :  { %2108 = vmatpush.bf16.msra.mxu0 %v3294_v30  ;;  %v3470_v30 = vor.u32 %v4293_v22, %v3469_v21  ;;  %v4381_v32 = vld [vmem:[#allocation8 + $0x5cc] sm:$0xf0]  ;;  %v3949_v35 = vld [vmem:[#allocation8 + $0x6c0] sm:$0xf]  ;;  %v3170_v53 = vor.u32 %v4215_v50, %v3167_v52  ;;  %v4203_v22 = vld [vmem:[#allocation8 + $0x44] sm:$0xf] }
  0x6d   :  { %2122 = vmatpush.bf16.msra.mxu1 %v3422_v33  ;;  %v3966_v33 = vor.u32 %v4417_v24, %v3965_v23  ;;  %v4413_v36 = vld [vmem:[#allocation8 + $0x6cc] sm:$0xf0]  ;;  %v3822_v39 = vor.u32 %v4381_v32, %v3821_v31  ;;  %v3805_v40 = vld [vmem:[#allocation8 + $0x5a0] sm:$0xf]  ;;  %v3119_v24 = vld [vmem:[#allocation8 + $0x50] sm:$0xf0] }
  0x6e   :  { %2136 = vmatpush.bf16.msra.mxu2 %v3550_v34  ;;  %v3202_v34 = vor.u32 %v4223_v25, %v3199_v26  ;;  %v4377_v46 = vld [vmem:[#allocation8 + $0x5ac] sm:$0xf0]  ;;  %v3933_v48 = vld [vmem:[#allocation8 + $0x6a0] sm:$0xf]  ;;  %v3122_v25 = vor.u32 %v4203_v22, %v3119_v24  ;;  %v3711_v22 = vld [vmem:[#allocation8 + $0x4f0] sm:$0xf0] }
  0x6f   :  { %2150 = vmatpush.bf16.msra.mxu3 %v3678_v62  ;;  %v3806_v43 = vor.u32 %v4377_v46, %v3805_v40  ;;  %v4409_v49 = vld [vmem:[#allocation8 + $0x6ac] sm:$0xf0]  ;;  %v3773_v56 = vld [vmem:[#allocation8 + $0x560] sm:$0xf]  ;;  %v4211_v62 = vld [vmem:[#allocation8 + $0x84] sm:$0xf] }
  0x70   :  { %2109 = vmatpush.bf16.msra.mxu0 %v3278_v41  ;;  %v3950_v41 = vor.u32 %v4413_v36, %v3949_v35  ;;  %v3934_v51 = vor.u32 %v4409_v49, %v3933_v48  ;;  %v4337_v55 = vld [vmem:[#allocation8 + $0x46c] sm:$0xf0]  ;;  %v3917_v60 = vld [vmem:[#allocation8 + $0x680] sm:$0xf]  ;;  %v3154_v1 = vor.u32 %v4211_v62, %v3151_v0  ;;  %v3103_v35 = vld [vmem:[#allocation8 + $0x30] sm:$0xf0] }
  0x71   :  { %2123 = vmatpush.bf16.msra.mxu1 %v3406_v44  ;;  %v3789_v44 = vld [vmem:[#allocation8 + $0x580] sm:$0xf]  ;;  %v4405_v61 = vld [vmem:[#allocation8 + $0x68c] sm:$0xf0]  ;;  %v4195_v46 = vld [vmem:[#allocation8 + $0x4] sm:$0xf] }
  0x72   :  { %2137 = vmatpush.bf16.msra.mxu2 %v3534_v45  ;;  %v4373_v45 = vld [vmem:[#allocation8 + $0x58c] sm:$0xf0]  ;;  %v3918_v63 = vor.u32 %v4405_v61, %v3917_v60  ;;  %v3757_v5 = vld [vmem:[#allocation8 + $0x540] sm:$0xf]  ;;  %v3455_v0 = vld [vmem:[#allocation8 + $0x2f0] sm:$0xf0] }
  0x73   :  { %2151 = vmatpush.bf16.msra.mxu3 %v3662_v9  ;;  %v3790_v47 = vor.u32 %v4373_v45, %v3789_v44  ;;  %v4333_v3 = vld [vmem:[#allocation8 + $0x44c] sm:$0xf0]  ;;  %v3901_v8 = vld [vmem:[#allocation8 + $0x660] sm:$0xf] }
  0x74   :  { %2110 = vmatpush.bf16.msra.mxu0 %v3262_v54  ;;  %v3645_v54 = vld [vmem:[#allocation8 + $0x460] sm:$0xf]  ;;  %v4401_v9 = vld [vmem:[#allocation8 + $0x66c] sm:$0xf0] }
  0x75   :  { %2124 = vmatpush.bf16.msra.mxu1 %v3390_v57  ;;  %v3646_v57 = vor.u32 %v4337_v55, %v3645_v54  ;;  %v3902_v11 = vor.u32 %v4401_v9, %v3901_v8  ;;  %v3613_v14 = vld [vmem:[#allocation8 + $0x420] sm:$0xf]  ;;  %v4329_v15 = vld [vmem:[#allocation8 + $0x42c] sm:$0xf0] }
  0x76   :  { %2138 = vmatpush.bf16.msra.mxu2 %v3518_v58  ;;  %v4369_v58 = vld [vmem:[#allocation8 + $0x56c] sm:$0xf0]  ;;  %v3614_v17 = vor.u32 %v4329_v15, %v3613_v14  ;;  %v3885_v20 = vld [vmem:[#allocation8 + $0x640] sm:$0xf] }
  0x77   :  { %v3774_v59 = vor.u32 %v4369_v58, %v3773_v56  ;;  %2152 = vmatpush.bf16.msra.mxu3 %v3646_v57  ;;  %v4397_v21 = vld [vmem:[#allocation8 + $0x64c] sm:$0xf0]  ;;  %v3597_v26 = vld [vmem:[#allocation8 + $0x400] sm:$0xf]  ;;  %v4255_v57 = vld [vmem:[#allocation8 + $0x1e4] sm:$0xf] }
  0x78   :  { %2111 = vmatpush.bf16.msra.mxu0 %v3246_v2  ;;  %v3629_v2 = vld [vmem:[#allocation8 + $0x440] sm:$0xf]  ;;  %v3886_v23 = vor.u32 %v4397_v21, %v3885_v20  ;;  %v3327_v58 = vld [vmem:[#allocation8 + $0x1f0] sm:$0xf0]  ;;  %v4351_v21 = vld [vmem:[#allocation8 + $0x4e4] sm:$0xf] }
  0x79   :  { %2125 = vmatpush.bf16.msra.mxu1 %v3374_v4  ;;  %v3630_v4 = vor.u32 %v4333_v3, %v3629_v2  ;;  %v3869_v32 = vld [vmem:[#allocation8 + $0x620] sm:$0xf] }
  0x7a   :  { %2139 = vmatpush.bf16.msra.mxu2 %v3502_v6  ;;  %v4365_v6 = vld [vmem:[#allocation8 + $0x54c] sm:$0xf0]  ;;  %v3853_v38 = vld [vmem:[#allocation8 + $0x600] sm:$0xf] }
  0x7b   :  { %v3758_v7 = vor.u32 %v4365_v6, %v3757_v5  ;;  %2153 = vmatpush.bf16.msra.mxu3 %v3630_v4  ;;  %v3330_v5 = vor.u32 %v4255_v57, %v3327_v58  ;;  %v3551_v57 = vld [vmem:[#allocation8 + $0x3b0] sm:$0xf0] }
  0x7c   :  { %2112 = vmatpush.bf16.msra.mxu0 %v3230_v12  ;;  %v3135_v12 = vld [vmem:[#allocation8 + $0x70] sm:$0xf0] }
  0x7d   :  { %2126 = vmatpush.bf16.msra.mxu1 %v3358_v16  ;;  %v3138_v13 = vor.u32 %v4207_v10, %v3135_v12  ;;  %v3741_v16 = vld [vmem:[#allocation8 + $0x520] sm:$0xf]  ;;  %v3311_v12 = vld [vmem:[#allocation8 + $0x1d0] sm:$0xf0] }
  0x7e   :  { %2140 = vmatpush.bf16.msra.mxu2 %v3486_v18  ;;  %v4361_v18 = vld [vmem:[#allocation8 + $0x52c] sm:$0xf0] }
  0x7f   :  { %v3742_v19 = vor.u32 %v4361_v18, %v3741_v16  ;;  %2154 = vmatpush.bf16.msra.mxu3 %v3614_v17  ;;  %v3439_v16 = vld [vmem:[#allocation8 + $0x2d0] sm:$0xf0]  ;;  %v4319_v17 = vld [vmem:[#allocation8 + $0x3e4] sm:$0xf] }
  0x80   :  { %2113 = vmatpush.bf16.msra.mxu0 %v3214_v27  ;;  %v4325_v27 = vld [vmem:[#allocation8 + $0x40c] sm:$0xf0]  ;;  %v3583_v18 = vld [vmem:[#allocation8 + $0x3f0] sm:$0xf0] }
  0x81   :  { %2127 = vmatpush.bf16.msra.mxu1 %v3342_v28  ;;  %v3725_v28 = vld [vmem:[#allocation8 + $0x500] sm:$0xf] }
  0x82   :  { %2141 = vmatpush.bf16.msra.mxu2 %v3470_v30  ;;  %v4357_v30 = vld [vmem:[#allocation8 + $0x50c] sm:$0xf0] }
  0x83   :  { %v3726_v31 = vor.u32 %v4357_v30, %v3725_v28  ;;  %v3295_v28 = vld [vmem:[#allocation8 + $0x1b0] sm:$0xf0] }
  0x84   :  { %2162 = vmatpush.bf16.msrb.mxu0 %v3838_v29  ;;  %v3598_v29 = vor.u32 %v4325_v27, %v3597_v26 }
  0x85   :  { %2176 = vmatpush.bf16.msrb.mxu1 %v3966_v33  ;;  %v4393_v33 = vld [vmem:[#allocation8 + $0x62c] sm:$0xf0] }
  0x86   :  { %2190 = vmatpush.bf16.msrb.mxu2 %v3202_v34  ;;  %2155 = vmatpush.bf16.msra.mxu3 %v3598_v29  ;;  %v4199_v34 = vld [vmem:[#allocation8 + $0x24] sm:$0xf]  ;;  %v3870_v36 = vor.u32 %v4393_v33, %v3869_v32  ;;  %v3423_v32 = vld [vmem:[#allocation8 + $0x2b0] sm:$0xf0] }
  0x87   :  { %v3106_v37 = vor.u32 %v4199_v34, %v3103_v35  ;;  %v3586_v35 = vor.u32 %v4319_v17, %v3583_v18  ;;  %v4267_v17 = vld [vmem:[#allocation8 + $0x244] sm:$0xf]  ;;  %v3375_v18 = vld [vmem:[#allocation8 + $0x250] sm:$0xf0] }
  0x88   :  { %2163 = vmatpush.bf16.msrb.mxu0 %v3822_v39  ;;  %v4389_v39 = vld [vmem:[#allocation8 + $0x60c] sm:$0xf0] }
  0x89   :  { %2177 = vmatpush.bf16.msrb.mxu1 %v3950_v41  ;;  %v3854_v40 = vor.u32 %v4389_v39, %v3853_v38  ;;  %v3087_v41 = vld [vmem:[#allocation8 + $0x10] sm:$0xf0] }
  0x8a   :  { %2191 = vmatpush.bf16.msrb.mxu2 %v3186_v42  ;;  %v3090_v42 = vor.u32 %v4195_v46, %v3087_v41  ;;  %v4315_v41 = vld [vmem:[#allocation8 + $0x3c4] sm:$0xf] }
  0x8c   :  { %2164 = vmatpush.bf16.msrb.mxu0 %v3806_v43  ;;  %v4784_v43 = vld [vmem:[#allocation7] sm:$0xff] }
  0x8d   :  { %2178 = vmatpush.bf16.msrb.mxu1 %v3934_v51  ;;  %v515_v48 = vperm.slane %v4784_v43, 1  ;;  %v516_v51 = vperm.slane %v4784_v43, 2 }
  0x8e   :  { %2192 = vmatpush.bf16.msrb.mxu2 %v3170_v53  ;;  %v517_v53 = vperm.slane %v4784_v43, 3 }
  0x90   :  { %2165 = vmatpush.bf16.msrb.mxu0 %v3790_v47  ;;  %v514_v47 = vperm.slane %v4784_v43, 0 }
  0x91   :  { %2179 = vmatpush.bf16.msrb.mxu1 %v3918_v63 }
  0x92   :  { %2193 = vmatpush.bf16.msrb.mxu2 %v3154_v1 }
  0x94   :  { %2166 = vmatpush.bf16.msrb.mxu0 %v3774_v59  ;;  %v4287_v59 = vld [vmem:[#allocation8 + $0x2e4] sm:$0xf] }
  0x95   :  { %2180 = vmatpush.bf16.msrb.mxu1 %v3902_v11  ;;  %v3458_v6 = vor.u32 %v4287_v59, %v3455_v0  ;;  %v4251_v11 = vld [vmem:[#allocation8 + $0x1c4] sm:$0xf] }
  0x96   :  { %2194 = vmatpush.bf16.msrb.mxu2 %v3138_v13  ;;  %v4283_v13 = vld [vmem:[#allocation8 + $0x2c4] sm:$0xf]  ;;  %v3314_v29 = vor.u32 %v4251_v11, %v3311_v12  ;;  %v3663_v11 = vld [vmem:[#allocation8 + $0x490] sm:$0xf0] }
  0x97   :  { %v3442_v30 = vor.u32 %v4283_v13, %v3439_v16  ;;  %v4271_v0 = vld [vmem:[#allocation8 + $0x264] sm:$0xf]  ;;  %v3247_v16 = vld [vmem:[#allocation8 + $0x150] sm:$0xf0] }
  0x98   :  { %2167 = vmatpush.bf16.msrb.mxu0 %v3758_v7  ;;  %v4235_v12 = vld [vmem:[#allocation8 + $0x144] sm:$0xf] }
  0x99   :  { %2181 = vmatpush.bf16.msrb.mxu1 %v3886_v23  ;;  %v4247_v23 = vld [vmem:[#allocation8 + $0x1a4] sm:$0xf] }
  0x9a   :  { %2195 = vmatpush.bf16.msrb.mxu2 %v3122_v25 }
  0x9c   :  { %2168 = vmatpush.bf16.msrb.mxu0 %v3742_v19 }
  0x9d   :  { %2182 = vmatpush.bf16.msrb.mxu1 %v3870_v36  ;;  %v3714_v36 = vor.u32 %v4351_v21, %v3711_v22 }
  0x9e   :  { %2196 = vmatpush.bf16.msrb.mxu2 %v3106_v37  ;;  %v3298_v37 = vor.u32 %v4247_v23, %v3295_v28  ;;  %v4303_v23 = vld [vmem:[#allocation8 + $0x364] sm:$0xf]  ;;  %v3647_v28 = vld [vmem:[#allocation8 + $0x470] sm:$0xf0] }
  0xa0   :  { %2169 = vmatpush.bf16.msrb.mxu0 %v3726_v31  ;;  %v4279_v31 = vld [vmem:[#allocation8 + $0x2a4] sm:$0xf] }
  0xa1   :  { %2183 = vmatpush.bf16.msrb.mxu1 %v3854_v40 }
  0xa2   :  { %2197 = vmatpush.bf16.msrb.mxu2 %v3090_v42  ;;  %v3567_v42 = vld [vmem:[#allocation8 + $0x3d0] sm:$0xf0] }
  0xc0   :  { %v825_v44 = vpop.f32.mrf.mxu0 }
  0xc1   :  { %v839_v45 = vpop.f32.mrf.mxu1  ;;  %v826_v49 = vadd.f32 %v825_v44, %v514_v47 }
  0xc2   :  { %v840_v50 = vadd.f32 %v839_v45, %v515_v48 }
  0xc3   :  { %v928_v60 = vmul.f32 0.2, %v826_v49  ;;  %vm914_vm0 = vcmp.gt.f32.partialorder %v826_v49, 0.0 }
  0xc4   :  { %v929_v61 = vmul.f32 0.2, %v840_v50  ;;  %vm915_vm1 = vcmp.gt.f32.partialorder %v840_v50, 0.0 }
  0xc5   :  { %v942_v7 = vsel %vm914_vm0, %v826_v49, %v928_v60  ;;  %v3695_v49 = vld [vmem:[#allocation8 + $0x4d0] sm:$0xf0]  ;;  %v4343_v60 = vld [vmem:[#allocation8 + $0x4a4] sm:$0xf] }
  0xc6   :  { %v943_v8 = vsel %vm915_vm1, %v840_v50, %v929_v61  ;;  %v4243_v50 = vld [vmem:[#allocation8 + $0x184] sm:$0xf]  ;;  %v3679_v61 = vld [vmem:[#allocation8 + $0x4b0] sm:$0xf0] }
  0xc8   :  { %v853_v52 = vpop.f32.mrf.mxu2  ;;  %v827_v55 = vpop.f32.mrf.mxu0 }
  0xc9   :  { %v867_v54 = vpop.f32.mrf.mxu3  ;;  %v841_v56 = vpop.f32.mrf.mxu1  ;;  %v828_v62 = vadd.f32 %v827_v55, %v514_v47  ;;  %v854_v3 = vadd.f32 %v853_v52, %v516_v51  ;;  %v3426_v47 = vor.u32 %v4279_v31, %v3423_v32  ;;  %v4275_v52 = vld [vmem:[#allocation8 + $0x284] sm:$0xf] }
  0xca   :  { %v842_v63 = vadd.f32 %v841_v56, %v515_v48  ;;  %v868_v4 = vadd.f32 %v867_v54, %v517_v53  ;;  %v4347_v48 = vld [vmem:[#allocation8 + $0x4c4] sm:$0xf]  ;;  %v3570_v54 = vor.u32 %v4315_v41, %v3567_v42  ;;  %v3215_v42 = vld [vmem:[#allocation8 + $0x110] sm:$0xf0] }
  0xcb   :  { %vm921_vm2 = vcmp.gt.f32.partialorder %v828_v62, 0.0  ;;  %v935_v1 = vmul.f32 0.2, %v828_v62  ;;  %v930_v24 = vmul.f32 0.2, %v854_v3  ;;  %vm916_vm4 = vcmp.gt.f32.partialorder %v854_v3, 0.0 }
  0xcc   :  { %vm922_vm3 = vcmp.gt.f32.partialorder %v842_v63, 0.0  ;;  %v936_v2 = vmul.f32 0.2, %v842_v63  ;;  %v931_v25 = vmul.f32 0.2, %v868_v4  ;;  %vm917_vm5 = vcmp.gt.f32.partialorder %v868_v4, 0.0 }
  0xcd   :  { %v949_v9 = vsel %vm921_vm2, %v828_v62, %v935_v1  ;;  %v944_v38 = vsel %vm916_vm4, %v854_v3, %v930_v24  ;;  %v3698_v55 = vor.u32 %v4347_v48, %v3695_v49  ;;  %v4311_v56 = vld [vmem:[#allocation8 + $0x3a4] sm:$0xf]  ;;  %v3391_v1 = vld [vmem:[#allocation8 + $0x270] sm:$0xf0] }
  0xce   :  { %v950_v10 = vsel %vm922_vm3, %v842_v63, %v936_v2  ;;  %v4790_v14 = vpack.c.bf16 %v949_v9, %v942_v7  ;;  %v945_v39 = vsel %vm917_vm5, %v868_v4, %v931_v25  ;;  %v4239_v62 = vld [vmem:[#allocation8 + $0x164] sm:$0xf]  ;;  %v3263_v63 = vld [vmem:[#allocation8 + $0x170] sm:$0xf0]  ;;  %v518_v2 = vperm.slane %v4784_v43, 4 }
  0xcf   :  { %v4792_v15 = vpack.c.bf16 %v950_v10, %v943_v8  ;;  %v3554_v3 = vor.u32 %v4311_v56, %v3551_v57  ;;  %v3682_v4 = vor.u32 %v4343_v60, %v3679_v61  ;;  %v3266_v8 = vor.u32 %v4239_v62, %v3263_v63  ;;  %v4339_v10 = vld [vmem:[#allocation8 + $0x484] sm:$0xf]  ;;  %v3519_v24 = vld [vmem:[#allocation8 + $0x370] sm:$0xf0] }
  0xd0   :  { %v855_v19 = vpop.f32.mrf.mxu2  ;;  %2100 = vmatmul.bf16.vlgmr.msrb.gmra.mxu3 %v4790_v14  ;;  %v3394_v9 = vor.u32 %v4271_v0, %v3391_v1  ;;  %v3666_v22 = vor.u32 %v4339_v10, %v3663_v11  ;;  %v4335_v25 = vld [vmem:[#allocation8 + $0x464] sm:$0xf]  ;;  %v3487_v0 = vld [vmem:[#allocation8 + $0x330] sm:$0xf0] }
  0xd1   :  { %v869_v20 = vpop.f32.mrf.mxu3  ;;  %v856_v26 = vadd.f32 %v855_v19, %v516_v51  ;;  %2114 = vmatmul.bf16.vlgmr.msra.gmra.mxu0 %v4792_v15  ;;  %2204 = vmatpush.bf16.msrb.mxu3 %v3330_v5  ;;  %v3279_v51 = vld [vmem:[#allocation8 + $0x190] sm:$0xf0]  ;;  %v4307_v5 = vld [vmem:[#allocation8 + $0x384] sm:$0xf]  ;;  %v519_v19 = vperm.slane %v4784_v43, 5 }
  0xd2   :  { %v870_v27 = vadd.f32 %v869_v20, %v517_v53  ;;  %2218 = vmatpush.bf16.msra.mxu0 %v3458_v6  ;;  %v3407_v53 = vld [vmem:[#allocation8 + $0x290] sm:$0xf0]  ;;  %v3282_v58 = vor.u32 %v4243_v50, %v3279_v51  ;;  %v520_v20 = vperm.slane %v4784_v43, 6  ;;  %v4263_v32 = vld [vmem:[#allocation8 + $0x224] sm:$0xf] }
  0xd3   :  { %vm923_vm6 = vcmp.gt.f32.partialorder %v856_v26, 0.0  ;;  %v937_v33 = vmul.f32 0.2, %v856_v26  ;;  %v3410_v59 = vor.u32 %v4275_v52, %v3407_v53  ;;  %v3535_v6 = vld [vmem:[#allocation8 + $0x390] sm:$0xf0] }
  0xd4   :  { %vm924_vm7 = vcmp.gt.f32.partialorder %v870_v27, 0.0  ;;  %v938_v34 = vmul.f32 0.2, %v870_v27  ;;  %v3538_v21 = vor.u32 %v4307_v5, %v3535_v6  ;;  %v4227_v41 = vld [vmem:[#allocation8 + $0x104] sm:$0xf] }
  0xd5   :  { %v951_v40 = vsel %vm923_vm6, %v856_v26, %v937_v33  ;;  %2205 = vmatpush.bf16.msrb.mxu3 %v3314_v29  ;;  %v3250_v26 = vor.u32 %v4235_v12, %v3247_v16  ;;  %v4231_v29 = vld [vmem:[#allocation8 + $0x124] sm:$0xf]  ;;  %v3359_v33 = vld [vmem:[#allocation8 + $0x230] sm:$0xf0] }
  0xd6   :  { %v952_v46 = vsel %vm924_vm7, %v870_v27, %v938_v34  ;;  %v4796_v44 = vpack.c.bf16 %v951_v40, %v944_v38  ;;  %2219 = vmatpush.bf16.msra.mxu0 %v3442_v30  ;;  %v3378_v27 = vor.u32 %v4267_v17, %v3375_v18  ;;  %v3231_v30 = vld [vmem:[#allocation8 + $0x130] sm:$0xf0]  ;;  %v4299_v34 = vld [vmem:[#allocation8 + $0x344] sm:$0xf]  ;;  %v3522_v40 = vor.u32 %v4303_v23, %v3519_v24 }
  0xd7   :  { %v4798_v45 = vpack.c.bf16 %v952_v46, %v945_v39  ;;  %v3631_v38 = vld [vmem:[#allocation8 + $0x450] sm:$0xf0]  ;;  %v3650_v46 = vor.u32 %v4335_v25, %v3647_v28  ;;  %v3234_v49 = vor.u32 %v4231_v29, %v3231_v30  ;;  %v3362_v50 = vor.u32 %v4263_v32, %v3359_v33  ;;  %v4805_v52 = vld [vmem:[#allocation8 + $0x5e4] sm:$0xf]  ;;  %v3205_v32 = vld [vmem:[#allocation8 + $0xe8] sm:$0xf] }
  0xd8   :  { %2128 = vmatmul.bf16.vlgmr.msra.gmra.mxu1 %v4796_v44  ;;  %v3343_v51 = vld [vmem:[#allocation8 + $0x210] sm:$0xf0]  ;;  %v4295_v63 = vld [vmem:[#allocation8 + $0x324] sm:$0xf]  ;;  %v4226_v33 = vld [vmem:[#allocation8 + $0xf4] sm:$0xf0] }
  0xd9   :  { %2142 = vmatmul.bf16.vlgmr.msra.gmra.mxu2 %v4798_v45  ;;  %2232 = vmatpush.bf16.msra.mxu1 %v3586_v35  ;;  %v3839_v53 = vld [vmem:[#allocation8 + $0x5f0] sm:$0xf0]  ;;  %v4379_v11 = vld [vmem:[#allocation8 + $0x5c4] sm:$0xf]  ;;  %v3490_v25 = vor.u32 %v4295_v63, %v3487_v0  ;;  %v3301_v63 = vld [vmem:[#allocation8 + $0x1a8] sm:$0xf] }
  0xda   :  { %2246 = vmatpush.bf16.msra.mxu2 %v3714_v36  ;;  %2206 = vmatpush.bf16.msrb.mxu3 %v3298_v37  ;;  %v3503_v36 = vld [vmem:[#allocation8 + $0x350] sm:$0xf0]  ;;  %v4331_v37 = vld [vmem:[#allocation8 + $0x444] sm:$0xf]  ;;  %v3842_v10 = vor.u32 %v4805_v52, %v3839_v53  ;;  %v4254_v52 = vld [vmem:[#allocation8 + $0x1d4] sm:$0xf0] }
  0xdb   :  { %2220 = vmatpush.bf16.msra.mxu0 %v3426_v47  ;;  %v4259_v47 = vld [vmem:[#allocation8 + $0x204] sm:$0xf]  ;;  %v3506_v57 = vor.u32 %v4299_v34, %v3503_v36  ;;  %v3634_v62 = vor.u32 %v4331_v37, %v3631_v38  ;;  %v3823_v12 = vld [vmem:[#allocation8 + $0x5d0] sm:$0xf0]  ;;  %v3333_v34 = vld [vmem:[#allocation8 + $0x1e8] sm:$0xf] }
  0xdc   :  { %v3346_v6 = vor.u32 %v4259_v47, %v3343_v51  ;;  %v4323_v28 = vld [vmem:[#allocation8 + $0x404] sm:$0xf]  ;;  %v3599_v29 = vld [vmem:[#allocation8 + $0x410] sm:$0xf0]  ;;  %v3826_v37 = vor.u32 %v4379_v11, %v3823_v12  ;;  %v3317_v51 = vld [vmem:[#allocation8 + $0x1c8] sm:$0xf] }
  0xdd   :  { %2233 = vmatpush.bf16.msra.mxu1 %v3570_v54  ;;  %v4250_v0 = vld [vmem:[#allocation8 + $0x1b4] sm:$0xf0]  ;;  %v3285_v11 = vld [vmem:[#allocation8 + $0x188] sm:$0xf] }
  0xde   :  { %2247 = vmatpush.bf16.msra.mxu2 %v3698_v55  ;;  %2207 = vmatpush.bf16.msrb.mxu3 %v3282_v58  ;;  %v4415_v58 = vld [vmem:[#allocation8 + $0x6e4] sm:$0xf]  ;;  %v4246_v12 = vld [vmem:[#allocation8 + $0x194] sm:$0xf0] }
  0xdf   :  { %2221 = vmatpush.bf16.msra.mxu0 %v3410_v59  ;;  %v3967_v59 = vld [vmem:[#allocation8 + $0x6f0] sm:$0xf0] }
  0xe0   :  { %v881_v7 = vpop.f32.mrf.mxu0  ;;  %v3970_v18 = vor.u32 %v4415_v58, %v3967_v59  ;;  %v3791_v58 = vld [vmem:[#allocation8 + $0x590] sm:$0xf0]  ;;  %v4403_v59 = vld [vmem:[#allocation8 + $0x684] sm:$0xf] }
  0xe1   :  { %v895_v13 = vpop.f32.mrf.mxu1  ;;  %2234 = vmatpush.bf16.msra.mxu1 %v3554_v3  ;;  %v882_v31 = vadd.f32 %v881_v7, %v518_v2  ;;  %v3218_v3 = vor.u32 %v4227_v41, %v3215_v42  ;;  %v3615_v7 = vld [vmem:[#allocation8 + $0x430] sm:$0xf0] }
  0xe2   :  { %2248 = vmatpush.bf16.msra.mxu2 %v3682_v4  ;;  %2208 = vmatpush.bf16.msrb.mxu3 %v3266_v8  ;;  %v896_v35 = vadd.f32 %v895_v13, %v519_v19  ;;  %v4327_v4 = vld [vmem:[#allocation8 + $0x424] sm:$0xf]  ;;  %v3935_v41 = vld [vmem:[#allocation8 + $0x6b0] sm:$0xf0] }
  0xe3   :  { %2222 = vmatpush.bf16.msra.mxu0 %v3394_v9  ;;  %v932_v54 = vmul.f32 0.2, %v882_v31  ;;  %vm918_vm8 = vcmp.gt.f32.partialorder %v882_v31, 0.0 }
  0xe4   :  { %v933_v60 = vmul.f32 0.2, %v896_v35  ;;  %vm919_vm9 = vcmp.gt.f32.partialorder %v896_v35, 0.0 }
  0xe5   :  { %2235 = vmatpush.bf16.msra.mxu1 %v3538_v21  ;;  %v946_v8 = vsel %vm918_vm8, %v882_v31, %v932_v54  ;;  %v3951_v21 = vld [vmem:[#allocation8 + $0x6d0] sm:$0xf0] }
  0xe6   :  { %2249 = vmatpush.bf16.msra.mxu2 %v3666_v22  ;;  %2209 = vmatpush.bf16.msrb.mxu3 %v3250_v26  ;;  %v947_v13 = vsel %vm919_vm9, %v896_v35, %v933_v60  ;;  %v4291_v22 = vld [vmem:[#allocation8 + $0x304] sm:$0xf]  ;;  %v3618_v26 = vor.u32 %v4327_v4, %v3615_v7  ;;  %v4258_v35 = vld [vmem:[#allocation8 + $0x1f4] sm:$0xf0]  ;;  %v3919_v60 = vld [vmem:[#allocation8 + $0x690] sm:$0xf0]  ;;  %v3302_v7 = vor.u32 %v4250_v0, %v3301_v63 }
  0xe7   :  { %2223 = vmatpush.bf16.msra.mxu0 %v3378_v27  ;;  %v3471_v27 = vld [vmem:[#allocation8 + $0x310] sm:$0xf0]  ;;  %v3173_v4 = vld [vmem:[#allocation8 + $0xa8] sm:$0xf] }
  0xe8   :  { %v909_v39 = vpop.f32.mrf.mxu2  ;;  %v883_v48 = vpop.f32.mrf.mxu0  ;;  %v3474_v43 = vor.u32 %v4291_v22, %v3471_v27  ;;  %v3759_v22 = vld [vmem:[#allocation8 + $0x550] sm:$0xf0] }
  0xe9   :  { %v884_v55 = vadd.f32 %v883_v48, %v518_v2  ;;  %v897_v56 = vpop.f32.mrf.mxu1  ;;  %2198 = vmatmul.bf16.vlgmr.msrb.gmra.mxu2 %v4790_v14  ;;  %2236 = vmatpush.bf16.msra.mxu1 %v3522_v40  ;;  %v910_v2 = vadd.f32 %v909_v39, %v520_v20  ;;  %v4375_v39 = vld [vmem:[#allocation8 + $0x5a4] sm:$0xf]  ;;  %v3807_v40 = vld [vmem:[#allocation8 + $0x5b0] sm:$0xf0]  ;;  %v3334_v48 = vor.u32 %v4258_v35, %v3333_v34 }
  0xea   :  { %v898_v61 = vadd.f32 %v897_v56, %v519_v19  ;;  %2250 = vmatpush.bf16.msra.mxu2 %v3650_v46  ;;  %2210 = vmatpush.bf16.msrb.mxu3 %v3234_v49  ;;  %v4411_v19 = vld [vmem:[#allocation8 + $0x6c4] sm:$0xf]  ;;  %v3810_v53 = vor.u32 %v4375_v39, %v3807_v40  ;;  %v4222_v56 = vld [vmem:[#allocation8 + $0xd4] sm:$0xf0]  ;;  %v3743_v35 = vld [vmem:[#allocation8 + $0x530] sm:$0xf0] }
  0xeb   :  { %vm925_vm10 = vcmp.gt.f32.partialorder %v884_v55, 0.0  ;;  %v939_v1 = vmul.f32 0.2, %v884_v55  ;;  %2224 = vmatpush.bf16.msra.mxu0 %v3362_v50  ;;  %v934_v30 = vmul.f32 0.2, %v910_v2  ;;  %vm920_vm12 = vcmp.gt.f32.partialorder %v910_v2, 0.0 }
  0xec   :  { %vm926_vm11 = vcmp.gt.f32.partialorder %v898_v61, 0.0  ;;  %v940_v5 = vmul.f32 0.2, %v898_v61  ;;  %v3954_v38 = vor.u32 %v4411_v19, %v3951_v21  ;;  %v4407_v46 = vld [vmem:[#allocation8 + $0x6a4] sm:$0xf]  ;;  %v3206_v50 = vor.u32 %v4226_v33, %v3205_v32 }
  0xed   :  { %v953_v9 = vsel %vm925_vm10, %v884_v55, %v939_v1  ;;  %2237 = vmatpush.bf16.msra.mxu1 %v3506_v57  ;;  %v948_v42 = vsel %vm920_vm12, %v910_v2, %v934_v30  ;;  %v3938_v54 = vor.u32 %v4407_v46, %v3935_v41  ;;  %v3189_v55 = vld [vmem:[#allocation8 + $0xc8] sm:$0xf]  ;;  %v4371_v57 = vld [vmem:[#allocation8 + $0x584] sm:$0xf]  ;;  %v4218_v2 = vld [vmem:[#allocation8 + $0xb4] sm:$0xf0] }
  0xee   :  { %v4813_v16 = vpack.c.bf16 %v953_v9, %v946_v8  ;;  %v954_v17 = vsel %vm926_vm11, %v898_v61, %v940_v5  ;;  %2251 = vmatpush.bf16.msra.mxu2 %v3634_v62  ;;  %2211 = vmatpush.bf16.msrb.mxu3 %v3218_v3  ;;  %v3318_v61 = vor.u32 %v4254_v52, %v3317_v51  ;;  %v4367_v5 = vld [vmem:[#allocation8 + $0x564] sm:$0xf]  ;;  %v3903_v9 = vld [vmem:[#allocation8 + $0x670] sm:$0xf0]  ;;  %v4210_v32 = vld [vmem:[#allocation8 + $0x74] sm:$0xf0] }
  0xef   :  { %v4815_v23 = vpack.c.bf16 %v954_v17, %v947_v13  ;;  %2225 = vmatpush.bf16.msra.mxu0 %v3346_v6  ;;  %v3190_v62 = vor.u32 %v4222_v56, %v3189_v55  ;;  %v3794_v1 = vor.u32 %v4371_v57, %v3791_v58  ;;  %v3922_v3 = vor.u32 %v4403_v59, %v3919_v60  ;;  %v3775_v6 = vld [vmem:[#allocation8 + $0x570] sm:$0xf0]  ;;  %v4399_v8 = vld [vmem:[#allocation8 + $0x664] sm:$0xf]  ;;  %v3157_v17 = vld [vmem:[#allocation8 + $0x88] sm:$0xf] }
  0xf0   :  { %v911_v24 = vpop.f32.mrf.mxu2  ;;  %2156 = vmatmul.bf16.vlgmr.msra.gmra.mxu3 %v4813_v16  ;;  %v3778_v13 = vor.u32 %v4367_v5, %v3775_v6  ;;  %v3906_v19 = vor.u32 %v4399_v8, %v3903_v9  ;;  %v4363_v21 = vld [vmem:[#allocation8 + $0x544] sm:$0xf]  ;;  %v3125_v46 = vld [vmem:[#allocation8 + $0x48] sm:$0xf]  ;;  %v4206_v41 = vld [vmem:[#allocation8 + $0x54] sm:$0xf0] }
  0xf1   :  { %v912_v31 = vadd.f32 %v911_v24, %v520_v20  ;;  %2170 = vmatmul.bf16.vlgmr.msrb.gmra.mxu0 %v4815_v23  ;;  %2238 = vmatpush.bf16.msra.mxu1 %v3490_v25  ;;  %v3602_v20 = vor.u32 %v4323_v28, %v3599_v29  ;;  %v3286_v24 = vor.u32 %v4246_v12, %v3285_v11  ;;  %v4395_v25 = vld [vmem:[#allocation8 + $0x644] sm:$0xf]  ;;  %v3269_v28 = vld [vmem:[#allocation8 + $0x168] sm:$0xf]  ;;  %v4242_v29 = vld [vmem:[#allocation8 + $0x174] sm:$0xf0] }
  0xf2   :  { %2260 = vmatpush.bf16.msra.mxu3 %v3842_v10  ;;  %2252 = vmatpush.bf16.msra.mxu2 %v3618_v26  ;;  %v3174_v10 = vor.u32 %v4218_v2, %v3173_v4  ;;  %v3887_v26 = vld [vmem:[#allocation8 + $0x650] sm:$0xf0]  ;;  %v3762_v30 = vor.u32 %v4363_v21, %v3759_v22  ;;  %v4359_v34 = vld [vmem:[#allocation8 + $0x524] sm:$0xf]  ;;  %v3589_v55 = vld [vmem:[#allocation8 + $0x3e8] sm:$0xf]  ;;  %v3126_v56 = vor.u32 %v4206_v41, %v3125_v46 }
  0xf3   :  { %vm927_vm13 = vcmp.gt.f32.partialorder %v912_v31, 0.0  ;;  %v941_v36 = vmul.f32 0.2, %v912_v31  ;;  %2274 = vmatpush.bf16.msrb.mxu0 %v3970_v18  ;;  %v4214_v18 = vld [vmem:[#allocation8 + $0x94] sm:$0xf0]  ;;  %v3890_v33 = vor.u32 %v4395_v25, %v3887_v26  ;;  %v3746_v40 = vor.u32 %v4359_v34, %v3743_v35 }
  0xf4   :  { %v3158_v27 = vor.u32 %v4214_v18, %v3157_v17  ;;  %v3855_v51 = vld [vmem:[#allocation8 + $0x610] sm:$0xf0]  ;;  %v4322_v57 = vld [vmem:[#allocation8 + $0x3f4] sm:$0xf0]  ;;  %v3237_v58 = vld [vmem:[#allocation8 + $0x128] sm:$0xf] }
  0xf5   :  { %v955_v47 = vsel %vm927_vm13, %v912_v31, %v941_v36  ;;  %2239 = vmatpush.bf16.msra.mxu1 %v3474_v43  ;;  %v3141_v31 = vld [vmem:[#allocation8 + $0x68] sm:$0xf]  ;;  %v3270_v36 = vor.u32 %v4242_v29, %v3269_v28  ;;  %v4234_v59 = vld [vmem:[#allocation8 + $0x134] sm:$0xf0] }
  0xf6   :  { %v4822_v49 = vpack.c.bf16 %v955_v47, %v948_v42  ;;  %2261 = vmatpush.bf16.msra.mxu3 %v3826_v37  ;;  %2253 = vmatpush.bf16.msra.mxu2 %v3602_v20  ;;  %v4391_v37 = vld [vmem:[#allocation8 + $0x624] sm:$0xf]  ;;  %v3142_v39 = vor.u32 %v4210_v32, %v3141_v31  ;;  %v3253_v43 = vld [vmem:[#allocation8 + $0x148] sm:$0xf]  ;;  %v4238_v20 = vld [vmem:[#allocation8 + $0x154] sm:$0xf0]  ;;  %v3238_v4 = vor.u32 %v4234_v59, %v3237_v58 }
  0xf7   :  { %2275 = vmatpush.bf16.msrb.mxu0 %v3954_v38  ;;  %v3871_v38 = vld [vmem:[#allocation8 + $0x630] sm:$0xf0]  ;;  %v4355_v42 = vld [vmem:[#allocation8 + $0x504] sm:$0xf]  ;;  %v3254_v52 = vor.u32 %v4238_v20, %v3253_v43  ;;  %v4286_v2 = vld [vmem:[#allocation8 + $0x2d4] sm:$0xf0] }
  0xf8   :  { %2184 = vmatmul.bf16.vlgmr.msrb.gmra.mxu1 %v4822_v49  ;;  %v3874_v47 = vor.u32 %v4391_v37, %v3871_v38  ;;  %v3573_v5 = vld [vmem:[#allocation8 + $0x3c8] sm:$0xf]  ;;  %v4318_v6 = vld [vmem:[#allocation8 + $0x3d4] sm:$0xf0] }
  0xf9   :  { %2288 = vmatpush.bf16.msrb.mxu1 %v3206_v50  ;;  %2254 = vmatmul.bf16.vlgmr.msra.gmra.mxu2 %v4813_v16  ;;  %v4387_v50 = vld [vmem:[#allocation8 + $0x604] sm:$0xf]  ;;  %v3093_v8 = vld [vmem:[#allocation8 + $0x8] sm:$0xf]  ;;  %v4198_v11 = vld [vmem:[#allocation8 + $0x14] sm:$0xf0]  ;;  %v3574_v21 = vor.u32 %v4318_v6, %v3573_v5 }
  0xfa   :  { %2302 = vmatpush.bf16.msrb.mxu2 %v3334_v48  ;;  %2262 = vmatpush.bf16.msra.mxu3 %v3810_v53  ;;  %v3727_v48 = vld [vmem:[#allocation8 + $0x510] sm:$0xf0]  ;;  %v3461_v53 = vld [vmem:[#allocation8 + $0x2e8] sm:$0xf]  ;;  %v3858_v63 = vor.u32 %v4387_v50, %v3855_v51  ;;  %v4282_v25 = vld [vmem:[#allocation8 + $0x2b4] sm:$0xf0]  ;;  %v3094_v26 = vor.u32 %v4198_v11, %v3093_v8 }
  0xfb   :  { %2276 = vmatpush.bf16.msrb.mxu0 %v3938_v54  ;;  %v4290_v54 = vld [vmem:[#allocation8 + $0x2f4] sm:$0xf0]  ;;  %v3730_v60 = vor.u32 %v4355_v42, %v3727_v48  ;;  %v3221_v9 = vld [vmem:[#allocation8 + $0x108] sm:$0xf] }
  0xfc   :  { %v3462_v0 = vor.u32 %v4290_v54, %v3461_v53  ;;  %v3845_v12 = vld [vmem:[#allocation8 + $0x5e8] sm:$0xf]  ;;  %v4314_v29 = vld [vmem:[#allocation8 + $0x3b4] sm:$0xf0] }
  0xfd   :  { %2289 = vmatpush.bf16.msrb.mxu1 %v3190_v62  ;;  %v4202_v62 = vld [vmem:[#allocation8 + $0x34] sm:$0xf0]  ;;  %v3717_v18 = vld [vmem:[#allocation8 + $0x4e8] sm:$0xf] }
  0xfe   :  { %2303 = vmatpush.bf16.msrb.mxu2 %v3318_v61  ;;  %2263 = vmatpush.bf16.msra.mxu3 %v3794_v1  ;;  %v3109_v61 = vld [vmem:[#allocation8 + $0x28] sm:$0xf]  ;;  %v4382_v32 = vld [vmem:[#allocation8 + $0x5d4] sm:$0xf0] }
  0xff   :  { %2277 = vmatpush.bf16.msrb.mxu0 %v3922_v3  ;;  %v3445_v1 = vld [vmem:[#allocation8 + $0x2c8] sm:$0xf]  ;;  %v3590_v3 = vor.u32 %v4322_v57, %v3589_v55  ;;  %v4350_v35 = vld [vmem:[#allocation8 + $0x4d4] sm:$0xf0] }
 0x100   :  { %2212 = vmatmul.bf16.vlgmr.msrb.gmra.mxu3 %v4792_v15  ;;  %v3446_v17 = vor.u32 %v4286_v2, %v3445_v1  ;;  %v3557_v28 = vld [vmem:[#allocation8 + $0x3a8] sm:$0xf]  ;;  %v4278_v38 = vld [vmem:[#allocation8 + $0x294] sm:$0xf0] }
 0x101   :  { %2290 = vmatpush.bf16.msrb.mxu1 %v3174_v10  ;;  %2226 = vmatmul.bf16.vlgmr.msra.gmra.mxu0 %v4796_v44  ;;  %v4230_v10 = vld [vmem:[#allocation8 + $0x114] sm:$0xf0]  ;;  %v3829_v31 = vld [vmem:[#allocation8 + $0x5c8] sm:$0xf] }
 0x102   :  { %2304 = vmatpush.bf16.msrb.mxu2 %v3302_v7  ;;  %2264 = vmatpush.bf16.msra.mxu3 %v3778_v13  ;;  %v3110_v7 = vor.u32 %v4202_v62, %v3109_v61  ;;  %v4386_v13 = vld [vmem:[#allocation8 + $0x5f4] sm:$0xf0]  ;;  %v3222_v22 = vor.u32 %v4230_v10, %v3221_v9  ;;  %v3701_v34 = vld [vmem:[#allocation8 + $0x4c8] sm:$0xf] }
 0x103   :  { %2278 = vmatpush.bf16.msrb.mxu0 %v3906_v19  ;;  %v4354_v19 = vld [vmem:[#allocation8 + $0x4f4] sm:$0xf0]  ;;  %v3413_v37 = vld [vmem:[#allocation8 + $0x288] sm:$0xf] }
 0x104   :  { %v3541_v43 = vld [vmem:[#allocation8 + $0x388] sm:$0xf]  ;;  %v4310_v20 = vld [vmem:[#allocation8 + $0x394] sm:$0xf0]  ;;  %v3414_v42 = vor.u32 %v4278_v38, %v3413_v37  ;;  %v3207_v37 = vld [vmem:[#allocation8 + $0xf8] sm:$0xf0] }
 0x105   :  { %2291 = vmatpush.bf16.msrb.mxu1 %v3158_v27  ;;  %v3846_v27 = vor.u32 %v4386_v13, %v3845_v12  ;;  %v3813_v46 = vld [vmem:[#allocation8 + $0x5a8] sm:$0xf]  ;;  %v4378_v41 = vld [vmem:[#allocation8 + $0x5b4] sm:$0xf0]  ;;  %v3542_v50 = vor.u32 %v4310_v20, %v3541_v43 }
 0x106   :  { %2305 = vmatpush.bf16.msrb.mxu2 %v3286_v24  ;;  %2265 = vmatpush.bf16.msra.mxu3 %v3762_v30  ;;  %v3429_v24 = vld [vmem:[#allocation8 + $0x2a8] sm:$0xf]  ;;  %v3718_v30 = vor.u32 %v4354_v19, %v3717_v18  ;;  %v4346_v48 = vld [vmem:[#allocation8 + $0x4b4] sm:$0xf0]  ;;  %v3814_v53 = vor.u32 %v4378_v41, %v3813_v46 }
 0x107   :  { %2279 = vmatpush.bf16.msrb.mxu0 %v3890_v33  ;;  %v3430_v33 = vor.u32 %v4282_v25, %v3429_v24  ;;  %v3397_v51 = vld [vmem:[#allocation8 + $0x268] sm:$0xf]  ;;  %v4306_v55 = vld [vmem:[#allocation8 + $0x374] sm:$0xf0] }
 0x108   :  { %2240 = vmatmul.bf16.vlgmr.msra.gmra.mxu1 %v4798_v45  ;;  %v3525_v54 = vld [vmem:[#allocation8 + $0x368] sm:$0xf]  ;;  %v4374_v58 = vld [vmem:[#allocation8 + $0x594] sm:$0xf0] }
 0x109   :  { %2292 = vmatpush.bf16.msrb.mxu1 %v3142_v39  ;;  %v3830_v39 = vor.u32 %v4382_v32, %v3829_v31  ;;  %v3797_v57 = vld [vmem:[#allocation8 + $0x588] sm:$0xf]  ;;  %v4342_v61 = vld [vmem:[#allocation8 + $0x494] sm:$0xf0]  ;;  %v3526_v62 = vor.u32 %v4306_v55, %v3525_v54 }
 0x10a   :  { %2306 = vmatpush.bf16.msrb.mxu2 %v3270_v36  ;;  %2266 = vmatpush.bf16.msra.mxu3 %v3746_v40  ;;  %v3558_v36 = vor.u32 %v4314_v29, %v3557_v28  ;;  %v3702_v40 = vor.u32 %v4350_v35, %v3701_v34  ;;  %v3798_v1 = vor.u32 %v4374_v58, %v3797_v57  ;;  %v3781_v5 = vld [vmem:[#allocation8 + $0x568] sm:$0xf]  ;;  %v4370_v6 = vld [vmem:[#allocation8 + $0x574] sm:$0xf0]  ;;  %v4224_v35 = vld [vmem:[#allocation8 + $0xec] sm:$0xf] }
 0x10b   :  { %2280 = vmatpush.bf16.msrb.mxu0 %v3874_v47  ;;  %v3685_v47 = vld [vmem:[#allocation8 + $0x4a8] sm:$0xf]  ;;  %v4338_v9 = vld [vmem:[#allocation8 + $0x474] sm:$0xf0]  ;;  %v3782_v13 = vor.u32 %v4370_v6, %v3781_v5  ;;  %v4288_v58 = vld [vmem:[#allocation8 + $0x2ec] sm:$0xf] }
 0x10c   :  { %v3653_v8 = vld [vmem:[#allocation8 + $0x468] sm:$0xf]  ;;  %v4266_v12 = vld [vmem:[#allocation8 + $0x234] sm:$0xf0]  ;;  %v4216_v5 = vld [vmem:[#allocation8 + $0xac] sm:$0xf] }
 0x10d   :  { %2293 = vmatpush.bf16.msrb.mxu1 %v3126_v56  ;;  %v3686_v56 = vor.u32 %v4346_v48, %v3685_v47  ;;  %v3365_v11 = vld [vmem:[#allocation8 + $0x228] sm:$0xf]  ;;  %v4298_v18 = vld [vmem:[#allocation8 + $0x334] sm:$0xf0]  ;;  %v3654_v19 = vor.u32 %v4338_v9, %v3653_v8  ;;  %v3210_v47 = vor.u32 %v4224_v35, %v3207_v37  ;;  %v3175_v6 = vld [vmem:[#allocation8 + $0xb8] sm:$0xf0] }
 0x10e   :  { %2307 = vmatpush.bf16.msrb.mxu2 %v3254_v52  ;;  %2267 = vmatpush.bf16.msra.mxu3 %v3730_v60  ;;  %v4274_v52 = vld [vmem:[#allocation8 + $0x274] sm:$0xf0]  ;;  %v3669_v60 = vld [vmem:[#allocation8 + $0x488] sm:$0xf]  ;;  %v3366_v24 = vor.u32 %v4266_v12, %v3365_v11  ;;  %v4284_v8 = vld [vmem:[#allocation8 + $0x2cc] sm:$0xf] }
 0x10f   :  { %2281 = vmatpush.bf16.msrb.mxu0 %v3858_v63  ;;  %v3398_v59 = vor.u32 %v4274_v52, %v3397_v51  ;;  %v3381_v63 = vld [vmem:[#allocation8 + $0x248] sm:$0xf]  ;;  %v3670_v2 = vor.u32 %v4342_v61, %v3669_v60  ;;  %v4262_v29 = vld [vmem:[#allocation8 + $0x214] sm:$0xf0]  ;;  %v4220_v51 = vld [vmem:[#allocation8 + $0xcc] sm:$0xf] }
 0x110   :  { %v3637_v25 = vld [vmem:[#allocation8 + $0x448] sm:$0xf]  ;;  %v4294_v31 = vld [vmem:[#allocation8 + $0x314] sm:$0xf0]  ;;  %v3191_v52 = vld [vmem:[#allocation8 + $0xd8] sm:$0xf0] }
 0x111   :  { %2294 = vmatpush.bf16.msrb.mxu1 %v3110_v7  ;;  %2268 = vmatmul.bf16.vlgmr.msra.gmra.mxu3 %v4815_v23  ;;  %v4418_v34 = vld [vmem:[#allocation8 + $0x6f4] sm:$0xf0]  ;;  %v3749_v38 = vld [vmem:[#allocation8 + $0x528] sm:$0xf]  ;;  %v4256_v61 = vld [vmem:[#allocation8 + $0x1ec] sm:$0xf] }
 0x112   :  { %2316 = vmatpush.bf16.msrb.mxu3 %v3462_v0  ;;  %2308 = vmatpush.bf16.msrb.mxu2 %v3238_v4  ;;  %v4270_v0 = vld [vmem:[#allocation8 + $0x254] sm:$0xf0]  ;;  %v3621_v20 = vld [vmem:[#allocation8 + $0x428] sm:$0xf]  ;;  %v3447_v9 = vld [vmem:[#allocation8 + $0x2d8] sm:$0xf0] }
 0x113   :  { %2330 = vmatpush.bf16.msra.mxu0 %v3590_v3  ;;  %v3509_v3 = vld [vmem:[#allocation8 + $0x348] sm:$0xf]  ;;  %v4302_v4 = vld [vmem:[#allocation8 + $0x354] sm:$0xf0]  ;;  %v3382_v7 = vor.u32 %v4270_v0, %v3381_v63  ;;  %v3194_v63 = vor.u32 %v4220_v51, %v3191_v52  ;;  %v4252_v11 = vld [vmem:[#allocation8 + $0x1cc] sm:$0xf] }
 0x114   :  { %2282 = vmatmul.bf16.vlgmr.msrb.gmra.mxu0 %v4822_v49  ;;  %v3510_v10 = vor.u32 %v4302_v4, %v3509_v3  ;;  %v3605_v54 = vld [vmem:[#allocation8 + $0x408] sm:$0xf]  ;;  %v4326_v57 = vld [vmem:[#allocation8 + $0x414] sm:$0xf0]  ;;  %v3319_v12 = vld [vmem:[#allocation8 + $0x1d8] sm:$0xf0] }
 0x115   :  { %2295 = vmatpush.bf16.msrb.mxu1 %v3094_v26  ;;  %v4334_v26 = vld [vmem:[#allocation8 + $0x454] sm:$0xf0]  ;;  %v3733_v55 = vld [vmem:[#allocation8 + $0x508] sm:$0xf]  ;;  %v3606_v4 = vor.u32 %v4326_v57, %v3605_v54  ;;  %v3143_v35 = vld [vmem:[#allocation8 + $0x78] sm:$0xf0] }
 0x116   :  { %2317 = vmatpush.bf16.msrb.mxu3 %v3446_v17  ;;  %2309 = vmatpush.bf16.msrb.mxu2 %v3222_v22  ;;  %v3493_v17 = vld [vmem:[#allocation8 + $0x328] sm:$0xf]  ;;  %v4366_v22 = vld [vmem:[#allocation8 + $0x554] sm:$0xf0]  ;;  %v4276_v37 = vld [vmem:[#allocation8 + $0x28c] sm:$0xf] }
 0x117   :  { %2331 = vmatpush.bf16.msra.mxu0 %v3574_v21  ;;  %v3765_v21 = vld [vmem:[#allocation8 + $0x548] sm:$0xf]  ;;  %v3494_v28 = vor.u32 %v4298_v18, %v3493_v17  ;;  %v4410_v3 = vld [vmem:[#allocation8 + $0x6b4] sm:$0xf0]  ;;  %v4272_v51 = vld [vmem:[#allocation8 + $0x26c] sm:$0xf] }
 0x118   :  { %2296 = vmatmul.bf16.vlgmr.msrb.gmra.mxu1 %v4790_v14  ;;  %v3766_v32 = vor.u32 %v4366_v22, %v3765_v21  ;;  %v3925_v17 = vld [vmem:[#allocation8 + $0x688] sm:$0xf]  ;;  %v4406_v18 = vld [vmem:[#allocation8 + $0x694] sm:$0xf0]  ;;  %v4212_v21 = vld [vmem:[#allocation8 + $0x8c] sm:$0xf] }
 0x119   :  { %2344 = vmatpush.bf16.msra.mxu1 %v3718_v30  ;;  %2310 = vmatmul.bf16.vlgmr.msrb.gmra.mxu2 %v4792_v15  ;;  %v3477_v30 = vld [vmem:[#allocation8 + $0x308] sm:$0xf]  ;;  %v3159_v22 = vld [vmem:[#allocation8 + $0x98] sm:$0xf0]  ;;  %v4240_v54 = vld [vmem:[#allocation8 + $0x16c] sm:$0xf] }
 0x11a   :  { %2358 = vmatpush.bf16.msra.mxu2 %v3846_v27  ;;  %2318 = vmatpush.bf16.msrb.mxu3 %v3430_v33  ;;  %v3349_v27 = vld [vmem:[#allocation8 + $0x208] sm:$0xf]  ;;  %v3478_v46 = vor.u32 %v4294_v31, %v3477_v30  ;;  %v3162_v30 = vor.u32 %v4212_v21, %v3159_v22  ;;  %v3399_v52 = vld [vmem:[#allocation8 + $0x278] sm:$0xf0]  ;;  %v4232_v22 = vld [vmem:[#allocation8 + $0x12c] sm:$0xf] }
 0x11b   :  { %2332 = vmatpush.bf16.msra.mxu0 %v3558_v36  ;;  %v3973_v33 = vld [vmem:[#allocation8 + $0x6e8] sm:$0xf]  ;;  %v3638_v36 = vor.u32 %v4334_v26, %v3637_v25  ;;  %v3350_v43 = vor.u32 %v4262_v29, %v3349_v27  ;;  %v4280_v25 = vld [vmem:[#allocation8 + $0x2ac] sm:$0xf]  ;;  %v3431_v26 = vld [vmem:[#allocation8 + $0x2b8] sm:$0xf0]  ;;  %v3926_v27 = vor.u32 %v4406_v18, %v3925_v17 }
 0x11c   :  { %v3974_v41 = vor.u32 %v4418_v34, %v3973_v33  ;;  %v3303_v29 = vld [vmem:[#allocation8 + $0x1b8] sm:$0xf0]  ;;  %v3909_v31 = vld [vmem:[#allocation8 + $0x668] sm:$0xf]  ;;  %v3434_v33 = vor.u32 %v4280_v25, %v3431_v26  ;;  %v4208_v34 = vld [vmem:[#allocation8 + $0x6c] sm:$0xf] }
 0x11d   :  { %2345 = vmatpush.bf16.msra.mxu1 %v3702_v40  ;;  %v4330_v40 = vld [vmem:[#allocation8 + $0x434] sm:$0xf0]  ;;  %v3877_v57 = vld [vmem:[#allocation8 + $0x628] sm:$0xf]  ;;  %v3719_v17 = vld [vmem:[#allocation8 + $0x4f8] sm:$0xf0] }
 0x11e   :  { %2359 = vmatpush.bf16.msra.mxu2 %v3830_v39  ;;  %2319 = vmatpush.bf16.msrb.mxu3 %v3414_v42  ;;  %v4362_v39 = vld [vmem:[#allocation8 + $0x534] sm:$0xf0]  ;;  %v3957_v42 = vld [vmem:[#allocation8 + $0x6c8] sm:$0xf]  ;;  %v4264_v18 = vld [vmem:[#allocation8 + $0x22c] sm:$0xf] }
 0x11f   :  { %2333 = vmatpush.bf16.msra.mxu0 %v3542_v50  ;;  %v3750_v48 = vor.u32 %v4362_v39, %v3749_v38  ;;  %v4414_v50 = vld [vmem:[#allocation8 + $0x6d4] sm:$0xf0]  ;;  %v3415_v38 = vld [vmem:[#allocation8 + $0x298] sm:$0xf0] }
 0x120   :  { %v3958_v60 = vor.u32 %v4414_v50, %v3957_v42  ;;  %v3418_v42 = vor.u32 %v4276_v37, %v3415_v38  ;;  %v3223_v37 = vld [vmem:[#allocation8 + $0x118] sm:$0xf0]  ;;  %v4416_v38 = vld [vmem:[#allocation8 + $0x6ec] sm:$0xf] }
 0x121   :  { %2346 = vmatpush.bf16.msra.mxu1 %v3686_v56  ;;  %v4358_v56 = vld [vmem:[#allocation8 + $0x514] sm:$0xf0] }
 0x122   :  { %2360 = vmatpush.bf16.msra.mxu2 %v3814_v53  ;;  %2320 = vmatpush.bf16.msrb.mxu3 %v3398_v59  ;;  %v3622_v53 = vor.u32 %v4330_v40, %v3621_v20  ;;  %v3463_v59 = vld [vmem:[#allocation8 + $0x2f8] sm:$0xf0]  ;;  %v3734_v0 = vor.u32 %v4358_v56, %v3733_v55  ;;  %v3146_v40 = vor.u32 %v4208_v34, %v3143_v35  ;;  %v4228_v34 = vld [vmem:[#allocation8 + $0x10c] sm:$0xf] }
 0x123   :  { %2334 = vmatpush.bf16.msra.mxu0 %v3526_v62  ;;  %v3335_v62 = vld [vmem:[#allocation8 + $0x1f8] sm:$0xf0]  ;;  %v4260_v35 = vld [vmem:[#allocation8 + $0x20c] sm:$0xf] }
 0x124   :  { %v3287_v20 = vld [vmem:[#allocation8 + $0x198] sm:$0xf0] }
 0x125   :  { %2347 = vmatpush.bf16.msra.mxu1 %v3670_v2  ;;  %v3466_v2 = vor.u32 %v4288_v58, %v3463_v59  ;;  %v3271_v55 = vld [vmem:[#allocation8 + $0x178] sm:$0xf0]  ;;  %v4394_v58 = vld [vmem:[#allocation8 + $0x634] sm:$0xf0]  ;;  %v3402_v59 = vor.u32 %v4272_v51, %v3399_v52  ;;  %v4344_v51 = vld [vmem:[#allocation8 + $0x4ac] sm:$0xf] }
 0x126   :  { %2361 = vmatpush.bf16.msra.mxu2 %v3798_v1  ;;  %2321 = vmatpush.bf16.msrb.mxu3 %v3382_v7  ;;  %v3941_v1 = vld [vmem:[#allocation8 + $0x6a8] sm:$0xf]  ;;  %v3338_v7 = vor.u32 %v4256_v61, %v3335_v62  ;;  %v3111_v61 = vld [vmem:[#allocation8 + $0x38] sm:$0xf0]  ;;  %v3274_v62 = vor.u32 %v4240_v54, %v3271_v55  ;;  %v4412_v54 = vld [vmem:[#allocation8 + $0x6cc] sm:$0xf] }
 0x127   :  { %2335 = vmatpush.bf16.msra.mxu0 %v3510_v10  ;;  %v3942_v10 = vor.u32 %v4410_v3, %v3941_v1  ;;  %v3878_v1 = vor.u32 %v4394_v58, %v3877_v57  ;;  %v4236_v3 = vld [vmem:[#allocation8 + $0x14c] sm:$0xf]  ;;  %v3687_v52 = vld [vmem:[#allocation8 + $0x4b8] sm:$0xf0] }
 0x128   :  { %v3959_v55 = vld [vmem:[#allocation8 + $0x6d8] sm:$0xf0]  ;;  %v4380_v57 = vld [vmem:[#allocation8 + $0x5cc] sm:$0xf] }
 0x129   :  { %2348 = vmatpush.bf16.msra.mxu1 %v3654_v19  ;;  %v3450_v19 = vor.u32 %v4284_v8, %v3447_v9  ;;  %v3095_v8 = vld [vmem:[#allocation8 + $0x18] sm:$0xf0] }
 0x12a   :  { %2362 = vmatpush.bf16.msra.mxu2 %v3782_v13  ;;  %2322 = vmatpush.bf16.msrb.mxu3 %v3366_v24  ;;  %v3178_v13 = vor.u32 %v4216_v5, %v3175_v6  ;;  %v3322_v24 = vor.u32 %v4252_v11, %v3319_v12  ;;  %v4390_v6 = vld [vmem:[#allocation8 + $0x614] sm:$0xf0]  ;;  %v3591_v11 = vld [vmem:[#allocation8 + $0x3f8] sm:$0xf0]  ;;  %v4352_v12 = vld [vmem:[#allocation8 + $0x4ec] sm:$0xf] }
 0x12b   :  { %2336 = vmatpush.bf16.msra.mxu0 %v3494_v28  ;;  %v4248_v28 = vld [vmem:[#allocation8 + $0x1ac] sm:$0xf]  ;;  %v3831_v58 = vld [vmem:[#allocation8 + $0x5d8] sm:$0xf0] }
 0x12d   :  { %2349 = vmatpush.bf16.msra.mxu1 %v3638_v36  ;;  %v3306_v36 = vor.u32 %v4248_v28, %v3303_v29  ;;  %v3722_v28 = vor.u32 %v4352_v12, %v3719_v17  ;;  %v3927_v17 = vld [vmem:[#allocation8 + $0x698] sm:$0xf0] }
 0x12e   :  { %2363 = vmatpush.bf16.msra.mxu2 %v3766_v32  ;;  %2323 = vmatpush.bf16.msrb.mxu3 %v3350_v43  ;;  %v4402_v32 = vld [vmem:[#allocation8 + $0x674] sm:$0xf0]  ;;  %v4244_v43 = vld [vmem:[#allocation8 + $0x18c] sm:$0xf] }
 0x12f   :  { %2337 = vmatpush.bf16.msra.mxu0 %v3478_v46  ;;  %v3910_v39 = vor.u32 %v4402_v32, %v3909_v31  ;;  %v3893_v46 = vld [vmem:[#allocation8 + $0x648] sm:$0xf]  ;;  %v3290_v50 = vor.u32 %v4244_v43, %v3287_v20  ;;  %v4348_v31 = vld [vmem:[#allocation8 + $0x4cc] sm:$0xf]  ;;  %v3703_v32 = vld [vmem:[#allocation8 + $0x4d8] sm:$0xf0] }
 0x130   :  { %v4384_v20 = vld [vmem:[#allocation8 + $0x5ec] sm:$0xf] }
 0x131   :  { %2350 = vmatpush.bf16.msra.mxu1 %v3622_v53  ;;  %2324 = vmatmul.bf16.vlgmr.msrb.gmra.mxu3 %v4796_v44 }
 0x132   :  { %2372 = vmatpush.bf16.msra.mxu3 %v3974_v41  ;;  %2364 = vmatpush.bf16.msra.mxu2 %v3750_v48  ;;  %v4398_v41 = vld [vmem:[#allocation8 + $0x654] sm:$0xf0]  ;;  %v3127_v48 = vld [vmem:[#allocation8 + $0x58] sm:$0xf0] }
 0x133   :  { %2386 = vmatpush.bf16.msrb.mxu0 %v3210_v47  ;;  %v4204_v47 = vld [vmem:[#allocation8 + $0x4c] sm:$0xf]  ;;  %v3894_v53 = vor.u32 %v4398_v41, %v3893_v46  ;;  %v3706_v46 = vor.u32 %v4348_v31, %v3703_v32  ;;  %v3783_v32 = vld [vmem:[#allocation8 + $0x578] sm:$0xf0] }
 0x134   :  { %2338 = vmatmul.bf16.vlgmr.msra.gmra.mxu0 %v4798_v45  ;;  %v3130_v56 = vor.u32 %v4204_v47, %v3127_v48  ;;  %v3559_v47 = vld [vmem:[#allocation8 + $0x3b8] sm:$0xf0]  ;;  %v3226_v48 = vor.u32 %v4228_v34, %v3223_v37  ;;  %v4368_v31 = vld [vmem:[#allocation8 + $0x56c] sm:$0xf] }
 0x135   :  { %2351 = vmatpush.bf16.msra.mxu1 %v3606_v4  ;;  %v3255_v4 = vld [vmem:[#allocation8 + $0x158] sm:$0xf0]  ;;  %v4296_v34 = vld [vmem:[#allocation8 + $0x32c] sm:$0xf] }
 0x136   :  { %2373 = vmatpush.bf16.msra.mxu3 %v3958_v60  ;;  %2365 = vmatpush.bf16.msra.mxu2 %v3734_v0  ;;  %v4200_v60 = vld [vmem:[#allocation8 + $0x2c] sm:$0xf]  ;;  %v3383_v0 = vld [vmem:[#allocation8 + $0x258] sm:$0xf0] }
 0x137   :  { %2387 = vmatpush.bf16.msrb.mxu0 %v3194_v63  ;;  %v4268_v63 = vld [vmem:[#allocation8 + $0x24c] sm:$0xf]  ;;  %v3114_v5 = vor.u32 %v4200_v60, %v3111_v61  ;;  %v3543_v61 = vld [vmem:[#allocation8 + $0x398] sm:$0xf0] }
 0x138   :  { %2352 = vmatmul.bf16.vlgmr.msra.gmra.mxu1 %v4813_v16  ;;  %v3386_v9 = vor.u32 %v4268_v63, %v3383_v0  ;;  %v4308_v60 = vld [vmem:[#allocation8 + $0x38c] sm:$0xf]  ;;  %v3671_v0 = vld [vmem:[#allocation8 + $0x498] sm:$0xf0] }
 0x139   :  { %2400 = vmatpush.bf16.msrb.mxu1 %v3338_v7  ;;  %2366 = vmatmul.bf16.vlgmr.msra.gmra.mxu2 %v4815_v23  ;;  %v4196_v7 = vld [vmem:[#allocation8 + $0xc] sm:$0xf] }
 0x13a   :  { %2414 = vmatpush.bf16.msrb.mxu2 %v3466_v2  ;;  %2374 = vmatpush.bf16.msra.mxu3 %v3942_v10  ;;  %v3861_v2 = vld [vmem:[#allocation8 + $0x608] sm:$0xf]  ;;  %v4320_v10 = vld [vmem:[#allocation8 + $0x3ec] sm:$0xf]  ;;  %v3098_v25 = vor.u32 %v4196_v7, %v3095_v8  ;;  %v3527_v8 = vld [vmem:[#allocation8 + $0x378] sm:$0xf0] }
 0x13b   :  { %2388 = vmatpush.bf16.msrb.mxu0 %v3178_v13  ;;  %v3258_v13 = vor.u32 %v4236_v3, %v3255_v4  ;;  %v3862_v21 = vor.u32 %v4390_v6, %v3861_v2  ;;  %v3594_v26 = vor.u32 %v4320_v10, %v3591_v11  ;;  %v4340_v63 = vld [vmem:[#allocation8 + $0x48c] sm:$0xf]  ;;  %v3943_v3 = vld [vmem:[#allocation8 + $0x6b8] sm:$0xf0]  ;;  %v3546_v4 = vor.u32 %v4308_v60, %v3543_v61 }
 0x13c   :  { %v4376_v2 = vld [vmem:[#allocation8 + $0x5ac] sm:$0xf]  ;;  %v3674_v6 = vor.u32 %v4340_v63, %v3671_v0  ;;  %v3655_v11 = vld [vmem:[#allocation8 + $0x478] sm:$0xf0] }
 0x13d   :  { %2401 = vmatpush.bf16.msrb.mxu1 %v3322_v24  ;;  %v3239_v24 = vld [vmem:[#allocation8 + $0x138] sm:$0xf0]  ;;  %v4304_v7 = vld [vmem:[#allocation8 + $0x36c] sm:$0xf] }
 0x13e   :  { %2415 = vmatpush.bf16.msrb.mxu2 %v3450_v19  ;;  %2375 = vmatpush.bf16.msra.mxu3 %v3926_v27  ;;  %v3367_v19 = vld [vmem:[#allocation8 + $0x238] sm:$0xf0]  ;;  %v4316_v27 = vld [vmem:[#allocation8 + $0x3cc] sm:$0xf] }
 0x13f   :  { %2389 = vmatpush.bf16.msrb.mxu0 %v3162_v30  ;;  %v3370_v29 = vor.u32 %v4264_v18, %v3367_v19  ;;  %v3575_v30 = vld [vmem:[#allocation8 + $0x3d8] sm:$0xf0]  ;;  %v4336_v10 = vld [vmem:[#allocation8 + $0x46c] sm:$0xf] }
 0x140   :  { %v3578_v43 = vor.u32 %v4316_v27, %v3575_v30  ;;  %v4372_v18 = vld [vmem:[#allocation8 + $0x58c] sm:$0xf]  ;;  %v3799_v19 = vld [vmem:[#allocation8 + $0x598] sm:$0xf0] }
 0x141   :  { %2402 = vmatpush.bf16.msrb.mxu1 %v3306_v36  ;;  %v3351_v36 = vld [vmem:[#allocation8 + $0x218] sm:$0xf0]  ;;  %v3802_v27 = vor.u32 %v4372_v18, %v3799_v19  ;;  %v4328_v37 = vld [vmem:[#allocation8 + $0x42c] sm:$0xf]  ;;  %v4433_v18 = vld [vmem:[#allocation11 + $0x70] sm:$0xff] }
 0x142   :  { %2416 = vmatpush.bf16.msrb.mxu2 %v3434_v33  ;;  %2376 = vmatpush.bf16.msra.mxu3 %v3910_v39  ;;  %v3242_v33 = vor.u32 %v4232_v22, %v3239_v24  ;;  %v3975_v39 = vld [vmem:[#allocation8 + $0x6f8] sm:$0xf0]  ;;  %v3354_v41 = vor.u32 %v4260_v35, %v3351_v36  ;;  %v4300_v22 = vld [vmem:[#allocation8 + $0x34c] sm:$0xf] }
 0x143   :  { %2390 = vmatpush.bf16.msrb.mxu0 %v3146_v40  ;;  %v3847_v40 = vld [vmem:[#allocation8 + $0x5f8] sm:$0xf0] }
 0x144   :  { %v3495_v35 = vld [vmem:[#allocation8 + $0x338] sm:$0xf0] }
 0x145   :  { %2403 = vmatpush.bf16.msrb.mxu1 %v3290_v50  ;;  %v3978_v50 = vor.u32 %v4416_v38, %v3975_v39  ;;  %v3623_v38 = vld [vmem:[#allocation8 + $0x438] sm:$0xf0] }
 0x146   :  { %2417 = vmatpush.bf16.msrb.mxu2 %v3418_v42  ;;  %2377 = vmatpush.bf16.msra.mxu3 %v3894_v53  ;;  %v4312_v42 = vld [vmem:[#allocation8 + $0x3ac] sm:$0xf]  ;;  %v3850_v53 = vor.u32 %v4384_v20, %v3847_v40  ;;  %v3895_v40 = vld [vmem:[#allocation8 + $0x658] sm:$0xf0] }
 0x147   :  { %2391 = vmatpush.bf16.msrb.mxu0 %v3130_v56  ;;  %v3562_v56 = vor.u32 %v4312_v42, %v3559_v47  ;;  %v4396_v20 = vld [vmem:[#allocation8 + $0x64c] sm:$0xf]  ;;  %v3767_v42 = vld [vmem:[#allocation8 + $0x558] sm:$0xf0]  ;;  %v3626_v47 = vor.u32 %v4328_v37, %v3623_v38  ;;  %v4429_v38 = vld [vmem:[#allocation11 + $0x50] sm:$0xff] }
 0x148   :  { %v3751_v60 = vld [vmem:[#allocation8 + $0x538] sm:$0xf0] }
 0x149   :  { %2404 = vmatpush.bf16.msrb.mxu1 %v3274_v62  ;;  %v3962_v62 = vor.u32 %v4412_v54, %v3959_v55  ;;  %v4841_v54 = vld [vmem:[#allocation10] sm:$0xf] }
 0x14a   :  { %2418 = vmatpush.bf16.msrb.mxu2 %v3402_v59  ;;  %2378 = vmatpush.bf16.msra.mxu3 %v3878_v1  ;;  %v3690_v59 = vor.u32 %v4344_v51, %v3687_v52  ;;  %v3834_v1 = vor.u32 %v4380_v57, %v3831_v58  ;;  %v3898_v51 = vor.u32 %v4396_v20, %v3895_v40  ;;  %v4324_v52 = vld [vmem:[#allocation8 + $0x40c] sm:$0xf]  ;;  %v3879_v57 = vld [vmem:[#allocation8 + $0x638] sm:$0xf0]  ;;  %v964_v0 = vperm.slane %v4841_v54, 0 }
 0x14b   :  { %2392 = vmatpush.bf16.msrb.mxu0 %v3114_v5  ;;  %v3815_v5 = vld [vmem:[#allocation8 + $0x5b8] sm:$0xf0] }
 0x14c   :  { %v3818_v12 = vor.u32 %v4376_v2, %v3815_v5  ;;  %v4426_v63 = vld [vmem:[#allocation11 + $0x38] sm:$0xff]  ;;  %v4356_v5 = vld [vmem:[#allocation8 + $0x50c] sm:$0xf] }
 0x14d   :  { %2405 = vmatpush.bf16.msrb.mxu1 %v3258_v13  ;;  %v4404_v13 = vld [vmem:[#allocation8 + $0x68c] sm:$0xf]  ;;  %v3863_v2 = vld [vmem:[#allocation8 + $0x618] sm:$0xf0] }
 0x14e   :  { %2419 = vmatpush.bf16.msrb.mxu2 %v3386_v9  ;;  %2379 = vmatpush.bf16.msra.mxu3 %v3862_v21  ;;  %v3658_v21 = vor.u32 %v4336_v10, %v3655_v11  ;;  %v3930_v24 = vor.u32 %v4404_v13, %v3927_v17  ;;  %v2115_v39 = vpop.f32.mrf.mxu0  ;;  %v4434_v11 = vld [vmem:[#allocation11 + $0x78] sm:$0xff]  ;;  %v4424_v17 = vld [vmem:[#allocation11 + $0x28] sm:$0xff] }
 0x14f   :  { %2393 = vmatpush.bf16.msrb.mxu0 %v3098_v25  ;;  %v4332_v25 = vld [vmem:[#allocation8 + $0x44c] sm:$0xf] }
 0x151   :  { %2406 = vmatpush.bf16.msrb.mxu1 %v3242_v33  ;;  %2380 = vmatmul.bf16.vlgmr.msra.gmra.mxu3 %v4822_v49 }
 0x152   :  { %2428 = vmatpush.bf16.msrb.mxu3 %v3594_v26  ;;  %2420 = vmatpush.bf16.msrb.mxu2 %v3370_v29  ;;  %v3639_v26 = vld [vmem:[#allocation8 + $0x458] sm:$0xf0] }
 0x153   :  { %2442 = vmatpush.bf16.msra.mxu0 %v3722_v28  ;;  %v4400_v28 = vld [vmem:[#allocation8 + $0x66c] sm:$0xf]  ;;  %v3911_v29 = vld [vmem:[#allocation8 + $0x678] sm:$0xf0]  ;;  %v3642_v33 = vor.u32 %v4332_v25, %v3639_v26  ;;  %v2101_v61 = vpop.f32.mrf.mxu3 }
 0x154   :  { %2394 = vmatmul.bf16.vlgmr.msrb.gmra.mxu0 %v4790_v14  ;;  %v4408_v14 = vld [vmem:[#allocation8 + $0x6ac] sm:$0xf]  ;;  %v3914_v36 = vor.u32 %v4400_v28, %v3911_v29  ;;  %v4422_v26 = vld [vmem:[#allocation11 + $0x18] sm:$0xff]  ;;  %v4431_v29 = vld [vmem:[#allocation11 + $0x60] sm:$0xff] }
 0x155   :  { %2407 = vmatpush.bf16.msrb.mxu1 %v3226_v48  ;;  %v3946_v9 = vor.u32 %v4408_v14, %v3943_v3  ;;  %v4292_v48 = vld [vmem:[#allocation8 + $0x30c] sm:$0xf]  ;;  %v2129_v14 = vpop.f32.mrf.mxu1 }
 0x156   :  { %2429 = vmatpush.bf16.msrb.mxu3 %v3578_v43  ;;  %2421 = vmatpush.bf16.msrb.mxu2 %v3354_v41  ;;  %v3786_v43 = vor.u32 %v4368_v31, %v3783_v32  ;;  %v4364_v41 = vld [vmem:[#allocation8 + $0x54c] sm:$0xf] }
 0x157   :  { %2443 = vmatpush.bf16.msra.mxu0 %v3706_v46  ;;  %v3498_v46 = vor.u32 %v4296_v34, %v3495_v35  ;;  %v3770_v55 = vor.u32 %v4364_v41, %v3767_v42  ;;  %v4430_v35 = vld [vmem:[#allocation11 + $0x58] sm:$0xff]  ;;  %v4428_v42 = vld [vmem:[#allocation11 + $0x48] sm:$0xff] }
 0x158   :  { %2408 = vmatmul.bf16.vlgmr.msrb.gmra.mxu1 %v4792_v15  ;;  %v3511_v15 = vld [vmem:[#allocation8 + $0x358] sm:$0xf0] }
 0x159   :  { %2456 = vmatpush.bf16.msra.mxu1 %v3850_v53  ;;  %2422 = vmatmul.bf16.vlgmr.msrb.gmra.mxu2 %v4796_v44  ;;  %v3530_v44 = vor.u32 %v4304_v7, %v3527_v8  ;;  %v3514_v30 = vor.u32 %v4300_v22, %v3511_v15  ;;  %v3607_v53 = vld [vmem:[#allocation8 + $0x418] sm:$0xf0]  ;;  %v2117_v7 = vpop.f32.mrf.mxu0  ;;  %v4425_v8 = vld [vmem:[#allocation11 + $0x30] sm:$0xff]  ;;  %v4423_v15 = vld [vmem:[#allocation11 + $0x20] sm:$0xff] }
 0x15a   :  { %2470 = vmatpush.bf16.msra.mxu2 %v3978_v50  ;;  %2430 = vmatpush.bf16.msrb.mxu3 %v3562_v56  ;;  %v3479_v50 = vld [vmem:[#allocation8 + $0x318] sm:$0xf0]  ;;  %v4392_v56 = vld [vmem:[#allocation8 + $0x62c] sm:$0xf] }
 0x15b   :  { %2444 = vmatpush.bf16.msra.mxu0 %v3690_v59  ;;  %v3482_v58 = vor.u32 %v4292_v48, %v3479_v50  ;;  %v4360_v59 = vld [vmem:[#allocation8 + $0x52c] sm:$0xf]  ;;  %v2103_v19 = vpop.f32.mrf.mxu3 }
 0x15c   :  { %v3754_v3 = vor.u32 %v4360_v59, %v3751_v60  ;;  %v2104_v25 = vadd.f32 %v2103_v19, %v964_v0 }
 0x15d   :  { %2457 = vmatpush.bf16.msra.mxu1 %v3834_v1  ;;  %v3882_v1 = vor.u32 %v4392_v56, %v3879_v57 }
 0x15e   :  { %2471 = vmatpush.bf16.msra.mxu2 %v3962_v62  ;;  %2431 = vmatpush.bf16.msrb.mxu3 %v3546_v4  ;;  %v3610_v62 = vor.u32 %v4324_v52, %v3607_v53  ;;  %v4388_v4 = vld [vmem:[#allocation8 + $0x60c] sm:$0xf]  ;;  %v2118_v28 = vadd.f32 %v2117_v7, %v2104_v25  ;;  %v965_v52 = vperm.slane %v4841_v54, 1  ;;  %v4441_v25 = vld [vmem:[#allocation11 + $0xb0] sm:$0xff] }
 0x15f   :  { %2445 = vmatpush.bf16.msra.mxu0 %v3674_v6  ;;  %v3735_v6 = vld [vmem:[#allocation8 + $0x518] sm:$0xf0]  ;;  %v3866_v10 = vor.u32 %v4388_v4, %v3863_v2 }
 0x160   :  { %v3738_v13 = vor.u32 %v4356_v5, %v3735_v6 }
 0x161   :  { %2458 = vmatpush.bf16.msra.mxu1 %v3818_v12  ;;  %v2143_v12 = vpop.f32.mrf.mxu2 }
 0x162   :  { %2472 = vmatpush.bf16.msra.mxu2 %v3946_v9  ;;  %2432 = vmatpush.bf16.msrb.mxu3 %v3530_v44  ;;  %v2102_v9 = vadd.f32 %v2101_v61, %v964_v0 }
 0x163   :  { %2446 = vmatpush.bf16.msra.mxu0 %v3658_v21  ;;  %v2131_v21 = vpop.f32.mrf.mxu1 }
 0x164   :  { %v2116_v44 = vadd.f32 %v2115_v39, %v2102_v9  ;;  %v2132_v34 = vadd.f32 %v2131_v21, %v2118_v28  ;;  %v4440_v28 = vld [vmem:[#allocation11 + $0xa8] sm:$0xff] }
 0x165   :  { %2459 = vmatpush.bf16.msra.mxu1 %v3802_v27 }
 0x166   :  { %2473 = vmatpush.bf16.msra.mxu2 %v3930_v24  ;;  %2433 = vmatpush.bf16.msrb.mxu3 %v3514_v30  ;;  %v2130_v24 = vadd.f32 %v2129_v14, %v2116_v44 }
 0x167   :  { %2447 = vmatpush.bf16.msra.mxu0 %v3642_v33  ;;  %v4421_v33 = vld [vmem:[#allocation11 + $0x10] sm:$0xff] }
 0x168   :  { %v2144_v27 = vadd.f32 %v2143_v12, %v2130_v24 }
 0x169   :  { %2460 = vmatpush.bf16.msra.mxu1 %v3786_v43 }
 0x16a   :  { %2474 = vmatpush.bf16.msra.mxu2 %v3914_v36  ;;  %2434 = vmatpush.bf16.msrb.mxu3 %v3498_v46  ;;  %v4419_v46 = vld [vmem:[#allocation11] sm:$0xff] }
 0x16b   :  { %2448 = vmatpush.bf16.msra.mxu0 %v3626_v47 }
 0x16d   :  { %2461 = vmatpush.bf16.msra.mxu1 %v3770_v55  ;;  %v4427_v55 = vld [vmem:[#allocation11 + $0x40] sm:$0xff] }
 0x16e   :  { %2475 = vmatpush.bf16.msra.mxu2 %v3898_v51  ;;  %2435 = vmatpush.bf16.msrb.mxu3 %v3482_v58  ;;  %v2171_v22 = vpop.f32.mrf.mxu0 }
 0x16f   :  { %2449 = vmatpush.bf16.msra.mxu0 %v3610_v62 }
 0x171   :  { %2462 = vmatpush.bf16.msra.mxu1 %v3754_v3  ;;  %2436 = vmatmul.bf16.vlgmr.msrb.gmra.mxu3 %v4798_v45  ;;  %v4432_v45 = vld [vmem:[#allocation11 + $0x68] sm:$0xff] }
 0x172   :  { %2707 = vmatpush.bf16.msra.mxu3 %v4426_v63  ;;  %2476 = vmatpush.bf16.msra.mxu2 %v3882_v1 }
 0x173   :  { %2450 = vmatmul.bf16.vlgmr.msra.gmra.mxu0 %v4813_v16  ;;  %v2145_v16 = vpop.f32.mrf.mxu2  ;;  %v2157_v30 = vpop.f32.mrf.mxu3 }
 0x174   :  { %2721 = vmatpush.bf16.msrb.mxu0 %v4434_v11  ;;  %v2158_v31 = vadd.f32 %v2157_v30, %v2144_v27  ;;  %v2146_v37 = vadd.f32 %v2145_v16, %v2132_v34  ;;  %v4438_v30 = vld [vmem:[#allocation11 + $0x98] sm:$0xff]  ;;  %v4435_v34 = vld [vmem:[#allocation11 + $0x80] sm:$0xff] }
 0x175   :  { %2463 = vmatpush.bf16.msra.mxu1 %v3738_v13  ;;  %v2185_v32 = vpop.f32.mrf.mxu1 }
 0x176   :  { %2708 = vmatpush.bf16.msra.mxu3 %v4425_v8  ;;  %2477 = vmatpush.bf16.msra.mxu2 %v3866_v10  ;;  %v2172_v36 = vadd.f32 %v2171_v22, %v2158_v31  ;;  %v4442_v22 = vld [vmem:[#allocation11 + $0xb8] sm:$0xff]  ;;  %v4437_v31 = vld [vmem:[#allocation11 + $0x90] sm:$0xff] }
 0x178   :  { %2464 = vmatmul.bf16.vlgmr.msra.gmra.mxu1 %v4815_v23  ;;  %2722 = vmatpush.bf16.msrb.mxu0 %v4433_v18  ;;  %v4420_v23 = vld [vmem:[#allocation11 + $0x8] sm:$0xff]  ;;  %v2186_v20 = vadd.f32 %v2185_v32, %v2172_v36  ;;  %v966_v36 = vperm.slane %v4841_v54, 2 }
 0x179   :  { %2478 = vmatmul.bf16.vlgmr.msra.gmra.mxu2 %v4822_v49  ;;  %v2173_v49 = vpop.f32.mrf.mxu0  ;;  %2735 = vmatpush.bf16.msrb.mxu1 %v4442_v22 }
 0x17a   :  { %2709 = vmatpush.bf16.msra.mxu3 %v4424_v17  ;;  %v2492_v50 = vmul.f32 0.2, %v2186_v20  ;;  %vm2484_vm14 = vcmp.gt.f32.partialorder %v2186_v20, 0.0 }
 0x17b   :  { %v2199_v39 = vpop.f32.mrf.mxu2  ;;  %v2159_v43 = vpop.f32.mrf.mxu3 }
 0x17c   :  { %2723 = vmatpush.bf16.msrb.mxu0 %v4432_v45  ;;  %v2160_v40 = vadd.f32 %v2159_v43, %v2146_v37  ;;  %v2500_v57 = vsel %vm2484_vm14, %v2186_v20, %v2492_v50  ;;  %v2200_v61 = vadd.f32 %v2199_v39, %v965_v52  ;;  %v4450_v37 = vld [vmem:[#allocation11 + $0xf8] sm:$0xff]  ;;  %v4448_v50 = vld [vmem:[#allocation11 + $0xe8] sm:$0xff] }
 0x17d   :  { %v2187_v47 = vpop.f32.mrf.mxu1  ;;  %2736 = vmatpush.bf16.msrb.mxu1 %v4441_v25  ;;  %2749 = vmatpush.bf16.msrb.mxu2 %v4450_v37 }
 0x17e   :  { %2710 = vmatpush.bf16.msra.mxu3 %v4423_v15  ;;  %v2174_v41 = vadd.f32 %v2173_v49, %v2160_v40 }
 0x180   :  { %2724 = vmatpush.bf16.msrb.mxu0 %v4431_v29  ;;  %v2188_v51 = vadd.f32 %v2187_v47, %v2174_v41  ;;  %v4439_v29 = vld [vmem:[#allocation11 + $0xa0] sm:$0xff]  ;;  %v4449_v41 = vld [vmem:[#allocation11 + $0xf0] sm:$0xff] }
 0x181   :  { %v2227_v48 = vpop.f32.mrf.mxu0  ;;  %2737 = vmatpush.bf16.msrb.mxu1 %v4440_v28  ;;  %2750 = vmatpush.bf16.msrb.mxu2 %v4449_v41  ;;  %v4458_v41 = vld [vmem:[#allocation13 + $0x38] sm:$0xff] }
 0x182   :  { %2711 = vmatpush.bf16.msra.mxu3 %v4422_v26  ;;  %vm2488_vm15 = vcmp.gt.f32.partialorder %v2188_v51, 0.0  ;;  %v2496_v53 = vmul.f32 0.2, %v2188_v51 }
 0x183   :  { %v2213_v56 = vpop.f32.mrf.mxu3  ;;  %v2201_v59 = vpop.f32.mrf.mxu2 }
 0x184   :  { %2725 = vmatpush.bf16.msrb.mxu0 %v4430_v35  ;;  %v2504_v58 = vsel %vm2488_vm15, %v2188_v51, %v2496_v53  ;;  %v2214_v62 = vadd.f32 %v2213_v56, %v2200_v61  ;;  %v2202_v14 = vadd.f32 %v2201_v59, %v965_v52 }
 0x185   :  { %v2508_v60 = vpack.c.bf16 %v2504_v58, %v2500_v57  ;;  %v2241_v0 = vpop.f32.mrf.mxu1  ;;  %2738 = vmatpush.bf16.msrb.mxu1 %v4439_v29  ;;  %2751 = vmatpush.bf16.msrb.mxu2 %v4448_v50  ;;  %v4447_v58 = vld [vmem:[#allocation11 + $0xe0] sm:$0xff]  ;;  %v4454_v50 = vld [vmem:[#allocation13 + $0x18] sm:$0xff] }
 0x186   :  { %2712 = vmatpush.bf16.msra.mxu3 %v4421_v33  ;;  %v2228_v3 = vadd.f32 %v2227_v48, %v2214_v62  ;;  %v4436_v33 = vld [vmem:[#allocation11 + $0x88] sm:$0xff] }
 0x188   :  { %2726 = vmatpush.bf16.msrb.mxu0 %v4429_v38  ;;  %v2242_v5 = vadd.f32 %v2241_v0, %v2228_v3  ;;  %v4445_v3 = vld [vmem:[#allocation11 + $0xd0] sm:$0xff] }
 0x189   :  { %v2229_v63 = vpop.f32.mrf.mxu0  ;;  %2739 = vmatpush.bf16.msrb.mxu1 %v4438_v30  ;;  %2752 = vmatpush.bf16.msrb.mxu2 %v4447_v58  ;;  %v4475_v58 = vld [vmem:[%s4869_s6] ss:$0 sm:$0xff] }
 0x18a   :  { %2713 = vmatpush.bf16.msra.mxu3 %v4420_v23 }
 0x18b   :  { %v2215_v1 = vpop.f32.mrf.mxu3  ;;  %v2255_v2 = vpop.f32.mrf.mxu2 }
 0x18c   :  { %2727 = vmatpush.bf16.msrb.mxu0 %v4428_v42  ;;  %v2216_v4 = vadd.f32 %v2215_v1, %v2202_v14  ;;  %v2256_v9 = vadd.f32 %v2255_v2, %v2242_v5 }
 0x18d   :  { %v2243_v10 = vpop.f32.mrf.mxu1  ;;  %2740 = vmatpush.bf16.msrb.mxu1 %v4437_v31 }
 0x18e   :  { %2714 = vmatpush.bf16.msra.mxu3 %v4419_v46  ;;  %v2230_v6 = vadd.f32 %v2229_v63, %v2216_v4  ;;  %v4446_v63 = vld [vmem:[#allocation11 + $0xd8] sm:$0xff] }
 0x18f   :  { %2753 = vmatpush.bf16.msrb.mxu2 %v4446_v63 }
 0x190   :  { %2728 = vmatpush.bf16.msrb.mxu0 %v4427_v55  ;;  %v2244_v11 = vadd.f32 %v2243_v10, %v2230_v6 }
 0x191   :  { %2715 = vmatmul.bf16.vlgmr.msra.gmra.mxu3 %v2508_v60  ;;  %v2283_v7 = vpop.f32.mrf.mxu0  ;;  %2741 = vmatpush.bf16.msrb.mxu1 %v4436_v33 }
 0x192   :  { %2821 = vmatpush.bf16.msrb.mxu3 %v4458_v41 }
 0x193   :  { %v2257_v13 = vpop.f32.mrf.mxu2  ;;  %2754 = vmatpush.bf16.msrb.mxu2 %v4445_v3 }
 0x194   :  { %v2269_v8 = vpop.f32.mrf.mxu3  ;;  %v2258_v44 = vadd.f32 %v2257_v13, %v2244_v11  ;;  %v4443_v13 = vld [vmem:[#allocation11 + $0xc0] sm:$0xff] }
 0x195   :  { %v2270_v12 = vadd.f32 %v2269_v8, %v2256_v9  ;;  %v2297_v32 = vpop.f32.mrf.mxu1  ;;  %2742 = vmatpush.bf16.msrb.mxu1 %v4435_v34  ;;  %v4444_v8 = vld [vmem:[#allocation11 + $0xc8] sm:$0xff] }
 0x196   :  { %v2298_v39 = vadd.f32 %v2297_v32, %v966_v36 }
 0x197   :  { %v2284_v17 = vadd.f32 %v2283_v7, %v2270_v12  ;;  %2755 = vmatpush.bf16.msrb.mxu2 %v4444_v8 }
 0x199   :  { %v2285_v21 = vpop.f32.mrf.mxu0  ;;  %v2493_v15 = vmul.f32 0.2, %v2284_v17  ;;  %vm2485_vm0 = vcmp.gt.f32.partialorder %v2284_v17, 0.0 }
 0x19b   :  { %v2501_v16 = vsel %vm2485_vm0, %v2284_v17, %v2493_v15  ;;  %2756 = vmatpush.bf16.msrb.mxu2 %v4443_v13 }
 0x19c   :  { %v2271_v18 = vpop.f32.mrf.mxu3  ;;  %v2311_v49 = vpop.f32.mrf.mxu2 }
 0x19d   :  { %v2272_v19 = vadd.f32 %v2271_v18, %v2258_v44  ;;  %v2299_v23 = vpop.f32.mrf.mxu1  ;;  %v2312_v20 = vadd.f32 %v2311_v49, %v2298_v39  ;;  %v967_v44 = vperm.slane %v4841_v54, 3 }
 0x19e   :  { %v2300_v40 = vadd.f32 %v2299_v23, %v966_v36 }
 0x19f   :  { %v2286_v24 = vadd.f32 %v2285_v21, %v2272_v19 }
 0x1a1   :  { %vm2489_vm1 = vcmp.gt.f32.partialorder %v2286_v24, 0.0  ;;  %v2497_v45 = vmul.f32 0.2, %v2286_v24 }
 0x1a3   :  { %v2505_v26 = vsel %vm2489_vm1, %v2286_v24, %v2497_v45 }
 0x1a4   :  { %v2509_v27 = vpack.c.bf16 %v2505_v26, %v2501_v16  ;;  %v2313_v38 = vpop.f32.mrf.mxu2 }
 0x1a5   :  { %v2314_v48 = vadd.f32 %v2313_v38, %v2300_v40 }
 0x1a6   :  { %2729 = vmatmul.bf16.vlgmr.msrb.gmra.mxu0 %v2509_v27 }
 0x1b1   :  { %v2339_v43 = vpop.f32.mrf.mxu0 }
 0x1b4   :  { %v2325_v35 = vpop.f32.mrf.mxu3 }
 0x1b5   :  { %v2326_v46 = vadd.f32 %v2325_v35, %v2312_v20  ;;  %v2353_v42 = vpop.f32.mrf.mxu1 }
 0x1b7   :  { %v2340_v52 = vadd.f32 %v2339_v43, %v2326_v46 }
 0x1b9   :  { %v2341_v55 = vpop.f32.mrf.mxu0  ;;  %v2354_v56 = vadd.f32 %v2353_v42, %v2340_v52  ;;  %v4457_v42 = vld [vmem:[#allocation13 + $0x30] sm:$0xff]  ;;  %v4452_v52 = vld [vmem:[#allocation13 + $0x8] sm:$0xff] }
 0x1ba   :  { %2822 = vmatpush.bf16.msrb.mxu3 %v4457_v42 }
 0x1bc   :  { %v2327_v47 = vpop.f32.mrf.mxu3  ;;  %v2367_v51 = vpop.f32.mrf.mxu2 }
 0x1bd   :  { %v2328_v53 = vadd.f32 %v2327_v47, %v2314_v48  ;;  %v2355_v60 = vpop.f32.mrf.mxu1  ;;  %v2368_v61 = vadd.f32 %v2367_v51, %v2354_v56  ;;  %v4456_v47 = vld [vmem:[#allocation13 + $0x28] sm:$0xff]  ;;  %v4455_v48 = vld [vmem:[#allocation13 + $0x20] sm:$0xff]  ;;  %v4453_v51 = vld [vmem:[#allocation13 + $0x10] sm:$0xff] }
 0x1be   :  { %2823 = vmatpush.bf16.msrb.mxu3 %v4456_v47 }
 0x1bf   :  { %v2342_v57 = vadd.f32 %v2341_v55, %v2328_v53  ;;  %v4451_v53 = vld [vmem:[#allocation13] sm:$0xff] }
 0x1c1   :  { %v2356_v62 = vadd.f32 %v2355_v60, %v2342_v57 }
 0x1c2   :  { %2824 = vmatpush.bf16.msrb.mxu3 %v4455_v48 }
 0x1c4   :  { %v2369_v0 = vpop.f32.mrf.mxu2 }
 0x1c5   :  { %v2370_v14 = vadd.f32 %v2369_v0, %v2356_v62 }
 0x1c6   :  { %2825 = vmatpush.bf16.msrb.mxu3 %v4454_v50 }
 0x1ca   :  { %2826 = vmatpush.bf16.msrb.mxu3 %v4453_v51 }
 0x1ce   :  { %2827 = vmatpush.bf16.msrb.mxu3 %v4452_v52 }
 0x1d1   :  { %v2395_v6 = vpop.f32.mrf.mxu0 }
 0x1d2   :  { %v2396_v21 = vadd.f32 %v2395_v6, %v967_v44  ;;  %2828 = vmatpush.bf16.msrb.mxu3 %v4451_v53 }
 0x1d4   :  { %v2381_v59 = vpop.f32.mrf.mxu3 }
 0x1d5   :  { %v2382_v1 = vadd.f32 %v2381_v59, %v2368_v61  ;;  %v2409_v10 = vpop.f32.mrf.mxu1 }
 0x1d6   :  { %v2410_v22 = vadd.f32 %v2409_v10, %v2396_v21 }
 0x1d7   :  { %v2494_v2 = vmul.f32 0.2, %v2382_v1  ;;  %vm2486_vm2 = vcmp.gt.f32.partialorder %v2382_v1, 0.0 }
 0x1d9   :  { %v2502_v9 = vsel %vm2486_vm2, %v2382_v1, %v2494_v2  ;;  %v2397_v18 = vpop.f32.mrf.mxu0 }
 0x1da   :  { %v2398_v27 = vadd.f32 %v2397_v18, %v967_v44 }
 0x1dc   :  { %v2383_v4 = vpop.f32.mrf.mxu3  ;;  %v2423_v17 = vpop.f32.mrf.mxu2 }
 0x1dd   :  { %v2384_v5 = vadd.f32 %v2383_v4, %v2370_v14  ;;  %v2411_v19 = vpop.f32.mrf.mxu1  ;;  %v2424_v24 = vadd.f32 %v2423_v17, %v2410_v22 }
 0x1de   :  { %v2412_v29 = vadd.f32 %v2411_v19, %v2398_v27 }
 0x1df   :  { %vm2490_vm3 = vcmp.gt.f32.partialorder %v2384_v5, 0.0  ;;  %v2498_v7 = vmul.f32 0.2, %v2384_v5 }
 0x1e1   :  { %v2506_v11 = vsel %vm2490_vm3, %v2384_v5, %v2498_v7 }
 0x1e2   :  { %v2510_v12 = vpack.c.bf16 %v2506_v11, %v2502_v9 }
 0x1e4   :  { %2743 = vmatmul.bf16.vlgmr.msrb.gmra.mxu1 %v2510_v12  ;;  %v2425_v15 = vpop.f32.mrf.mxu2  ;;  %v4476_v12 = vld [vmem:[%s4871_s8] ss:$0 sm:$0xff] }
 0x1e5   :  { %v2426_v31 = vadd.f32 %v2425_v15, %v2412_v29 }
 0x1f0   :  { %v2451_v25 = vpop.f32.mrf.mxu0 }
 0x1f4   :  { %v2437_v45 = vpop.f32.mrf.mxu3 }
 0x1f5   :  { %v2438_v16 = vadd.f32 %v2437_v45, %v2424_v24  ;;  %v2465_v26 = vpop.f32.mrf.mxu1 }
 0x1f7   :  { %v2452_v28 = vadd.f32 %v2451_v25, %v2438_v16 }
 0x1f8   :  { %v2453_v34 = vpop.f32.mrf.mxu0 }
 0x1f9   :  { %v2466_v32 = vadd.f32 %v2465_v26, %v2452_v28 }
 0x1fc   :  { %v2479_v30 = vpop.f32.mrf.mxu2  ;;  %v2439_v49 = vpop.f32.mrf.mxu3 }
 0x1fd   :  { %v2440_v33 = vadd.f32 %v2439_v49, %v2426_v31  ;;  %v2480_v54 = vadd.f32 %v2479_v30, %v2466_v32  ;;  %v2467_v36 = vpop.f32.mrf.mxu1 }
 0x1ff   :  { %v2454_v35 = vadd.f32 %v2453_v34, %v2440_v33  ;;  %v2495_v38 = vmul.f32 0.2, %v2480_v54  ;;  %vm2487_vm4 = vcmp.gt.f32.partialorder %v2480_v54, 0.0 }
 0x201   :  { %v2468_v23 = vadd.f32 %v2467_v36, %v2454_v35  ;;  %v2503_v20 = vsel %vm2487_vm4, %v2480_v54, %v2495_v38 }
 0x204   :  { %v2481_v37 = vpop.f32.mrf.mxu2 }
 0x205   :  { %v2482_v39 = vadd.f32 %v2481_v37, %v2468_v23 }
 0x207   :  { %vm2491_vm5 = vcmp.gt.f32.partialorder %v2482_v39, 0.0  ;;  %v2499_v43 = vmul.f32 0.2, %v2482_v39 }
 0x209   :  { %v2507_v40 = vsel %vm2491_vm5, %v2482_v39, %v2499_v43 }
 0x20a   :  { %v2511_v46 = vpack.c.bf16 %v2507_v40, %v2503_v20 }
 0x20c   :  { %2757 = vmatmul.bf16.vlgmr.msrb.gmra.mxu2 %v2511_v46 }
 0x214   :  { %v2716_v55 = vpop.f32.mrf.mxu3 }
 0x215   :  { %v2717_v59 = vadd.f32 %v4475_v58, %v2716_v55 }
 0x21c   :  { %v2718_v60 = vpop.f32.mrf.mxu3 }
 0x21d   :  { %v2719_v0 = vadd.f32 %v4475_v58, %v2718_v60 }
 0x223   :  { %v2730_v56 = vpop.f32.mrf.mxu0 }
 0x224   :  { %v2731_v62 = vadd.f32 %v2730_v56, %v2717_v59 }
 0x22b   :  { %v2732_v63 = vpop.f32.mrf.mxu0 }
 0x22c   :  { %v2733_v3 = vadd.f32 %v2732_v63, %v2719_v0 }
 0x261   :  { %v2744_v57 = vpop.f32.mrf.mxu1 }
 0x262   :  { %v2745_v1 = vadd.f32 %v2744_v57, %v2731_v62 }
 0x269   :  { %v2746_v14 = vpop.f32.mrf.mxu1 }
 0x26a   :  { %v2747_v2 = vadd.f32 %v2746_v14, %v2733_v3 }
 0x28f   :  { %v2758_v61 = vpop.f32.mrf.mxu2 }
 0x290   :  { %v2759_v4 = vadd.f32 %v2758_v61, %v2745_v1 }
 0x292   :  { %v2765_v6 = vmul.f32 0.2, %v2759_v4  ;;  %vm2763_vm6 = vcmp.gt.f32.partialorder %v2759_v4, 0.0 }
 0x294   :  { %v2767_v9 = vsel %vm2763_vm6, %v2759_v4, %v2765_v6 }
 0x297   :  { %v2760_v5 = vpop.f32.mrf.mxu2 }
 0x298   :  { %v2761_v7 = vadd.f32 %v2760_v5, %v2747_v2 }
 0x29a   :  { %vm2764_vm7 = vcmp.gt.f32.partialorder %v2761_v7, 0.0  ;;  %v2766_v8 = vmul.f32 0.2, %v2761_v7 }
 0x29c   :  { %v2768_v10 = vsel %vm2764_vm7, %v2761_v7, %v2766_v8 }
 0x29d   :  { %v2769_v11 = vpack.c.bf16 %v2768_v10, %v2767_v9 }
 0x29f   :  { %2829 = vmatmul.bf16.vlgmr.msrb.gmra.mxu3 %v2769_v11 }
 0x322   :  { %v2830_v13 = vpop.f32.mrf.mxu3 }
 0x323   :  { %v2831_v17 = vadd.f32 %v4476_v12, %v2830_v13 }
 0x325   :  { %2835 = vst [vmem:[#allocation14] sm:$0xff] %v2831_v17 }
 0x32a   :  { %v2832_v44 = vpop.f32.mrf.mxu3 }
 0x32b   :  { %v2833_v18 = vadd.f32 %v4476_v12, %v2832_v44 }
 0x32d   :  { %2836 = vst [vmem:[#allocation14 + $0x8] sm:$0xff] %v2833_v18 }
 0x32e   :  { %2849 = dma.vmem_to_hbm [thread:$0]  %s2842_s27, 256, %s2844_s29, [#allocation4], %s4689_s12, %s4689_s12, %s4690_s5  }
 0x32f   :  { %4677 = dma.done.wait [#allocation4], 256  }
 0x330   :  { %4678 = vsyncadd [#allocation4], 4294967040 }
 0x331   :  { %2854 = vsyncpa [#allocation3], 1 }
 0x332   :  { %2855 = vsyncpa [#allocation6], 1 }
 0x333   :  { %2856 = vsyncpa [#allocation9], 1 }
 0x334   :  { %2857 = vsyncpa [#allocation12], 1 }
 0x335   :  { %2858 = vsyncpa [#allocation4], 1 }

// kernel: tpu_custom_call.1
= control target key start
LH: loop header
LB: loop body
LE: loop exit
PB: predicated region body
PF: predicated region fallthrough
CT: control target
= control target key end

     0   :  { %14 = vsyncpa [#allocation3], 0  ;;  %s4863_s0 = inlined_call_operand.hbm [shape: f32[16,128], index: 0, kind: input, shape index: {}]   ;;  %s4864_s1 = inlined_call_operand.hbm [shape: bf16[128,896], index: 1, kind: input, shape index: {}]   ;;  %s4865_s2 = inlined_call_operand.hbm [shape: f32[1,896], index: 2, kind: input, shape index: {}]   ;;  %s4866_s3 = inlined_call_operand.hbm [shape: bf16[896,512], index: 3, kind: input, shape index: {}]   ;;  %s4867_s4 = inlined_call_operand.hbm [shape: f32[1,512], index: 4, kind: input, shape index: {}]   ;;  %s4868_s5 = inlined_call_operand.hbm [shape: bf16[512,128], index: 5, kind: input, shape index: {}]   ;;  %s4869_s6 = inlined_call_operand.vmem [shape: f32[1,128], index: 6, kind: input, shape index: {}]   ;;  %s4870_s7 = inlined_call_operand.hbm [shape: bf16[128,128], index: 7, kind: input, shape index: {}]   ;;  %s4871_s8 = inlined_call_operand.vmem [shape: f32[1,128], index: 8, kind: input, shape index: {}]   ;;  %s4872_s9 = inlined_call_operand.hbm [shape: f32[16,128], index: 9, kind: output, shape index: {}]  }
   0x1   :  { %15 = vsyncpa [#allocation6], 0 }
   0x2   :  { %16 = vsyncpa [#allocation9], 0 }
   0x3   :  { %17 = vsyncpa [#allocation12], 0  ;;  %s36_s11 = sshll.u32 %s4864_s1, 4  ;;  %s37_s11 = int_to_ptr.hbm [resolvable:$true] %s36_s11 }
   0x4   :  { %18 = vsyncpa [#allocation4], 0  ;;  %s4679_s12 = smov [#allocation5]   ;;  %s60_s16 = sshll.u32 %s4866_s3, 4  ;;  %s61_s16 = int_to_ptr.hbm [resolvable:$true] %s60_s16 }
   0x5   :  { %s38_s13 = sshll.u32 %s4679_s12, 4  ;;  %s4680_s17 = smov 448   ;;  %s39_s13 = int_to_ptr.vmem [resolvable:$true] %s38_s13 }
   0x6   :  { %s4681_s18 = smov 28   ;;  %s4682_s19 = smov [#allocation8]  }
   0x7   :  { %44 = dma.hbm_to_vmem [thread:$0]  %s37_s11, 7168, %s39_s13, [#allocation6], %s4680_s17, %s4680_s17, %s4681_s18  }
   0x8   :  { %s62_s20 = sshll.u32 %s4682_s19, 4  ;;  %s4683_s21 = smov 256   ;;  %s63_s20 = int_to_ptr.vmem [resolvable:$true] %s62_s20 }
   0x9   :  { %s4684_s22 = smov 16   ;;  %s84_s24 = sshll.u32 %s4868_s5, 4  ;;  %s85_s24 = int_to_ptr.hbm [resolvable:$true] %s84_s24 }
   0xa   :  { %68 = dma.hbm_to_vmem [thread:$0]  %s61_s16, 28672, %s63_s20, [#allocation9], %s4683_s21, %s4683_s21, %s4684_s22  }
   0xb   :  { %s4685_s25 = smov [#allocation11]   ;;  %s23_s28 = sshll.u32 %s4863_s0, 4  ;;  %s24_s28 = int_to_ptr.hbm [resolvable:$true] %s23_s28 }
   0xc   :  { %s86_s26 = sshll.u32 %s4685_s25, 4  ;;  %s4686_s29 = smov 64   ;;  %s87_s26 = int_to_ptr.vmem [resolvable:$true] %s86_s26 }
   0xd   :  { %s4687_s30 = smov 4   ;;  %s4688_s10 = smov [#allocation2]  }
   0xe   :  { %92 = dma.hbm_to_vmem [thread:$0]  %s85_s24, 4096, %s87_s26, [#allocation12], %s4686_s29, %s4686_s29, %s4687_s30  }
   0xf   :  { %s25_s11 = sshll.u32 %s4688_s10, 4  ;;  %s4689_s12 = smov 128   ;;  %s26_s11 = int_to_ptr.vmem [resolvable:$true] %s25_s11 }
  0x10   :  { %s4690_s5 = smov 8   ;;  %s50_s0 = sshll.u32 %s4865_s2, 4  ;;  %s51_s0 = int_to_ptr.hbm [resolvable:$true] %s50_s0 }
  0x11   :  { %31 = dma.hbm_to_vmem [thread:$0]  %s24_s28, 256, %s26_s11, [#allocation3], %s4689_s12, %s4689_s12, %s4690_s5  }
  0x12   :  { %s4691_s15 = smov [#allocation7]   ;;  %s74_s19 = sshll.u32 %s4867_s4, 4  ;;  %s75_s19 = int_to_ptr.hbm [resolvable:$true] %s74_s19 }
  0x13   :  { %s52_s16 = sshll.u32 %s4691_s15, 4  ;;  %s4692_s20 = smov [#allocation10]   ;;  %s53_s16 = int_to_ptr.vmem [resolvable:$true] %s52_s16 }
  0x14   :  { %55 = dma.hbm_to_vmem [thread:$0]  %s51_s0, 112, %s53_s16, [#allocation6]  }
  0x15   :  { %s76_s21 = sshll.u32 %s4692_s20, 4  ;;  %s99_s23 = sshll.u32 %s4870_s7, 4  ;;  %s77_s21 = int_to_ptr.vmem [resolvable:$true] %s76_s21  ;;  %s100_s23 = int_to_ptr.hbm [resolvable:$true] %s99_s23 }
  0x16   :  { %79 = dma.hbm_to_vmem [thread:$0]  %s75_s19, 64, %s77_s21, [#allocation9]  }
  0x17   :  { %s4693_s2 = smov [#allocation13]  }
  0x18   :  { %s101_s24 = sshll.u32 %s4693_s2, 4  ;;  %s102_s24 = int_to_ptr.vmem [resolvable:$true] %s101_s24 }
  0x19   :  { %107 = dma.hbm_to_vmem [thread:$0]  %s100_s23, 1024, %s102_s24, [#allocation12], %s4686_s29, %s4686_s29, %s4687_s30  }
  0x1a   :  { %4669 = dma.done.wait [#allocation3], 256  }
  0x1b   :  { %4670 = vsyncadd [#allocation3], 4294967040 }
  0x1c   :  { %4671 = dma.done.wait [#allocation6], 7280  }
  0x1d   :  { %4672 = vsyncadd [#allocation6], 4294960016 }
  0x1e   :  { %4673 = dma.done.wait [#allocation9], 28736  }
  0x1f   :  { %4674 = vsyncadd [#allocation9], 4294938560 }
  0x20   :  { %4675 = dma.done.wait [#allocation12], 5120  }
  0x21   :  { %4676 = vsyncadd [#allocation12], 4294962176  ;;  %v3057_v0 = vld [vmem:[#allocation5 + $0x188] sm:$0xf]  ;;  %v4191_v1 = vld [vmem:[#allocation5 + $0x1a0] sm:$0xf0] }
  0x22   :  { %v4188_v2 = vld [vmem:[#allocation5 + $0x18c] sm:$0xf]  ;;  %v3058_v3 = vor.u32 %v4191_v1, %v3057_v0  ;;  %v3059_v4 = vld [vmem:[#allocation5 + $0x1a4] sm:$0xf0]  ;;  %v3065_v5 = vld [vmem:[#allocation5 + $0x190] sm:$0xf] }
  0x23   :  { %v4192_v6 = vld [vmem:[#allocation5 + $0x1a8] sm:$0xf0]  ;;  %v3062_v7 = vor.u32 %v4188_v2, %v3059_v4  ;;  %v4189_v9 = vld [vmem:[#allocation5 + $0x194] sm:$0xf]  ;;  %v3067_v10 = vld [vmem:[#allocation5 + $0x1ac] sm:$0xf0] }
  0x24   :  { %v3066_v8 = vor.u32 %v4192_v6, %v3065_v5  ;;  %v3029_v11 = vld [vmem:[#allocation5 + $0x150] sm:$0xf]  ;;  %816 = vmatpush.bf16.msra.mxu0 %v3058_v3  ;;  %v3070_v12 = vor.u32 %v4189_v9, %v3067_v10  ;;  %v4184_v13 = vld [vmem:[#allocation5 + $0x168] sm:$0xf0]  ;;  %v4181_v14 = vld [vmem:[#allocation5 + $0x154] sm:$0xf] }
  0x25   :  { %v3031_v15 = vld [vmem:[#allocation5 + $0x16c] sm:$0xf0]  ;;  %830 = vmatpush.bf16.msra.mxu1 %v3062_v7  ;;  %v3030_v16 = vor.u32 %v4184_v13, %v3029_v11  ;;  %v3037_v18 = vld [vmem:[#allocation5 + $0x158] sm:$0xf]  ;;  %v4185_v19 = vld [vmem:[#allocation5 + $0x170] sm:$0xf0] }
  0x26   :  { %844 = vmatpush.bf16.msra.mxu2 %v3066_v8  ;;  %v3034_v17 = vor.u32 %v4181_v14, %v3031_v15  ;;  %v4182_v20 = vld [vmem:[#allocation5 + $0x15c] sm:$0xf]  ;;  %858 = vmatpush.bf16.msra.mxu3 %v3070_v12  ;;  %v3038_v21 = vor.u32 %v4185_v19, %v3037_v18  ;;  %v3039_v22 = vld [vmem:[#allocation5 + $0x174] sm:$0xf0]  ;;  %v4177_v24 = vld [vmem:[#allocation5 + $0x130] sm:$0xf0] }
  0x27   :  { %v3001_v23 = vld [vmem:[#allocation5 + $0x118] sm:$0xf]  ;;  %v3042_v25 = vor.u32 %v4182_v20, %v3039_v22  ;;  %v4174_v26 = vld [vmem:[#allocation5 + $0x11c] sm:$0xf]  ;;  %v3009_v28 = vld [vmem:[#allocation5 + $0x120] sm:$0xf] }
  0x28   :  { %v3003_v27 = vld [vmem:[#allocation5 + $0x134] sm:$0xf0]  ;;  %817 = vmatpush.bf16.msra.mxu0 %v3030_v16  ;;  %v3002_v29 = vor.u32 %v4177_v24, %v3001_v23  ;;  %v4178_v30 = vld [vmem:[#allocation5 + $0x138] sm:$0xf0]  ;;  %v4175_v31 = vld [vmem:[#allocation5 + $0x124] sm:$0xf] }
  0x29   :  { %v3011_v32 = vld [vmem:[#allocation5 + $0x13c] sm:$0xf0]  ;;  %831 = vmatpush.bf16.msra.mxu1 %v3034_v17  ;;  %v3006_v33 = vor.u32 %v4174_v26, %v3003_v27  ;;  %v3010_v34 = vor.u32 %v4178_v30, %v3009_v28  ;;  %v4170_v36 = vld [vmem:[#allocation5 + $0xf8] sm:$0xf0]  ;;  %v4167_v37 = vld [vmem:[#allocation5 + $0xe4] sm:$0xf] }
  0x2a   :  { %845 = vmatpush.bf16.msra.mxu2 %v3038_v21  ;;  %v2973_v35 = vld [vmem:[#allocation5 + $0xe0] sm:$0xf]  ;;  %859 = vmatpush.bf16.msra.mxu3 %v3042_v25  ;;  %v3014_v38 = vor.u32 %v4175_v31, %v3011_v32  ;;  %v2981_v40 = vld [vmem:[#allocation5 + $0xe8] sm:$0xf]  ;;  %v4171_v41 = vld [vmem:[#allocation5 + $0x100] sm:$0xf0] }
  0x2b   :  { %v2975_v39 = vld [vmem:[#allocation5 + $0xfc] sm:$0xf0]  ;;  %v4168_v42 = vld [vmem:[#allocation5 + $0xec] sm:$0xf]  ;;  %v2983_v43 = vld [vmem:[#allocation5 + $0x104] sm:$0xf0]  ;;  %v2974_v44 = vor.u32 %v4170_v36, %v2973_v35  ;;  %v2982_v46 = vor.u32 %v4171_v41, %v2981_v40 }
  0x2c   :  { %818 = vmatpush.bf16.msra.mxu0 %v3002_v29  ;;  %v2978_v45 = vor.u32 %v4167_v37, %v2975_v39  ;;  %v2945_v47 = vld [vmem:[#allocation5 + $0xa8] sm:$0xf]  ;;  %v4163_v48 = vld [vmem:[#allocation5 + $0xc0] sm:$0xf0]  ;;  %v4160_v49 = vld [vmem:[#allocation5 + $0xac] sm:$0xf]  ;;  %v2986_v50 = vor.u32 %v4168_v42, %v2983_v43 }
  0x2d   :  { %832 = vmatpush.bf16.msra.mxu1 %v3006_v33  ;;  %v2947_v51 = vld [vmem:[#allocation5 + $0xc4] sm:$0xf0]  ;;  %v2953_v52 = vld [vmem:[#allocation5 + $0xb0] sm:$0xf]  ;;  %v4164_v53 = vld [vmem:[#allocation5 + $0xc8] sm:$0xf0]  ;;  %v2946_v56 = vor.u32 %v4163_v48, %v2945_v47 }
  0x2e   :  { %846 = vmatpush.bf16.msra.mxu2 %v3010_v34  ;;  %860 = vmatpush.bf16.msra.mxu3 %v3014_v38  ;;  %v4161_v54 = vld [vmem:[#allocation5 + $0xb4] sm:$0xf]  ;;  %v2955_v55 = vld [vmem:[#allocation5 + $0xcc] sm:$0xf0]  ;;  %v2950_v57 = vor.u32 %v4160_v49, %v2947_v51  ;;  %v2954_v58 = vor.u32 %v4164_v53, %v2953_v52  ;;  %v4156_v60 = vld [vmem:[#allocation5 + $0x88] sm:$0xf0] }
  0x2f   :  { %v2917_v59 = vld [vmem:[#allocation5 + $0x70] sm:$0xf]  ;;  %v4153_v61 = vld [vmem:[#allocation5 + $0x74] sm:$0xf]  ;;  %v2958_v62 = vor.u32 %v4161_v54, %v2955_v55  ;;  %v2925_v0 = vld [vmem:[#allocation5 + $0x78] sm:$0xf] }
  0x30   :  { %819 = vmatpush.bf16.msra.mxu0 %v2974_v44  ;;  %v2919_v63 = vld [vmem:[#allocation5 + $0x8c] sm:$0xf0]  ;;  %v4157_v1 = vld [vmem:[#allocation5 + $0x90] sm:$0xf0]  ;;  %v4154_v2 = vld [vmem:[#allocation5 + $0x7c] sm:$0xf]  ;;  %v2918_v4 = vor.u32 %v4156_v60, %v2917_v59 }
  0x31   :  { %833 = vmatpush.bf16.msra.mxu1 %v2978_v45  ;;  %v2927_v3 = vld [vmem:[#allocation5 + $0x94] sm:$0xf0]  ;;  %v2922_v5 = vor.u32 %v4153_v61, %v2919_v63  ;;  %v2926_v6 = vor.u32 %v4157_v1, %v2925_v0  ;;  %v4149_v8 = vld [vmem:[#allocation5 + $0x50] sm:$0xf0]  ;;  %v4146_v9 = vld [vmem:[#allocation5 + $0x3c] sm:$0xf] }
  0x32   :  { %847 = vmatpush.bf16.msra.mxu2 %v2982_v46  ;;  %861 = vmatpush.bf16.msra.mxu3 %v2986_v50  ;;  %v2889_v7 = vld [vmem:[#allocation5 + $0x38] sm:$0xf]  ;;  %v2930_v10 = vor.u32 %v4154_v2, %v2927_v3  ;;  %v2897_v12 = vld [vmem:[#allocation5 + $0x40] sm:$0xf]  ;;  %v4150_v13 = vld [vmem:[#allocation5 + $0x58] sm:$0xf0] }
  0x33   :  { %v2891_v11 = vld [vmem:[#allocation5 + $0x54] sm:$0xf0]  ;;  %v4147_v14 = vld [vmem:[#allocation5 + $0x44] sm:$0xf]  ;;  %v2899_v15 = vld [vmem:[#allocation5 + $0x5c] sm:$0xf0]  ;;  %v2890_v16 = vor.u32 %v4149_v8, %v2889_v7  ;;  %v2898_v20 = vor.u32 %v4150_v13, %v2897_v12 }
  0x34   :  { %820 = vmatpush.bf16.msra.mxu0 %v2946_v56  ;;  %v2861_v17 = vld [vmem:[#allocation5] sm:$0xf]  ;;  %v4142_v18 = vld [vmem:[#allocation5 + $0x18] sm:$0xf0]  ;;  %v2894_v19 = vor.u32 %v4146_v9, %v2891_v11  ;;  %v4139_v21 = vld [vmem:[#allocation5 + $0x4] sm:$0xf]  ;;  %v2902_v24 = vor.u32 %v4147_v14, %v2899_v15 }
  0x35   :  { %834 = vmatpush.bf16.msra.mxu1 %v2950_v57  ;;  %v2863_v22 = vld [vmem:[#allocation5 + $0x1c] sm:$0xf0]  ;;  %v2869_v23 = vld [vmem:[#allocation5 + $0x8] sm:$0xf]  ;;  %v4143_v25 = vld [vmem:[#allocation5 + $0x20] sm:$0xf0]  ;;  %v2862_v31 = vor.u32 %v4142_v18, %v2861_v17 }
  0x36   :  { %848 = vmatpush.bf16.msra.mxu2 %v2954_v58  ;;  %862 = vmatpush.bf16.msra.mxu3 %v2958_v62  ;;  %v4140_v26 = vld [vmem:[#allocation5 + $0xc] sm:$0xf]  ;;  %v2871_v27 = vld [vmem:[#allocation5 + $0x24] sm:$0xf0]  ;;  %v3073_v28 = vld [vmem:[#allocation5 + $0x198] sm:$0xf]  ;;  %v2866_v35 = vor.u32 %v4139_v21, %v2863_v22  ;;  %v2870_v36 = vor.u32 %v4143_v25, %v2869_v23 }
  0x37   :  { %v4193_v29 = vld [vmem:[#allocation5 + $0x1b0] sm:$0xf0]  ;;  %v4190_v30 = vld [vmem:[#allocation5 + $0x19c] sm:$0xf]  ;;  %v3075_v32 = vld [vmem:[#allocation5 + $0x1b4] sm:$0xf0]  ;;  %v2874_v39 = vor.u32 %v4140_v26, %v2871_v27 }
  0x38   :  { %821 = vmatpush.bf16.msra.mxu0 %v2918_v4  ;;  %v3081_v33 = vld [vmem:[#allocation5 + $0x1a0] sm:$0xf]  ;;  %v4194_v34 = vld [vmem:[#allocation5 + $0x1b8] sm:$0xf0]  ;;  %v510_v37 = vld [vmem:[#allocation2] sm:$0xff]  ;;  %v3074_v40 = vor.u32 %v4193_v29, %v3073_v28  ;;  %v3078_v41 = vor.u32 %v4190_v30, %v3075_v32  ;;  %s4694_s26 = smov [#allocation14]  }
  0x39   :  { %835 = vmatpush.bf16.msra.mxu1 %v2922_v5  ;;  %v511_v38 = vld [vmem:[#allocation2 + $0x8] sm:$0xff]  ;;  %v3082_v42 = vor.u32 %v4194_v34, %v3081_v33  ;;  %v3045_v43 = vld [vmem:[#allocation5 + $0x160] sm:$0xf]  ;;  %v4183_v45 = vld [vmem:[#allocation5 + $0x164] sm:$0xf]  ;;  %s2841_s27 = sshll.u32 %s4694_s26, 4  ;;  %s2842_s27 = int_to_ptr.vmem [resolvable:$true] %s2841_s27 }
  0x3a   :  { %849 = vmatpush.bf16.msra.mxu2 %v2926_v6  ;;  %863 = vmatpush.bf16.msra.mxu3 %v2930_v10  ;;  %v4186_v44 = vld [vmem:[#allocation5 + $0x178] sm:$0xf0]  ;;  %v4775_v46 = vpack.c.bf16 %v511_v38, %v510_v37  ;;  %v3047_v47 = vld [vmem:[#allocation5 + $0x17c] sm:$0xf0]  ;;  %v3053_v48 = vld [vmem:[#allocation5 + $0x168] sm:$0xf] }
  0x3b   :  { %v4187_v49 = vld [vmem:[#allocation5 + $0x180] sm:$0xf0]  ;;  %v3046_v50 = vor.u32 %v4186_v44, %v3045_v43  ;;  %v3050_v51 = vor.u32 %v4183_v45, %v3047_v47  ;;  %v3017_v53 = vld [vmem:[#allocation5 + $0x128] sm:$0xf]  ;;  %v4176_v55 = vld [vmem:[#allocation5 + $0x12c] sm:$0xf] }
  0x3c   :  { %822 = vmatpush.bf16.msra.mxu0 %v2890_v16  ;;  %v3054_v52 = vor.u32 %v4187_v49, %v3053_v48  ;;  %v4179_v54 = vld [vmem:[#allocation5 + $0x140] sm:$0xf0]  ;;  %v3019_v56 = vld [vmem:[#allocation5 + $0x144] sm:$0xf0]  ;;  %v3025_v57 = vld [vmem:[#allocation5 + $0x130] sm:$0xf] }
  0x3d   :  { %836 = vmatpush.bf16.msra.mxu1 %v2894_v19  ;;  %v4180_v58 = vld [vmem:[#allocation5 + $0x148] sm:$0xf0]  ;;  %v2989_v59 = vld [vmem:[#allocation5 + $0xf0] sm:$0xf]  ;;  %v3018_v60 = vor.u32 %v4179_v54, %v3017_v53  ;;  %v4169_v62 = vld [vmem:[#allocation5 + $0xf4] sm:$0xf]  ;;  %v3022_v0 = vor.u32 %v4176_v55, %v3019_v56 }
  0x3e   :  { %850 = vmatpush.bf16.msra.mxu2 %v2898_v20  ;;  %864 = vmatpush.bf16.msra.mxu3 %v2902_v24  ;;  %v4172_v61 = vld [vmem:[#allocation5 + $0x108] sm:$0xf0]  ;;  %v2991_v63 = vld [vmem:[#allocation5 + $0x10c] sm:$0xf0]  ;;  %v3026_v1 = vor.u32 %v4180_v58, %v3025_v57  ;;  %v2997_v2 = vld [vmem:[#allocation5 + $0xf8] sm:$0xf] }
  0x3f   :  { %v3197_v3 = vld [vmem:[#allocation8 + $0xe0] sm:$0xf]  ;;  %v4225_v4 = vld [vmem:[#allocation8 + $0xec] sm:$0xf0]  ;;  %v4173_v5 = vld [vmem:[#allocation5 + $0x110] sm:$0xf0]  ;;  %v2990_v9 = vor.u32 %v4172_v61, %v2989_v59  ;;  %v2994_v13 = vor.u32 %v4169_v62, %v2991_v63 }
  0x40   :  { %823 = vmatpush.bf16.msra.mxu0 %v2862_v31  ;;  %v3198_v6 = vor.u32 %v4225_v4, %v3197_v3  ;;  %v3181_v7 = vld [vmem:[#allocation8 + $0xc0] sm:$0xf]  ;;  %v4221_v8 = vld [vmem:[#allocation8 + $0xcc] sm:$0xf0]  ;;  %v4165_v11 = vld [vmem:[#allocation5 + $0xd0] sm:$0xf0]  ;;  %v2998_v14 = vor.u32 %v4173_v5, %v2997_v2 }
  0x41   :  { %837 = vmatpush.bf16.msra.mxu1 %v2866_v35  ;;  %v2961_v10 = vld [vmem:[#allocation5 + $0xb8] sm:$0xf]  ;;  %v3182_v12 = vor.u32 %v4221_v8, %v3181_v7  ;;  %v4162_v15 = vld [vmem:[#allocation5 + $0xbc] sm:$0xf]  ;;  %v3165_v16 = vld [vmem:[#allocation8 + $0xa0] sm:$0xf] }
  0x42   :  { %851 = vmatpush.bf16.msra.mxu2 %v2870_v36  ;;  %865 = vmatpush.bf16.msra.mxu3 %v2874_v39  ;;  %v4217_v17 = vld [vmem:[#allocation8 + $0xac] sm:$0xf0]  ;;  %v2969_v19 = vld [vmem:[#allocation5 + $0xc0] sm:$0xf]  ;;  %v4166_v20 = vld [vmem:[#allocation5 + $0xd8] sm:$0xf0]  ;;  %v2962_v21 = vor.u32 %v4165_v11, %v2961_v10 }
  0x43   :  { %824 = vmatmul.bf16.vlgmr.msra.gmra.mxu0 %v4775_v46  ;;  %v2963_v18 = vld [vmem:[#allocation5 + $0xd4] sm:$0xf0]  ;;  %v2933_v22 = vld [vmem:[#allocation5 + $0x80] sm:$0xf]  ;;  %v4158_v23 = vld [vmem:[#allocation5 + $0x98] sm:$0xf0]  ;;  %v3166_v24 = vor.u32 %v4217_v17, %v3165_v16  ;;  %v2970_v26 = vor.u32 %v4166_v20, %v2969_v19 }
  0x44   :  { %872 = vmatpush.bf16.msrb.mxu0 %v3074_v40  ;;  %838 = vmatmul.bf16.vlgmr.msra.gmra.mxu1 %v4775_v46  ;;  %v2966_v25 = vor.u32 %v4162_v15, %v2963_v18  ;;  %v4155_v27 = vld [vmem:[#allocation5 + $0x84] sm:$0xf]  ;;  %v3149_v28 = vld [vmem:[#allocation8 + $0x80] sm:$0xf]  ;;  %v4213_v29 = vld [vmem:[#allocation8 + $0x8c] sm:$0xf0]  ;;  %v2934_v33 = vor.u32 %v4158_v23, %v2933_v22 }
  0x45   :  { %886 = vmatpush.bf16.msrb.mxu1 %v3078_v41  ;;  %852 = vmatmul.bf16.vlgmr.msra.gmra.mxu2 %v4775_v46  ;;  %v2935_v30 = vld [vmem:[#allocation5 + $0x9c] sm:$0xf0]  ;;  %v2941_v31 = vld [vmem:[#allocation5 + $0x88] sm:$0xf]  ;;  %v4159_v32 = vld [vmem:[#allocation5 + $0xa0] sm:$0xf0]  ;;  %v3150_v36 = vor.u32 %v4213_v29, %v3149_v28 }
  0x46   :  { %900 = vmatpush.bf16.msrb.mxu2 %v3082_v42  ;;  %866 = vmatmul.bf16.vlgmr.msra.gmra.mxu3 %v4775_v46  ;;  %v2905_v34 = vld [vmem:[#allocation5 + $0x48] sm:$0xf]  ;;  %v4151_v35 = vld [vmem:[#allocation5 + $0x60] sm:$0xf0]  ;;  %v2938_v37 = vor.u32 %v4155_v27, %v2935_v30  ;;  %v2942_v38 = vor.u32 %v4159_v32, %v2941_v31  ;;  %v4148_v39 = vld [vmem:[#allocation5 + $0x4c] sm:$0xf] }
  0x47   :  { %2092 = vmatpush.bf16.msrb.mxu3 %v3198_v6  ;;  %v3133_v40 = vld [vmem:[#allocation8 + $0x60] sm:$0xf]  ;;  %v4209_v41 = vld [vmem:[#allocation8 + $0x6c] sm:$0xf0]  ;;  %v2913_v43 = vld [vmem:[#allocation5 + $0x50] sm:$0xf]  ;;  %v2906_v48 = vor.u32 %v4151_v35, %v2905_v34 }
  0x48   :  { %873 = vmatpush.bf16.msrb.mxu0 %v3046_v50  ;;  %v2907_v42 = vld [vmem:[#allocation5 + $0x64] sm:$0xf0]  ;;  %v4152_v44 = vld [vmem:[#allocation5 + $0x68] sm:$0xf0]  ;;  %v2877_v45 = vld [vmem:[#allocation5 + $0x10] sm:$0xf] }
  0x49   :  { %887 = vmatpush.bf16.msrb.mxu1 %v3050_v51  ;;  %v4144_v47 = vld [vmem:[#allocation5 + $0x28] sm:$0xf0]  ;;  %v4141_v49 = vld [vmem:[#allocation5 + $0x14] sm:$0xf]  ;;  %v2879_v50 = vld [vmem:[#allocation5 + $0x2c] sm:$0xf0]  ;;  %v3134_v51 = vor.u32 %v4209_v41, %v3133_v40  ;;  %v2910_v53 = vor.u32 %v4148_v39, %v2907_v42  ;;  %v2914_v54 = vor.u32 %v4152_v44, %v2913_v43 }
  0x4a   :  { %901 = vmatpush.bf16.msrb.mxu2 %v3054_v52  ;;  %v3117_v52 = vld [vmem:[#allocation8 + $0x40] sm:$0xf]  ;;  %v4205_v55 = vld [vmem:[#allocation8 + $0x4c] sm:$0xf0]  ;;  %v4145_v57 = vld [vmem:[#allocation5 + $0x30] sm:$0xf0]  ;;  %v2878_v62 = vor.u32 %v4144_v47, %v2877_v45  ;;  %v2882_v2 = vor.u32 %v4141_v49, %v2879_v50 }
  0x4b   :  { %2093 = vmatpush.bf16.msrb.mxu3 %v3182_v12  ;;  %v2885_v56 = vld [vmem:[#allocation5 + $0x18] sm:$0xf]  ;;  %v3325_v58 = vld [vmem:[#allocation8 + $0x1e0] sm:$0xf]  ;;  %s2843_s29 = sshll.u32 %s4872_s9, 4  ;;  %s2844_s29 = int_to_ptr.hbm [resolvable:$true] %s2843_s29 }
  0x4c   :  { %874 = vmatpush.bf16.msrb.mxu0 %v3018_v60  ;;  %v4257_v59 = vld [vmem:[#allocation8 + $0x1ec] sm:$0xf0]  ;;  %v3453_v60 = vld [vmem:[#allocation8 + $0x2e0] sm:$0xf]  ;;  %v2886_v3 = vor.u32 %v4145_v57, %v2885_v56 }
  0x4d   :  { %888 = vmatpush.bf16.msrb.mxu1 %v3022_v0  ;;  %v4289_v61 = vld [vmem:[#allocation8 + $0x2ec] sm:$0xf0]  ;;  %v3581_v63 = vld [vmem:[#allocation8 + $0x3e0] sm:$0xf]  ;;  %v3326_v4 = vor.u32 %v4257_v59, %v3325_v58 }
  0x4e   :  { %902 = vmatpush.bf16.msrb.mxu2 %v3026_v1  ;;  %v4321_v0 = vld [vmem:[#allocation8 + $0x3ec] sm:$0xf0]  ;;  %v3118_v1 = vor.u32 %v4205_v55, %v3117_v52  ;;  %v3309_v5 = vld [vmem:[#allocation8 + $0x1c0] sm:$0xf]  ;;  %v3454_v6 = vor.u32 %v4289_v61, %v3453_v60 }
  0x4f   :  { %2094 = vmatpush.bf16.msrb.mxu3 %v3166_v24  ;;  %v3101_v7 = vld [vmem:[#allocation8 + $0x20] sm:$0xf]  ;;  %v4201_v8 = vld [vmem:[#allocation8 + $0x2c] sm:$0xf0]  ;;  %v3582_v10 = vor.u32 %v4321_v0, %v3581_v63 }
  0x50   :  { %875 = vmatpush.bf16.msrb.mxu0 %v2990_v9  ;;  %v4253_v9 = vld [vmem:[#allocation8 + $0x1cc] sm:$0xf0]  ;;  %v3437_v11 = vld [vmem:[#allocation8 + $0x2c0] sm:$0xf]  ;;  %v3102_v16 = vor.u32 %v4201_v8, %v3101_v7 }
  0x51   :  { %889 = vmatpush.bf16.msrb.mxu1 %v2994_v13  ;;  %v4285_v12 = vld [vmem:[#allocation8 + $0x2cc] sm:$0xf0]  ;;  %v3565_v13 = vld [vmem:[#allocation8 + $0x3c0] sm:$0xf]  ;;  %v3310_v17 = vor.u32 %v4253_v9, %v3309_v5 }
  0x52   :  { %903 = vmatpush.bf16.msrb.mxu2 %v2998_v14  ;;  %v4317_v14 = vld [vmem:[#allocation8 + $0x3cc] sm:$0xf0]  ;;  %v3293_v15 = vld [vmem:[#allocation8 + $0x1a0] sm:$0xf]  ;;  %v3438_v19 = vor.u32 %v4285_v12, %v3437_v11 }
  0x53   :  { %2095 = vmatpush.bf16.msrb.mxu3 %v3150_v36  ;;  %v4249_v18 = vld [vmem:[#allocation8 + $0x1ac] sm:$0xf0]  ;;  %v3085_v20 = vld [vmem:[#allocation8] sm:$0xf]  ;;  %v3566_v22 = vor.u32 %v4317_v14, %v3565_v13 }
  0x54   :  { %876 = vmatpush.bf16.msrb.mxu0 %v2962_v21  ;;  %v4197_v21 = vld [vmem:[#allocation8 + $0xc] sm:$0xf0]  ;;  %v3421_v23 = vld [vmem:[#allocation8 + $0x2a0] sm:$0xf]  ;;  %v3294_v30 = vor.u32 %v4249_v18, %v3293_v15 }
  0x55   :  { %890 = vmatpush.bf16.msrb.mxu1 %v2966_v25  ;;  %v4281_v24 = vld [vmem:[#allocation8 + $0x2ac] sm:$0xf0]  ;;  %v3549_v25 = vld [vmem:[#allocation8 + $0x3a0] sm:$0xf]  ;;  %v3086_v29 = vor.u32 %v4197_v21, %v3085_v20 }
  0x56   :  { %904 = vmatpush.bf16.msrb.mxu2 %v2970_v26  ;;  %v4313_v26 = vld [vmem:[#allocation8 + $0x3ac] sm:$0xf0]  ;;  %v3709_v27 = vld [vmem:[#allocation8 + $0x4e0] sm:$0xf] }
  0x57   :  { %2096 = vmatpush.bf16.msrb.mxu3 %v3134_v51  ;;  %v4353_v28 = vld [vmem:[#allocation8 + $0x4ec] sm:$0xf0]  ;;  %v3277_v31 = vld [vmem:[#allocation8 + $0x180] sm:$0xf]  ;;  %v3550_v34 = vor.u32 %v4313_v26, %v3549_v25  ;;  %v4223_v25 = vld [vmem:[#allocation8 + $0xe4] sm:$0xf] }
  0x58   :  { %877 = vmatpush.bf16.msrb.mxu0 %v2934_v33  ;;  %v4245_v32 = vld [vmem:[#allocation8 + $0x18c] sm:$0xf0]  ;;  %v3422_v33 = vor.u32 %v4281_v24, %v3421_v23  ;;  %v3405_v35 = vld [vmem:[#allocation8 + $0x280] sm:$0xf]  ;;  %v3199_v26 = vld [vmem:[#allocation8 + $0xf0] sm:$0xf0] }
  0x59   :  { %891 = vmatpush.bf16.msrb.mxu1 %v2938_v37  ;;  %v4277_v36 = vld [vmem:[#allocation8 + $0x28c] sm:$0xf0]  ;;  %v3533_v37 = vld [vmem:[#allocation8 + $0x380] sm:$0xf]  ;;  %v3278_v41 = vor.u32 %v4245_v32, %v3277_v31 }
  0x5a   :  { %905 = vmatpush.bf16.msrb.mxu2 %v2942_v38  ;;  %v3710_v38 = vor.u32 %v4353_v28, %v3709_v27  ;;  %v4309_v39 = vld [vmem:[#allocation8 + $0x38c] sm:$0xf0]  ;;  %v3693_v40 = vld [vmem:[#allocation8 + $0x4c0] sm:$0xf]  ;;  %v3406_v44 = vor.u32 %v4277_v36, %v3405_v35 }
  0x5b   :  { %2097 = vmatpush.bf16.msrb.mxu3 %v3118_v1  ;;  %v3261_v42 = vld [vmem:[#allocation8 + $0x160] sm:$0xf]  ;;  %v4241_v43 = vld [vmem:[#allocation8 + $0x16c] sm:$0xf0]  ;;  %v3534_v45 = vor.u32 %v4309_v39, %v3533_v37  ;;  %v4219_v37 = vld [vmem:[#allocation8 + $0xc4] sm:$0xf] }
  0x5c   :  { %878 = vmatpush.bf16.msrb.mxu0 %v2906_v48  ;;  %v3389_v47 = vld [vmem:[#allocation8 + $0x260] sm:$0xf]  ;;  %v4273_v48 = vld [vmem:[#allocation8 + $0x26c] sm:$0xf0] }
  0x5d   :  { %892 = vmatpush.bf16.msrb.mxu1 %v2910_v53  ;;  %v3517_v49 = vld [vmem:[#allocation8 + $0x360] sm:$0xf]  ;;  %v4305_v51 = vld [vmem:[#allocation8 + $0x36c] sm:$0xf0]  ;;  %v3390_v57 = vor.u32 %v4273_v48, %v3389_v47 }
  0x5e   :  { %906 = vmatpush.bf16.msrb.mxu2 %v2914_v54  ;;  %v3677_v52 = vld [vmem:[#allocation8 + $0x4a0] sm:$0xf]  ;;  %v4345_v53 = vld [vmem:[#allocation8 + $0x4ac] sm:$0xf0]  ;;  %v3262_v54 = vor.u32 %v4241_v43, %v3261_v42  ;;  %v3518_v58 = vor.u32 %v4305_v51, %v3517_v49 }
  0x5f   :  { %2098 = vmatpush.bf16.msrb.mxu3 %v3102_v16  ;;  %v3245_v55 = vld [vmem:[#allocation8 + $0x140] sm:$0xf]  ;;  %v4237_v56 = vld [vmem:[#allocation8 + $0x14c] sm:$0xf0] }
  0x60   :  { %879 = vmatpush.bf16.msrb.mxu0 %v2878_v62  ;;  %v3373_v59 = vld [vmem:[#allocation8 + $0x240] sm:$0xf]  ;;  %v4269_v60 = vld [vmem:[#allocation8 + $0x24c] sm:$0xf0]  ;;  %v3678_v62 = vor.u32 %v4345_v53, %v3677_v52  ;;  %v3167_v52 = vld [vmem:[#allocation8 + $0xb0] sm:$0xf0] }
  0x61   :  { %893 = vmatpush.bf16.msrb.mxu1 %v2882_v2  ;;  %v3501_v61 = vld [vmem:[#allocation8 + $0x340] sm:$0xf]  ;;  %v4301_v63 = vld [vmem:[#allocation8 + $0x34c] sm:$0xf0]  ;;  %v3246_v2 = vor.u32 %v4237_v56, %v3245_v55 }
  0x62   :  { %907 = vmatpush.bf16.msrb.mxu2 %v2886_v3  ;;  %v3661_v0 = vld [vmem:[#allocation8 + $0x480] sm:$0xf]  ;;  %v4341_v1 = vld [vmem:[#allocation8 + $0x48c] sm:$0xf0] }
  0x63   :  { %880 = vmatmul.bf16.vlgmr.msrb.gmra.mxu0 %v4775_v46  ;;  %2099 = vmatpush.bf16.msrb.mxu3 %v3086_v29  ;;  %v3229_v3 = vld [vmem:[#allocation8 + $0x120] sm:$0xf]  ;;  %v4233_v5 = vld [vmem:[#allocation8 + $0x12c] sm:$0xf0]  ;;  %v3662_v9 = vor.u32 %v4341_v1, %v3661_v0  ;;  %v3151_v0 = vld [vmem:[#allocation8 + $0x90] sm:$0xf0] }
  0x64   :  { %2106 = vmatpush.bf16.msra.mxu0 %v3326_v4  ;;  %894 = vmatmul.bf16.vlgmr.msrb.gmra.mxu1 %v4775_v46  ;;  %v3374_v4 = vor.u32 %v4269_v60, %v3373_v59  ;;  %v3357_v7 = vld [vmem:[#allocation8 + $0x220] sm:$0xf]  ;;  %v4265_v8 = vld [vmem:[#allocation8 + $0x22c] sm:$0xf0]  ;;  %v3230_v12 = vor.u32 %v4233_v5, %v3229_v3 }
  0x65   :  { %2120 = vmatpush.bf16.msra.mxu1 %v3454_v6  ;;  %908 = vmatmul.bf16.vlgmr.msrb.gmra.mxu2 %v4775_v46  ;;  %v4349_v46 = vld [vmem:[#allocation8 + $0x4cc] sm:$0xf0]  ;;  %v3502_v6 = vor.u32 %v4301_v63, %v3501_v61  ;;  %v3213_v13 = vld [vmem:[#allocation8 + $0x100] sm:$0xf]  ;;  %v3358_v16 = vor.u32 %v4265_v8, %v3357_v7 }
  0x66   :  { %2134 = vmatpush.bf16.msra.mxu2 %v3582_v10  ;;  %v3694_v50 = vor.u32 %v4349_v46, %v3693_v40  ;;  %v3485_v10 = vld [vmem:[#allocation8 + $0x320] sm:$0xf]  ;;  %v4297_v11 = vld [vmem:[#allocation8 + $0x32c] sm:$0xf0] }
  0x67   :  { %2148 = vmatpush.bf16.msra.mxu3 %v3710_v38  ;;  %v4229_v14 = vld [vmem:[#allocation8 + $0x10c] sm:$0xf0]  ;;  %v3837_v15 = vld [vmem:[#allocation8 + $0x5e0] sm:$0xf]  ;;  %v3486_v18 = vor.u32 %v4297_v11, %v3485_v10  ;;  %v3183_v38 = vld [vmem:[#allocation8 + $0xd0] sm:$0xf0] }
  0x68   :  { %2107 = vmatpush.bf16.msra.mxu0 %v3310_v17  ;;  %v4385_v17 = vld [vmem:[#allocation8 + $0x5ec] sm:$0xf0]  ;;  %v3469_v21 = vld [vmem:[#allocation8 + $0x300] sm:$0xf]  ;;  %v3214_v27 = vor.u32 %v4229_v14, %v3213_v13  ;;  %v3186_v42 = vor.u32 %v4219_v37, %v3183_v38  ;;  %v4207_v10 = vld [vmem:[#allocation8 + $0x64] sm:$0xf] }
  0x69   :  { %2121 = vmatpush.bf16.msra.mxu1 %v3438_v19  ;;  %v3341_v19 = vld [vmem:[#allocation8 + $0x200] sm:$0xf]  ;;  %v4261_v20 = vld [vmem:[#allocation8 + $0x20c] sm:$0xf0]  ;;  %v3838_v29 = vor.u32 %v4385_v17, %v3837_v15 }
  0x6a   :  { %2135 = vmatpush.bf16.msra.mxu2 %v3566_v22  ;;  %v4293_v22 = vld [vmem:[#allocation8 + $0x30c] sm:$0xf0]  ;;  %v3965_v23 = vld [vmem:[#allocation8 + $0x6e0] sm:$0xf]  ;;  %v3342_v28 = vor.u32 %v4261_v20, %v3341_v19 }
  0x6b   :  { %2149 = vmatpush.bf16.msra.mxu3 %v3694_v50  ;;  %v4417_v24 = vld [vmem:[#allocation8 + $0x6ec] sm:$0xf0]  ;;  %v3821_v31 = vld [vmem:[#allocation8 + $0x5c0] sm:$0xf]  ;;  %v4215_v50 = vld [vmem:[#allocation8 + $0xa4] sm:$0xf] }
  0x6c   :  { %2108 = vmatpush.bf16.msra.mxu0 %v3294_v30  ;;  %v3470_v30 = vor.u32 %v4293_v22, %v3469_v21  ;;  %v4381_v32 = vld [vmem:[#allocation8 + $0x5cc] sm:$0xf0]  ;;  %v3949_v35 = vld [vmem:[#allocation8 + $0x6c0] sm:$0xf]  ;;  %v3170_v53 = vor.u32 %v4215_v50, %v3167_v52  ;;  %v4203_v22 = vld [vmem:[#allocation8 + $0x44] sm:$0xf] }
  0x6d   :  { %2122 = vmatpush.bf16.msra.mxu1 %v3422_v33  ;;  %v3966_v33 = vor.u32 %v4417_v24, %v3965_v23  ;;  %v4413_v36 = vld [vmem:[#allocation8 + $0x6cc] sm:$0xf0]  ;;  %v3822_v39 = vor.u32 %v4381_v32, %v3821_v31  ;;  %v3805_v40 = vld [vmem:[#allocation8 + $0x5a0] sm:$0xf]  ;;  %v3119_v24 = vld [vmem:[#allocation8 + $0x50] sm:$0xf0] }
  0x6e   :  { %2136 = vmatpush.bf16.msra.mxu2 %v3550_v34  ;;  %v3202_v34 = vor.u32 %v4223_v25, %v3199_v26  ;;  %v4377_v46 = vld [vmem:[#allocation8 + $0x5ac] sm:$0xf0]  ;;  %v3933_v48 = vld [vmem:[#allocation8 + $0x6a0] sm:$0xf]  ;;  %v3122_v25 = vor.u32 %v4203_v22, %v3119_v24  ;;  %v3711_v22 = vld [vmem:[#allocation8 + $0x4f0] sm:$0xf0] }
  0x6f   :  { %2150 = vmatpush.bf16.msra.mxu3 %v3678_v62  ;;  %v3806_v43 = vor.u32 %v4377_v46, %v3805_v40  ;;  %v4409_v49 = vld [vmem:[#allocation8 + $0x6ac] sm:$0xf0]  ;;  %v3773_v56 = vld [vmem:[#allocation8 + $0x560] sm:$0xf]  ;;  %v4211_v62 = vld [vmem:[#allocation8 + $0x84] sm:$0xf] }
  0x70   :  { %2109 = vmatpush.bf16.msra.mxu0 %v3278_v41  ;;  %v3950_v41 = vor.u32 %v4413_v36, %v3949_v35  ;;  %v3934_v51 = vor.u32 %v4409_v49, %v3933_v48  ;;  %v4337_v55 = vld [vmem:[#allocation8 + $0x46c] sm:$0xf0]  ;;  %v3917_v60 = vld [vmem:[#allocation8 + $0x680] sm:$0xf]  ;;  %v3154_v1 = vor.u32 %v4211_v62, %v3151_v0  ;;  %v3103_v35 = vld [vmem:[#allocation8 + $0x30] sm:$0xf0] }
  0x71   :  { %2123 = vmatpush.bf16.msra.mxu1 %v3406_v44  ;;  %v3789_v44 = vld [vmem:[#allocation8 + $0x580] sm:$0xf]  ;;  %v4405_v61 = vld [vmem:[#allocation8 + $0x68c] sm:$0xf0]  ;;  %v4195_v46 = vld [vmem:[#allocation8 + $0x4] sm:$0xf] }
  0x72   :  { %2137 = vmatpush.bf16.msra.mxu2 %v3534_v45  ;;  %v4373_v45 = vld [vmem:[#allocation8 + $0x58c] sm:$0xf0]  ;;  %v3918_v63 = vor.u32 %v4405_v61, %v3917_v60  ;;  %v3757_v5 = vld [vmem:[#allocation8 + $0x540] sm:$0xf]  ;;  %v3455_v0 = vld [vmem:[#allocation8 + $0x2f0] sm:$0xf0] }
  0x73   :  { %2151 = vmatpush.bf16.msra.mxu3 %v3662_v9  ;;  %v3790_v47 = vor.u32 %v4373_v45, %v3789_v44  ;;  %v4333_v3 = vld [vmem:[#allocation8 + $0x44c] sm:$0xf0]  ;;  %v3901_v8 = vld [vmem:[#allocation8 + $0x660] sm:$0xf] }
  0x74   :  { %2110 = vmatpush.bf16.msra.mxu0 %v3262_v54  ;;  %v3645_v54 = vld [vmem:[#allocation8 + $0x460] sm:$0xf]  ;;  %v4401_v9 = vld [vmem:[#allocation8 + $0x66c] sm:$0xf0] }
  0x75   :  { %2124 = vmatpush.bf16.msra.mxu1 %v3390_v57  ;;  %v3646_v57 = vor.u32 %v4337_v55, %v3645_v54  ;;  %v3902_v11 = vor.u32 %v4401_v9, %v3901_v8  ;;  %v3613_v14 = vld [vmem:[#allocation8 + $0x420] sm:$0xf]  ;;  %v4329_v15 = vld [vmem:[#allocation8 + $0x42c] sm:$0xf0] }
  0x76   :  { %2138 = vmatpush.bf16.msra.mxu2 %v3518_v58  ;;  %v4369_v58 = vld [vmem:[#allocation8 + $0x56c] sm:$0xf0]  ;;  %v3614_v17 = vor.u32 %v4329_v15, %v3613_v14  ;;  %v3885_v20 = vld [vmem:[#allocation8 + $0x640] sm:$0xf] }
  0x77   :  { %v3774_v59 = vor.u32 %v4369_v58, %v3773_v56  ;;  %2152 = vmatpush.bf16.msra.mxu3 %v3646_v57  ;;  %v4397_v21 = vld [vmem:[#allocation8 + $0x64c] sm:$0xf0]  ;;  %v3597_v26 = vld [vmem:[#allocation8 + $0x400] sm:$0xf]  ;;  %v4255_v57 = vld [vmem:[#allocation8 + $0x1e4] sm:$0xf] }
  0x78   :  { %2111 = vmatpush.bf16.msra.mxu0 %v3246_v2  ;;  %v3629_v2 = vld [vmem:[#allocation8 + $0x440] sm:$0xf]  ;;  %v3886_v23 = vor.u32 %v4397_v21, %v3885_v20  ;;  %v3327_v58 = vld [vmem:[#allocation8 + $0x1f0] sm:$0xf0]  ;;  %v4351_v21 = vld [vmem:[#allocation8 + $0x4e4] sm:$0xf] }
  0x79   :  { %2125 = vmatpush.bf16.msra.mxu1 %v3374_v4  ;;  %v3630_v4 = vor.u32 %v4333_v3, %v3629_v2  ;;  %v3869_v32 = vld [vmem:[#allocation8 + $0x620] sm:$0xf] }
  0x7a   :  { %2139 = vmatpush.bf16.msra.mxu2 %v3502_v6  ;;  %v4365_v6 = vld [vmem:[#allocation8 + $0x54c] sm:$0xf0]  ;;  %v3853_v38 = vld [vmem:[#allocation8 + $0x600] sm:$0xf] }
  0x7b   :  { %v3758_v7 = vor.u32 %v4365_v6, %v3757_v5  ;;  %2153 = vmatpush.bf16.msra.mxu3 %v3630_v4  ;;  %v3330_v5 = vor.u32 %v4255_v57, %v3327_v58  ;;  %v3551_v57 = vld [vmem:[#allocation8 + $0x3b0] sm:$0xf0] }
  0x7c   :  { %2112 = vmatpush.bf16.msra.mxu0 %v3230_v12  ;;  %v3135_v12 = vld [vmem:[#allocation8 + $0x70] sm:$0xf0] }
  0x7d   :  { %2126 = vmatpush.bf16.msra.mxu1 %v3358_v16  ;;  %v3138_v13 = vor.u32 %v4207_v10, %v3135_v12  ;;  %v3741_v16 = vld [vmem:[#allocation8 + $0x520] sm:$0xf]  ;;  %v3311_v12 = vld [vmem:[#allocation8 + $0x1d0] sm:$0xf0] }
  0x7e   :  { %2140 = vmatpush.bf16.msra.mxu2 %v3486_v18  ;;  %v4361_v18 = vld [vmem:[#allocation8 + $0x52c] sm:$0xf0] }
  0x7f   :  { %v3742_v19 = vor.u32 %v4361_v18, %v3741_v16  ;;  %2154 = vmatpush.bf16.msra.mxu3 %v3614_v17  ;;  %v3439_v16 = vld [vmem:[#allocation8 + $0x2d0] sm:$0xf0]  ;;  %v4319_v17 = vld [vmem:[#allocation8 + $0x3e4] sm:$0xf] }
  0x80   :  { %2113 = vmatpush.bf16.msra.mxu0 %v3214_v27  ;;  %v4325_v27 = vld [vmem:[#allocation8 + $0x40c] sm:$0xf0]  ;;  %v3583_v18 = vld [vmem:[#allocation8 + $0x3f0] sm:$0xf0] }
  0x81   :  { %2127 = vmatpush.bf16.msra.mxu1 %v3342_v28  ;;  %v3725_v28 = vld [vmem:[#allocation8 + $0x500] sm:$0xf] }
  0x82   :  { %2141 = vmatpush.bf16.msra.mxu2 %v3470_v30  ;;  %v4357_v30 = vld [vmem:[#allocation8 + $0x50c] sm:$0xf0] }
  0x83   :  { %v3726_v31 = vor.u32 %v4357_v30, %v3725_v28  ;;  %v3295_v28 = vld [vmem:[#allocation8 + $0x1b0] sm:$0xf0] }
  0x84   :  { %2162 = vmatpush.bf16.msrb.mxu0 %v3838_v29  ;;  %v3598_v29 = vor.u32 %v4325_v27, %v3597_v26 }
  0x85   :  { %2176 = vmatpush.bf16.msrb.mxu1 %v3966_v33  ;;  %v4393_v33 = vld [vmem:[#allocation8 + $0x62c] sm:$0xf0] }
  0x86   :  { %2190 = vmatpush.bf16.msrb.mxu2 %v3202_v34  ;;  %2155 = vmatpush.bf16.msra.mxu3 %v3598_v29  ;;  %v4199_v34 = vld [vmem:[#allocation8 + $0x24] sm:$0xf]  ;;  %v3870_v36 = vor.u32 %v4393_v33, %v3869_v32  ;;  %v3423_v32 = vld [vmem:[#allocation8 + $0x2b0] sm:$0xf0] }
  0x87   :  { %v3106_v37 = vor.u32 %v4199_v34, %v3103_v35  ;;  %v3586_v35 = vor.u32 %v4319_v17, %v3583_v18  ;;  %v4267_v17 = vld [vmem:[#allocation8 + $0x244] sm:$0xf]  ;;  %v3375_v18 = vld [vmem:[#allocation8 + $0x250] sm:$0xf0] }
  0x88   :  { %2163 = vmatpush.bf16.msrb.mxu0 %v3822_v39  ;;  %v4389_v39 = vld [vmem:[#allocation8 + $0x60c] sm:$0xf0] }
  0x89   :  { %2177 = vmatpush.bf16.msrb.mxu1 %v3950_v41  ;;  %v3854_v40 = vor.u32 %v4389_v39, %v3853_v38  ;;  %v3087_v41 = vld [vmem:[#allocation8 + $0x10] sm:$0xf0] }
  0x8a   :  { %2191 = vmatpush.bf16.msrb.mxu2 %v3186_v42  ;;  %v3090_v42 = vor.u32 %v4195_v46, %v3087_v41  ;;  %v4315_v41 = vld [vmem:[#allocation8 + $0x3c4] sm:$0xf] }
  0x8c   :  { %2164 = vmatpush.bf16.msrb.mxu0 %v3806_v43  ;;  %v4784_v43 = vld [vmem:[#allocation7] sm:$0xff] }
  0x8d   :  { %2178 = vmatpush.bf16.msrb.mxu1 %v3934_v51  ;;  %v515_v48 = vperm.slane %v4784_v43, 1  ;;  %v516_v51 = vperm.slane %v4784_v43, 2 }
  0x8e   :  { %2192 = vmatpush.bf16.msrb.mxu2 %v3170_v53  ;;  %v517_v53 = vperm.slane %v4784_v43, 3 }
  0x90   :  { %2165 = vmatpush.bf16.msrb.mxu0 %v3790_v47  ;;  %v514_v47 = vperm.slane %v4784_v43, 0 }
  0x91   :  { %2179 = vmatpush.bf16.msrb.mxu1 %v3918_v63 }
  0x92   :  { %2193 = vmatpush.bf16.msrb.mxu2 %v3154_v1 }
  0x94   :  { %2166 = vmatpush.bf16.msrb.mxu0 %v3774_v59  ;;  %v4287_v59 = vld [vmem:[#allocation8 + $0x2e4] sm:$0xf] }
  0x95   :  { %2180 = vmatpush.bf16.msrb.mxu1 %v3902_v11  ;;  %v3458_v6 = vor.u32 %v4287_v59, %v3455_v0  ;;  %v4251_v11 = vld [vmem:[#allocation8 + $0x1c4] sm:$0xf] }
  0x96   :  { %2194 = vmatpush.bf16.msrb.mxu2 %v3138_v13  ;;  %v4283_v13 = vld [vmem:[#allocation8 + $0x2c4] sm:$0xf]  ;;  %v3314_v29 = vor.u32 %v4251_v11, %v3311_v12  ;;  %v3663_v11 = vld [vmem:[#allocation8 + $0x490] sm:$0xf0] }
  0x97   :  { %v3442_v30 = vor.u32 %v4283_v13, %v3439_v16  ;;  %v4271_v0 = vld [vmem:[#allocation8 + $0x264] sm:$0xf]  ;;  %v3247_v16 = vld [vmem:[#allocation8 + $0x150] sm:$0xf0] }
  0x98   :  { %2167 = vmatpush.bf16.msrb.mxu0 %v3758_v7  ;;  %v4235_v12 = vld [vmem:[#allocation8 + $0x144] sm:$0xf] }
  0x99   :  { %2181 = vmatpush.bf16.msrb.mxu1 %v3886_v23  ;;  %v4247_v23 = vld [vmem:[#allocation8 + $0x1a4] sm:$0xf] }
  0x9a   :  { %2195 = vmatpush.bf16.msrb.mxu2 %v3122_v25 }
  0x9c   :  { %2168 = vmatpush.bf16.msrb.mxu0 %v3742_v19 }
  0x9d   :  { %2182 = vmatpush.bf16.msrb.mxu1 %v3870_v36  ;;  %v3714_v36 = vor.u32 %v4351_v21, %v3711_v22 }
  0x9e   :  { %2196 = vmatpush.bf16.msrb.mxu2 %v3106_v37  ;;  %v3298_v37 = vor.u32 %v4247_v23, %v3295_v28  ;;  %v4303_v23 = vld [vmem:[#allocation8 + $0x364] sm:$0xf]  ;;  %v3647_v28 = vld [vmem:[#allocation8 + $0x470] sm:$0xf0] }
  0xa0   :  { %2169 = vmatpush.bf16.msrb.mxu0 %v3726_v31  ;;  %v4279_v31 = vld [vmem:[#allocation8 + $0x2a4] sm:$0xf] }
  0xa1   :  { %2183 = vmatpush.bf16.msrb.mxu1 %v3854_v40 }
  0xa2   :  { %2197 = vmatpush.bf16.msrb.mxu2 %v3090_v42  ;;  %v3567_v42 = vld [vmem:[#allocation8 + $0x3d0] sm:$0xf0] }
  0xc0   :  { %v825_v44 = vpop.f32.mrf.mxu0 }
  0xc1   :  { %v839_v45 = vpop.f32.mrf.mxu1  ;;  %v826_v49 = vadd.f32 %v825_v44, %v514_v47 }
  0xc2   :  { %v840_v50 = vadd.f32 %v839_v45, %v515_v48 }
  0xc3   :  { %v928_v60 = vmul.f32 0.2, %v826_v49  ;;  %vm914_vm0 = vcmp.gt.f32.partialorder %v826_v49, 0.0 }
  0xc4   :  { %v929_v61 = vmul.f32 0.2, %v840_v50  ;;  %vm915_vm1 = vcmp.gt.f32.partialorder %v840_v50, 0.0 }
  0xc5   :  { %v942_v7 = vsel %vm914_vm0, %v826_v49, %v928_v60  ;;  %v3695_v49 = vld [vmem:[#allocation8 + $0x4d0] sm:$0xf0]  ;;  %v4343_v60 = vld [vmem:[#allocation8 + $0x4a4] sm:$0xf] }
  0xc6   :  { %v943_v8 = vsel %vm915_vm1, %v840_v50, %v929_v61  ;;  %v4243_v50 = vld [vmem:[#allocation8 + $0x184] sm:$0xf]  ;;  %v3679_v61 = vld [vmem:[#allocation8 + $0x4b0] sm:$0xf0] }
  0xc8   :  { %v853_v52 = vpop.f32.mrf.mxu2  ;;  %v827_v55 = vpop.f32.mrf.mxu0 }
  0xc9   :  { %v867_v54 = vpop.f32.mrf.mxu3  ;;  %v841_v56 = vpop.f32.mrf.mxu1  ;;  %v828_v62 = vadd.f32 %v827_v55, %v514_v47  ;;  %v854_v3 = vadd.f32 %v853_v52, %v516_v51  ;;  %v3426_v47 = vor.u32 %v4279_v31, %v3423_v32  ;;  %v4275_v52 = vld [vmem:[#allocation8 + $0x284] sm:$0xf] }
  0xca   :  { %v842_v63 = vadd.f32 %v841_v56, %v515_v48  ;;  %v868_v4 = vadd.f32 %v867_v54, %v517_v53  ;;  %v4347_v48 = vld [vmem:[#allocation8 + $0x4c4] sm:$0xf]  ;;  %v3570_v54 = vor.u32 %v4315_v41, %v3567_v42  ;;  %v3215_v42 = vld [vmem:[#allocation8 + $0x110] sm:$0xf0] }
  0xcb   :  { %vm921_vm2 = vcmp.gt.f32.partialorder %v828_v62, 0.0  ;;  %v935_v1 = vmul.f32 0.2, %v828_v62  ;;  %v930_v24 = vmul.f32 0.2, %v854_v3  ;;  %vm916_vm4 = vcmp.gt.f32.partialorder %v854_v3, 0.0 }
  0xcc   :  { %vm922_vm3 = vcmp.gt.f32.partialorder %v842_v63, 0.0  ;;  %v936_v2 = vmul.f32 0.2, %v842_v63  ;;  %v931_v25 = vmul.f32 0.2, %v868_v4  ;;  %vm917_vm5 = vcmp.gt.f32.partialorder %v868_v4, 0.0 }
  0xcd   :  { %v949_v9 = vsel %vm921_vm2, %v828_v62, %v935_v1  ;;  %v944_v38 = vsel %vm916_vm4, %v854_v3, %v930_v24  ;;  %v3698_v55 = vor.u32 %v4347_v48, %v3695_v49  ;;  %v4311_v56 = vld [vmem:[#allocation8 + $0x3a4] sm:$0xf]  ;;  %v3391_v1 = vld [vmem:[#allocation8 + $0x270] sm:$0xf0] }
  0xce   :  { %v950_v10 = vsel %vm922_vm3, %v842_v63, %v936_v2  ;;  %v4790_v14 = vpack.c.bf16 %v949_v9, %v942_v7  ;;  %v945_v39 = vsel %vm917_vm5, %v868_v4, %v931_v25  ;;  %v4239_v62 = vld [vmem:[#allocation8 + $0x164] sm:$0xf]  ;;  %v3263_v63 = vld [vmem:[#allocation8 + $0x170] sm:$0xf0]  ;;  %v518_v2 = vperm.slane %v4784_v43, 4 }
  0xcf   :  { %v4792_v15 = vpack.c.bf16 %v950_v10, %v943_v8  ;;  %v3554_v3 = vor.u32 %v4311_v56, %v3551_v57  ;;  %v3682_v4 = vor.u32 %v4343_v60, %v3679_v61  ;;  %v3266_v8 = vor.u32 %v4239_v62, %v3263_v63  ;;  %v4339_v10 = vld [vmem:[#allocation8 + $0x484] sm:$0xf]  ;;  %v3519_v24 = vld [vmem:[#allocation8 + $0x370] sm:$0xf0] }
  0xd0   :  { %v855_v19 = vpop.f32.mrf.mxu2  ;;  %2100 = vmatmul.bf16.vlgmr.msrb.gmra.mxu3 %v4790_v14  ;;  %v3394_v9 = vor.u32 %v4271_v0, %v3391_v1  ;;  %v3666_v22 = vor.u32 %v4339_v10, %v3663_v11  ;;  %v4335_v25 = vld [vmem:[#allocation8 + $0x464] sm:$0xf]  ;;  %v3487_v0 = vld [vmem:[#allocation8 + $0x330] sm:$0xf0] }
  0xd1   :  { %v869_v20 = vpop.f32.mrf.mxu3  ;;  %v856_v26 = vadd.f32 %v855_v19, %v516_v51  ;;  %2114 = vmatmul.bf16.vlgmr.msra.gmra.mxu0 %v4792_v15  ;;  %2204 = vmatpush.bf16.msrb.mxu3 %v3330_v5  ;;  %v3279_v51 = vld [vmem:[#allocation8 + $0x190] sm:$0xf0]  ;;  %v4307_v5 = vld [vmem:[#allocation8 + $0x384] sm:$0xf]  ;;  %v519_v19 = vperm.slane %v4784_v43, 5 }
  0xd2   :  { %v870_v27 = vadd.f32 %v869_v20, %v517_v53  ;;  %2218 = vmatpush.bf16.msra.mxu0 %v3458_v6  ;;  %v3407_v53 = vld [vmem:[#allocation8 + $0x290] sm:$0xf0]  ;;  %v3282_v58 = vor.u32 %v4243_v50, %v3279_v51  ;;  %v520_v20 = vperm.slane %v4784_v43, 6  ;;  %v4263_v32 = vld [vmem:[#allocation8 + $0x224] sm:$0xf] }
  0xd3   :  { %vm923_vm6 = vcmp.gt.f32.partialorder %v856_v26, 0.0  ;;  %v937_v33 = vmul.f32 0.2, %v856_v26  ;;  %v3410_v59 = vor.u32 %v4275_v52, %v3407_v53  ;;  %v3535_v6 = vld [vmem:[#allocation8 + $0x390] sm:$0xf0] }
  0xd4   :  { %vm924_vm7 = vcmp.gt.f32.partialorder %v870_v27, 0.0  ;;  %v938_v34 = vmul.f32 0.2, %v870_v27  ;;  %v3538_v21 = vor.u32 %v4307_v5, %v3535_v6  ;;  %v4227_v41 = vld [vmem:[#allocation8 + $0x104] sm:$0xf] }
  0xd5   :  { %v951_v40 = vsel %vm923_vm6, %v856_v26, %v937_v33  ;;  %2205 = vmatpush.bf16.msrb.mxu3 %v3314_v29  ;;  %v3250_v26 = vor.u32 %v4235_v12, %v3247_v16  ;;  %v4231_v29 = vld [vmem:[#allocation8 + $0x124] sm:$0xf]  ;;  %v3359_v33 = vld [vmem:[#allocation8 + $0x230] sm:$0xf0] }
  0xd6   :  { %v952_v46 = vsel %vm924_vm7, %v870_v27, %v938_v34  ;;  %v4796_v44 = vpack.c.bf16 %v951_v40, %v944_v38  ;;  %2219 = vmatpush.bf16.msra.mxu0 %v3442_v30  ;;  %v3378_v27 = vor.u32 %v4267_v17, %v3375_v18  ;;  %v3231_v30 = vld [vmem:[#allocation8 + $0x130] sm:$0xf0]  ;;  %v4299_v34 = vld [vmem:[#allocation8 + $0x344] sm:$0xf]  ;;  %v3522_v40 = vor.u32 %v4303_v23, %v3519_v24 }
  0xd7   :  { %v4798_v45 = vpack.c.bf16 %v952_v46, %v945_v39  ;;  %v3631_v38 = vld [vmem:[#allocation8 + $0x450] sm:$0xf0]  ;;  %v3650_v46 = vor.u32 %v4335_v25, %v3647_v28  ;;  %v3234_v49 = vor.u32 %v4231_v29, %v3231_v30  ;;  %v3362_v50 = vor.u32 %v4263_v32, %v3359_v33  ;;  %v4805_v52 = vld [vmem:[#allocation8 + $0x5e4] sm:$0xf]  ;;  %v3205_v32 = vld [vmem:[#allocation8 + $0xe8] sm:$0xf] }
  0xd8   :  { %2128 = vmatmul.bf16.vlgmr.msra.gmra.mxu1 %v4796_v44  ;;  %v3343_v51 = vld [vmem:[#allocation8 + $0x210] sm:$0xf0]  ;;  %v4295_v63 = vld [vmem:[#allocation8 + $0x324] sm:$0xf]  ;;  %v4226_v33 = vld [vmem:[#allocation8 + $0xf4] sm:$0xf0] }
  0xd9   :  { %2142 = vmatmul.bf16.vlgmr.msra.gmra.mxu2 %v4798_v45  ;;  %2232 = vmatpush.bf16.msra.mxu1 %v3586_v35  ;;  %v3839_v53 = vld [vmem:[#allocation8 + $0x5f0] sm:$0xf0]  ;;  %v4379_v11 = vld [vmem:[#allocation8 + $0x5c4] sm:$0xf]  ;;  %v3490_v25 = vor.u32 %v4295_v63, %v3487_v0  ;;  %v3301_v63 = vld [vmem:[#allocation8 + $0x1a8] sm:$0xf] }
  0xda   :  { %2246 = vmatpush.bf16.msra.mxu2 %v3714_v36  ;;  %2206 = vmatpush.bf16.msrb.mxu3 %v3298_v37  ;;  %v3503_v36 = vld [vmem:[#allocation8 + $0x350] sm:$0xf0]  ;;  %v4331_v37 = vld [vmem:[#allocation8 + $0x444] sm:$0xf]  ;;  %v3842_v10 = vor.u32 %v4805_v52, %v3839_v53  ;;  %v4254_v52 = vld [vmem:[#allocation8 + $0x1d4] sm:$0xf0] }
  0xdb   :  { %2220 = vmatpush.bf16.msra.mxu0 %v3426_v47  ;;  %v4259_v47 = vld [vmem:[#allocation8 + $0x204] sm:$0xf]  ;;  %v3506_v57 = vor.u32 %v4299_v34, %v3503_v36  ;;  %v3634_v62 = vor.u32 %v4331_v37, %v3631_v38  ;;  %v3823_v12 = vld [vmem:[#allocation8 + $0x5d0] sm:$0xf0]  ;;  %v3333_v34 = vld [vmem:[#allocation8 + $0x1e8] sm:$0xf] }
  0xdc   :  { %v3346_v6 = vor.u32 %v4259_v47, %v3343_v51  ;;  %v4323_v28 = vld [vmem:[#allocation8 + $0x404] sm:$0xf]  ;;  %v3599_v29 = vld [vmem:[#allocation8 + $0x410] sm:$0xf0]  ;;  %v3826_v37 = vor.u32 %v4379_v11, %v3823_v12  ;;  %v3317_v51 = vld [vmem:[#allocation8 + $0x1c8] sm:$0xf] }
  0xdd   :  { %2233 = vmatpush.bf16.msra.mxu1 %v3570_v54  ;;  %v4250_v0 = vld [vmem:[#allocation8 + $0x1b4] sm:$0xf0]  ;;  %v3285_v11 = vld [vmem:[#allocation8 + $0x188] sm:$0xf] }
  0xde   :  { %2247 = vmatpush.bf16.msra.mxu2 %v3698_v55  ;;  %2207 = vmatpush.bf16.msrb.mxu3 %v3282_v58  ;;  %v4415_v58 = vld [vmem:[#allocation8 + $0x6e4] sm:$0xf]  ;;  %v4246_v12 = vld [vmem:[#allocation8 + $0x194] sm:$0xf0] }
  0xdf   :  { %2221 = vmatpush.bf16.msra.mxu0 %v3410_v59  ;;  %v3967_v59 = vld [vmem:[#allocation8 + $0x6f0] sm:$0xf0] }
  0xe0   :  { %v881_v7 = vpop.f32.mrf.mxu0  ;;  %v3970_v18 = vor.u32 %v4415_v58, %v3967_v59  ;;  %v3791_v58 = vld [vmem:[#allocation8 + $0x590] sm:$0xf0]  ;;  %v4403_v59 = vld [vmem:[#allocation8 + $0x684] sm:$0xf] }
  0xe1   :  { %v895_v13 = vpop.f32.mrf.mxu1  ;;  %2234 = vmatpush.bf16.msra.mxu1 %v3554_v3  ;;  %v882_v31 = vadd.f32 %v881_v7, %v518_v2  ;;  %v3218_v3 = vor.u32 %v4227_v41, %v3215_v42  ;;  %v3615_v7 = vld [vmem:[#allocation8 + $0x430] sm:$0xf0] }
  0xe2   :  { %2248 = vmatpush.bf16.msra.mxu2 %v3682_v4  ;;  %2208 = vmatpush.bf16.msrb.mxu3 %v3266_v8  ;;  %v896_v35 = vadd.f32 %v895_v13, %v519_v19  ;;  %v4327_v4 = vld [vmem:[#allocation8 + $0x424] sm:$0xf]  ;;  %v3935_v41 = vld [vmem:[#allocation8 + $0x6b0] sm:$0xf0] }
  0xe3   :  { %2222 = vmatpush.bf16.msra.mxu0 %v3394_v9  ;;  %v932_v54 = vmul.f32 0.2, %v882_v31  ;;  %vm918_vm8 = vcmp.gt.f32.partialorder %v882_v31, 0.0 }
  0xe4   :  { %v933_v60 = vmul.f32 0.2, %v896_v35  ;;  %vm919_vm9 = vcmp.gt.f32.partialorder %v896_v35, 0.0 }
  0xe5   :  { %2235 = vmatpush.bf16.msra.mxu1 %v3538_v21  ;;  %v946_v8 = vsel %vm918_vm8, %v882_v31, %v932_v54  ;;  %v3951_v21 = vld [vmem:[#allocation8 + $0x6d0] sm:$0xf0] }
  0xe6   :  { %2249 = vmatpush.bf16.msra.mxu2 %v3666_v22  ;;  %2209 = vmatpush.bf16.msrb.mxu3 %v3250_v26  ;;  %v947_v13 = vsel %vm919_vm9, %v896_v35, %v933_v60  ;;  %v4291_v22 = vld [vmem:[#allocation8 + $0x304] sm:$0xf]  ;;  %v3618_v26 = vor.u32 %v4327_v4, %v3615_v7  ;;  %v4258_v35 = vld [vmem:[#allocation8 + $0x1f4] sm:$0xf0]  ;;  %v3919_v60 = vld [vmem:[#allocation8 + $0x690] sm:$0xf0]  ;;  %v3302_v7 = vor.u32 %v4250_v0, %v3301_v63 }
  0xe7   :  { %2223 = vmatpush.bf16.msra.mxu0 %v3378_v27  ;;  %v3471_v27 = vld [vmem:[#allocation8 + $0x310] sm:$0xf0]  ;;  %v3173_v4 = vld [vmem:[#allocation8 + $0xa8] sm:$0xf] }
  0xe8   :  { %v909_v39 = vpop.f32.mrf.mxu2  ;;  %v883_v48 = vpop.f32.mrf.mxu0  ;;  %v3474_v43 = vor.u32 %v4291_v22, %v3471_v27  ;;  %v3759_v22 = vld [vmem:[#allocation8 + $0x550] sm:$0xf0] }
  0xe9   :  { %v884_v55 = vadd.f32 %v883_v48, %v518_v2  ;;  %v897_v56 = vpop.f32.mrf.mxu1  ;;  %2198 = vmatmul.bf16.vlgmr.msrb.gmra.mxu2 %v4790_v14  ;;  %2236 = vmatpush.bf16.msra.mxu1 %v3522_v40  ;;  %v910_v2 = vadd.f32 %v909_v39, %v520_v20  ;;  %v4375_v39 = vld [vmem:[#allocation8 + $0x5a4] sm:$0xf]  ;;  %v3807_v40 = vld [vmem:[#allocation8 + $0x5b0] sm:$0xf0]  ;;  %v3334_v48 = vor.u32 %v4258_v35, %v3333_v34 }
  0xea   :  { %v898_v61 = vadd.f32 %v897_v56, %v519_v19  ;;  %2250 = vmatpush.bf16.msra.mxu2 %v3650_v46  ;;  %2210 = vmatpush.bf16.msrb.mxu3 %v3234_v49  ;;  %v4411_v19 = vld [vmem:[#allocation8 + $0x6c4] sm:$0xf]  ;;  %v3810_v53 = vor.u32 %v4375_v39, %v3807_v40  ;;  %v4222_v56 = vld [vmem:[#allocation8 + $0xd4] sm:$0xf0]  ;;  %v3743_v35 = vld [vmem:[#allocation8 + $0x530] sm:$0xf0] }
  0xeb   :  { %vm925_vm10 = vcmp.gt.f32.partialorder %v884_v55, 0.0  ;;  %v939_v1 = vmul.f32 0.2, %v884_v55  ;;  %2224 = vmatpush.bf16.msra.mxu0 %v3362_v50  ;;  %v934_v30 = vmul.f32 0.2, %v910_v2  ;;  %vm920_vm12 = vcmp.gt.f32.partialorder %v910_v2, 0.0 }
  0xec   :  { %vm926_vm11 = vcmp.gt.f32.partialorder %v898_v61, 0.0  ;;  %v940_v5 = vmul.f32 0.2, %v898_v61  ;;  %v3954_v38 = vor.u32 %v4411_v19, %v3951_v21  ;;  %v4407_v46 = vld [vmem:[#allocation8 + $0x6a4] sm:$0xf]  ;;  %v3206_v50 = vor.u32 %v4226_v33, %v3205_v32 }
  0xed   :  { %v953_v9 = vsel %vm925_vm10, %v884_v55, %v939_v1  ;;  %2237 = vmatpush.bf16.msra.mxu1 %v3506_v57  ;;  %v948_v42 = vsel %vm920_vm12, %v910_v2, %v934_v30  ;;  %v3938_v54 = vor.u32 %v4407_v46, %v3935_v41  ;;  %v3189_v55 = vld [vmem:[#allocation8 + $0xc8] sm:$0xf]  ;;  %v4371_v57 = vld [vmem:[#allocation8 + $0x584] sm:$0xf]  ;;  %v4218_v2 = vld [vmem:[#allocation8 + $0xb4] sm:$0xf0] }
  0xee   :  { %v4813_v16 = vpack.c.bf16 %v953_v9, %v946_v8  ;;  %v954_v17 = vsel %vm926_vm11, %v898_v61, %v940_v5  ;;  %2251 = vmatpush.bf16.msra.mxu2 %v3634_v62  ;;  %2211 = vmatpush.bf16.msrb.mxu3 %v3218_v3  ;;  %v3318_v61 = vor.u32 %v4254_v52, %v3317_v51  ;;  %v4367_v5 = vld [vmem:[#allocation8 + $0x564] sm:$0xf]  ;;  %v3903_v9 = vld [vmem:[#allocation8 + $0x670] sm:$0xf0]  ;;  %v4210_v32 = vld [vmem:[#allocation8 + $0x74] sm:$0xf0] }
  0xef   :  { %v4815_v23 = vpack.c.bf16 %v954_v17, %v947_v13  ;;  %2225 = vmatpush.bf16.msra.mxu0 %v3346_v6  ;;  %v3190_v62 = vor.u32 %v4222_v56, %v3189_v55  ;;  %v3794_v1 = vor.u32 %v4371_v57, %v3791_v58  ;;  %v3922_v3 = vor.u32 %v4403_v59, %v3919_v60  ;;  %v3775_v6 = vld [vmem:[#allocation8 + $0x570] sm:$0xf0]  ;;  %v4399_v8 = vld [vmem:[#allocation8 + $0x664] sm:$0xf]  ;;  %v3157_v17 = vld [vmem:[#allocation8 + $0x88] sm:$0xf] }
  0xf0   :  { %v911_v24 = vpop.f32.mrf.mxu2  ;;  %2156 = vmatmul.bf16.vlgmr.msra.gmra.mxu3 %v4813_v16  ;;  %v3778_v13 = vor.u32 %v4367_v5, %v3775_v6  ;;  %v3906_v19 = vor.u32 %v4399_v8, %v3903_v9  ;;  %v4363_v21 = vld [vmem:[#allocation8 + $0x544] sm:$0xf]  ;;  %v3125_v46 = vld [vmem:[#allocation8 + $0x48] sm:$0xf]  ;;  %v4206_v41 = vld [vmem:[#allocation8 + $0x54] sm:$0xf0] }
  0xf1   :  { %v912_v31 = vadd.f32 %v911_v24, %v520_v20  ;;  %2170 = vmatmul.bf16.vlgmr.msrb.gmra.mxu0 %v4815_v23  ;;  %2238 = vmatpush.bf16.msra.mxu1 %v3490_v25  ;;  %v3602_v20 = vor.u32 %v4323_v28, %v3599_v29  ;;  %v3286_v24 = vor.u32 %v4246_v12, %v3285_v11  ;;  %v4395_v25 = vld [vmem:[#allocation8 + $0x644] sm:$0xf]  ;;  %v3269_v28 = vld [vmem:[#allocation8 + $0x168] sm:$0xf]  ;;  %v4242_v29 = vld [vmem:[#allocation8 + $0x174] sm:$0xf0] }
  0xf2   :  { %2260 = vmatpush.bf16.msra.mxu3 %v3842_v10  ;;  %2252 = vmatpush.bf16.msra.mxu2 %v3618_v26  ;;  %v3174_v10 = vor.u32 %v4218_v2, %v3173_v4  ;;  %v3887_v26 = vld [vmem:[#allocation8 + $0x650] sm:$0xf0]  ;;  %v3762_v30 = vor.u32 %v4363_v21, %v3759_v22  ;;  %v4359_v34 = vld [vmem:[#allocation8 + $0x524] sm:$0xf]  ;;  %v3589_v55 = vld [vmem:[#allocation8 + $0x3e8] sm:$0xf]  ;;  %v3126_v56 = vor.u32 %v4206_v41, %v3125_v46 }
  0xf3   :  { %vm927_vm13 = vcmp.gt.f32.partialorder %v912_v31, 0.0  ;;  %v941_v36 = vmul.f32 0.2, %v912_v31  ;;  %2274 = vmatpush.bf16.msrb.mxu0 %v3970_v18  ;;  %v4214_v18 = vld [vmem:[#allocation8 + $0x94] sm:$0xf0]  ;;  %v3890_v33 = vor.u32 %v4395_v25, %v3887_v26  ;;  %v3746_v40 = vor.u32 %v4359_v34, %v3743_v35 }
  0xf4   :  { %v3158_v27 = vor.u32 %v4214_v18, %v3157_v17  ;;  %v3855_v51 = vld [vmem:[#allocation8 + $0x610] sm:$0xf0]  ;;  %v4322_v57 = vld [vmem:[#allocation8 + $0x3f4] sm:$0xf0]  ;;  %v3237_v58 = vld [vmem:[#allocation8 + $0x128] sm:$0xf] }
  0xf5   :  { %v955_v47 = vsel %vm927_vm13, %v912_v31, %v941_v36  ;;  %2239 = vmatpush.bf16.msra.mxu1 %v3474_v43  ;;  %v3141_v31 = vld [vmem:[#allocation8 + $0x68] sm:$0xf]  ;;  %v3270_v36 = vor.u32 %v4242_v29, %v3269_v28  ;;  %v4234_v59 = vld [vmem:[#allocation8 + $0x134] sm:$0xf0] }
  0xf6   :  { %v4822_v49 = vpack.c.bf16 %v955_v47, %v948_v42  ;;  %2261 = vmatpush.bf16.msra.mxu3 %v3826_v37  ;;  %2253 = vmatpush.bf16.msra.mxu2 %v3602_v20  ;;  %v4391_v37 = vld [vmem:[#allocation8 + $0x624] sm:$0xf]  ;;  %v3142_v39 = vor.u32 %v4210_v32, %v3141_v31  ;;  %v3253_v43 = vld [vmem:[#allocation8 + $0x148] sm:$0xf]  ;;  %v4238_v20 = vld [vmem:[#allocation8 + $0x154] sm:$0xf0]  ;;  %v3238_v4 = vor.u32 %v4234_v59, %v3237_v58 }
  0xf7   :  { %2275 = vmatpush.bf16.msrb.mxu0 %v3954_v38  ;;  %v3871_v38 = vld [vmem:[#allocation8 + $0x630] sm:$0xf0]  ;;  %v4355_v42 = vld [vmem:[#allocation8 + $0x504] sm:$0xf]  ;;  %v3254_v52 = vor.u32 %v4238_v20, %v3253_v43  ;;  %v4286_v2 = vld [vmem:[#allocation8 + $0x2d4] sm:$0xf0] }
  0xf8   :  { %2184 = vmatmul.bf16.vlgmr.msrb.gmra.mxu1 %v4822_v49  ;;  %v3874_v47 = vor.u32 %v4391_v37, %v3871_v38  ;;  %v3573_v5 = vld [vmem:[#allocation8 + $0x3c8] sm:$0xf]  ;;  %v4318_v6 = vld [vmem:[#allocation8 + $0x3d4] sm:$0xf0] }
  0xf9   :  { %2288 = vmatpush.bf16.msrb.mxu1 %v3206_v50  ;;  %2254 = vmatmul.bf16.vlgmr.msra.gmra.mxu2 %v4813_v16  ;;  %v4387_v50 = vld [vmem:[#allocation8 + $0x604] sm:$0xf]  ;;  %v3093_v8 = vld [vmem:[#allocation8 + $0x8] sm:$0xf]  ;;  %v4198_v11 = vld [vmem:[#allocation8 + $0x14] sm:$0xf0]  ;;  %v3574_v21 = vor.u32 %v4318_v6, %v3573_v5 }
  0xfa   :  { %2302 = vmatpush.bf16.msrb.mxu2 %v3334_v48  ;;  %2262 = vmatpush.bf16.msra.mxu3 %v3810_v53  ;;  %v3727_v48 = vld [vmem:[#allocation8 + $0x510] sm:$0xf0]  ;;  %v3461_v53 = vld [vmem:[#allocation8 + $0x2e8] sm:$0xf]  ;;  %v3858_v63 = vor.u32 %v4387_v50, %v3855_v51  ;;  %v4282_v25 = vld [vmem:[#allocation8 + $0x2b4] sm:$0xf0]  ;;  %v3094_v26 = vor.u32 %v4198_v11, %v3093_v8 }
  0xfb   :  { %2276 = vmatpush.bf16.msrb.mxu0 %v3938_v54  ;;  %v4290_v54 = vld [vmem:[#allocation8 + $0x2f4] sm:$0xf0]  ;;  %v3730_v60 = vor.u32 %v4355_v42, %v3727_v48  ;;  %v3221_v9 = vld [vmem:[#allocation8 + $0x108] sm:$0xf] }
  0xfc   :  { %v3462_v0 = vor.u32 %v4290_v54, %v3461_v53  ;;  %v3845_v12 = vld [vmem:[#allocation8 + $0x5e8] sm:$0xf]  ;;  %v4314_v29 = vld [vmem:[#allocation8 + $0x3b4] sm:$0xf0] }
  0xfd   :  { %2289 = vmatpush.bf16.msrb.mxu1 %v3190_v62  ;;  %v4202_v62 = vld [vmem:[#allocation8 + $0x34] sm:$0xf0]  ;;  %v3717_v18 = vld [vmem:[#allocation8 + $0x4e8] sm:$0xf] }
  0xfe   :  { %2303 = vmatpush.bf16.msrb.mxu2 %v3318_v61  ;;  %2263 = vmatpush.bf16.msra.mxu3 %v3794_v1  ;;  %v3109_v61 = vld [vmem:[#allocation8 + $0x28] sm:$0xf]  ;;  %v4382_v32 = vld [vmem:[#allocation8 + $0x5d4] sm:$0xf0] }
  0xff   :  { %2277 = vmatpush.bf16.msrb.mxu0 %v3922_v3  ;;  %v3445_v1 = vld [vmem:[#allocation8 + $0x2c8] sm:$0xf]  ;;  %v3590_v3 = vor.u32 %v4322_v57, %v3589_v55  ;;  %v4350_v35 = vld [vmem:[#allocation8 + $0x4d4] sm:$0xf0] }
 0x100   :  { %2212 = vmatmul.bf16.vlgmr.msrb.gmra.mxu3 %v4792_v15  ;;  %v3446_v17 = vor.u32 %v4286_v2, %v3445_v1  ;;  %v3557_v28 = vld [vmem:[#allocation8 + $0x3a8] sm:$0xf]  ;;  %v4278_v38 = vld [vmem:[#allocation8 + $0x294] sm:$0xf0] }
 0x101   :  { %2290 = vmatpush.bf16.msrb.mxu1 %v3174_v10  ;;  %2226 = vmatmul.bf16.vlgmr.msra.gmra.mxu0 %v4796_v44  ;;  %v4230_v10 = vld [vmem:[#allocation8 + $0x114] sm:$0xf0]  ;;  %v3829_v31 = vld [vmem:[#allocation8 + $0x5c8] sm:$0xf] }
 0x102   :  { %2304 = vmatpush.bf16.msrb.mxu2 %v3302_v7  ;;  %2264 = vmatpush.bf16.msra.mxu3 %v3778_v13  ;;  %v3110_v7 = vor.u32 %v4202_v62, %v3109_v61  ;;  %v4386_v13 = vld [vmem:[#allocation8 + $0x5f4] sm:$0xf0]  ;;  %v3222_v22 = vor.u32 %v4230_v10, %v3221_v9  ;;  %v3701_v34 = vld [vmem:[#allocation8 + $0x4c8] sm:$0xf] }
 0x103   :  { %2278 = vmatpush.bf16.msrb.mxu0 %v3906_v19  ;;  %v4354_v19 = vld [vmem:[#allocation8 + $0x4f4] sm:$0xf0]  ;;  %v3413_v37 = vld [vmem:[#allocation8 + $0x288] sm:$0xf] }
 0x104   :  { %v3541_v43 = vld [vmem:[#allocation8 + $0x388] sm:$0xf]  ;;  %v4310_v20 = vld [vmem:[#allocation8 + $0x394] sm:$0xf0]  ;;  %v3414_v42 = vor.u32 %v4278_v38, %v3413_v37  ;;  %v3207_v37 = vld [vmem:[#allocation8 + $0xf8] sm:$0xf0] }
 0x105   :  { %2291 = vmatpush.bf16.msrb.mxu1 %v3158_v27  ;;  %v3846_v27 = vor.u32 %v4386_v13, %v3845_v12  ;;  %v3813_v46 = vld [vmem:[#allocation8 + $0x5a8] sm:$0xf]  ;;  %v4378_v41 = vld [vmem:[#allocation8 + $0x5b4] sm:$0xf0]  ;;  %v3542_v50 = vor.u32 %v4310_v20, %v3541_v43 }
 0x106   :  { %2305 = vmatpush.bf16.msrb.mxu2 %v3286_v24  ;;  %2265 = vmatpush.bf16.msra.mxu3 %v3762_v30  ;;  %v3429_v24 = vld [vmem:[#allocation8 + $0x2a8] sm:$0xf]  ;;  %v3718_v30 = vor.u32 %v4354_v19, %v3717_v18  ;;  %v4346_v48 = vld [vmem:[#allocation8 + $0x4b4] sm:$0xf0]  ;;  %v3814_v53 = vor.u32 %v4378_v41, %v3813_v46 }
 0x107   :  { %2279 = vmatpush.bf16.msrb.mxu0 %v3890_v33  ;;  %v3430_v33 = vor.u32 %v4282_v25, %v3429_v24  ;;  %v3397_v51 = vld [vmem:[#allocation8 + $0x268] sm:$0xf]  ;;  %v4306_v55 = vld [vmem:[#allocation8 + $0x374] sm:$0xf0] }
 0x108   :  { %2240 = vmatmul.bf16.vlgmr.msra.gmra.mxu1 %v4798_v45  ;;  %v3525_v54 = vld [vmem:[#allocation8 + $0x368] sm:$0xf]  ;;  %v4374_v58 = vld [vmem:[#allocation8 + $0x594] sm:$0xf0] }
 0x109   :  { %2292 = vmatpush.bf16.msrb.mxu1 %v3142_v39  ;;  %v3830_v39 = vor.u32 %v4382_v32, %v3829_v31  ;;  %v3797_v57 = vld [vmem:[#allocation8 + $0x588] sm:$0xf]  ;;  %v4342_v61 = vld [vmem:[#allocation8 + $0x494] sm:$0xf0]  ;;  %v3526_v62 = vor.u32 %v4306_v55, %v3525_v54 }
 0x10a   :  { %2306 = vmatpush.bf16.msrb.mxu2 %v3270_v36  ;;  %2266 = vmatpush.bf16.msra.mxu3 %v3746_v40  ;;  %v3558_v36 = vor.u32 %v4314_v29, %v3557_v28  ;;  %v3702_v40 = vor.u32 %v4350_v35, %v3701_v34  ;;  %v3798_v1 = vor.u32 %v4374_v58, %v3797_v57  ;;  %v3781_v5 = vld [vmem:[#allocation8 + $0x568] sm:$0xf]  ;;  %v4370_v6 = vld [vmem:[#allocation8 + $0x574] sm:$0xf0]  ;;  %v4224_v35 = vld [vmem:[#allocation8 + $0xec] sm:$0xf] }
 0x10b   :  { %2280 = vmatpush.bf16.msrb.mxu0 %v3874_v47  ;;  %v3685_v47 = vld [vmem:[#allocation8 + $0x4a8] sm:$0xf]  ;;  %v4338_v9 = vld [vmem:[#allocation8 + $0x474] sm:$0xf0]  ;;  %v3782_v13 = vor.u32 %v4370_v6, %v3781_v5  ;;  %v4288_v58 = vld [vmem:[#allocation8 + $0x2ec] sm:$0xf] }
 0x10c   :  { %v3653_v8 = vld [vmem:[#allocation8 + $0x468] sm:$0xf]  ;;  %v4266_v12 = vld [vmem:[#allocation8 + $0x234] sm:$0xf0]  ;;  %v4216_v5 = vld [vmem:[#allocation8 + $0xac] sm:$0xf] }
 0x10d   :  { %2293 = vmatpush.bf16.msrb.mxu1 %v3126_v56  ;;  %v3686_v56 = vor.u32 %v4346_v48, %v3685_v47  ;;  %v3365_v11 = vld [vmem:[#allocation8 + $0x228] sm:$0xf]  ;;  %v4298_v18 = vld [vmem:[#allocation8 + $0x334] sm:$0xf0]  ;;  %v3654_v19 = vor.u32 %v4338_v9, %v3653_v8  ;;  %v3210_v47 = vor.u32 %v4224_v35, %v3207_v37  ;;  %v3175_v6 = vld [vmem:[#allocation8 + $0xb8] sm:$0xf0] }
 0x10e   :  { %2307 = vmatpush.bf16.msrb.mxu2 %v3254_v52  ;;  %2267 = vmatpush.bf16.msra.mxu3 %v3730_v60  ;;  %v4274_v52 = vld [vmem:[#allocation8 + $0x274] sm:$0xf0]  ;;  %v3669_v60 = vld [vmem:[#allocation8 + $0x488] sm:$0xf]  ;;  %v3366_v24 = vor.u32 %v4266_v12, %v3365_v11  ;;  %v4284_v8 = vld [vmem:[#allocation8 + $0x2cc] sm:$0xf] }
 0x10f   :  { %2281 = vmatpush.bf16.msrb.mxu0 %v3858_v63  ;;  %v3398_v59 = vor.u32 %v4274_v52, %v3397_v51  ;;  %v3381_v63 = vld [vmem:[#allocation8 + $0x248] sm:$0xf]  ;;  %v3670_v2 = vor.u32 %v4342_v61, %v3669_v60  ;;  %v4262_v29 = vld [vmem:[#allocation8 + $0x214] sm:$0xf0]  ;;  %v4220_v51 = vld [vmem:[#allocation8 + $0xcc] sm:$0xf] }
 0x110   :  { %v3637_v25 = vld [vmem:[#allocation8 + $0x448] sm:$0xf]  ;;  %v4294_v31 = vld [vmem:[#allocation8 + $0x314] sm:$0xf0]  ;;  %v3191_v52 = vld [vmem:[#allocation8 + $0xd8] sm:$0xf0] }
 0x111   :  { %2294 = vmatpush.bf16.msrb.mxu1 %v3110_v7  ;;  %2268 = vmatmul.bf16.vlgmr.msra.gmra.mxu3 %v4815_v23  ;;  %v4418_v34 = vld [vmem:[#allocation8 + $0x6f4] sm:$0xf0]  ;;  %v3749_v38 = vld [vmem:[#allocation8 + $0x528] sm:$0xf]  ;;  %v4256_v61 = vld [vmem:[#allocation8 + $0x1ec] sm:$0xf] }
 0x112   :  { %2316 = vmatpush.bf16.msrb.mxu3 %v3462_v0  ;;  %2308 = vmatpush.bf16.msrb.mxu2 %v3238_v4  ;;  %v4270_v0 = vld [vmem:[#allocation8 + $0x254] sm:$0xf0]  ;;  %v3621_v20 = vld [vmem:[#allocation8 + $0x428] sm:$0xf]  ;;  %v3447_v9 = vld [vmem:[#allocation8 + $0x2d8] sm:$0xf0] }
 0x113   :  { %2330 = vmatpush.bf16.msra.mxu0 %v3590_v3  ;;  %v3509_v3 = vld [vmem:[#allocation8 + $0x348] sm:$0xf]  ;;  %v4302_v4 = vld [vmem:[#allocation8 + $0x354] sm:$0xf0]  ;;  %v3382_v7 = vor.u32 %v4270_v0, %v3381_v63  ;;  %v3194_v63 = vor.u32 %v4220_v51, %v3191_v52  ;;  %v4252_v11 = vld [vmem:[#allocation8 + $0x1cc] sm:$0xf] }
 0x114   :  { %2282 = vmatmul.bf16.vlgmr.msrb.gmra.mxu0 %v4822_v49  ;;  %v3510_v10 = vor.u32 %v4302_v4, %v3509_v3  ;;  %v3605_v54 = vld [vmem:[#allocation8 + $0x408] sm:$0xf]  ;;  %v4326_v57 = vld [vmem:[#allocation8 + $0x414] sm:$0xf0]  ;;  %v3319_v12 = vld [vmem:[#allocation8 + $0x1d8] sm:$0xf0] }
 0x115   :  { %2295 = vmatpush.bf16.msrb.mxu1 %v3094_v26  ;;  %v4334_v26 = vld [vmem:[#allocation8 + $0x454] sm:$0xf0]  ;;  %v3733_v55 = vld [vmem:[#allocation8 + $0x508] sm:$0xf]  ;;  %v3606_v4 = vor.u32 %v4326_v57, %v3605_v54  ;;  %v3143_v35 = vld [vmem:[#allocation8 + $0x78] sm:$0xf0] }
 0x116   :  { %2317 = vmatpush.bf16.msrb.mxu3 %v3446_v17  ;;  %2309 = vmatpush.bf16.msrb.mxu2 %v3222_v22  ;;  %v3493_v17 = vld [vmem:[#allocation8 + $0x328] sm:$0xf]  ;;  %v4366_v22 = vld [vmem:[#allocation8 + $0x554] sm:$0xf0]  ;;  %v4276_v37 = vld [vmem:[#allocation8 + $0x28c] sm:$0xf] }
 0x117   :  { %2331 = vmatpush.bf16.msra.mxu0 %v3574_v21  ;;  %v3765_v21 = vld [vmem:[#allocation8 + $0x548] sm:$0xf]  ;;  %v3494_v28 = vor.u32 %v4298_v18, %v3493_v17  ;;  %v4410_v3 = vld [vmem:[#allocation8 + $0x6b4] sm:$0xf0]  ;;  %v4272_v51 = vld [vmem:[#allocation8 + $0x26c] sm:$0xf] }
 0x118   :  { %2296 = vmatmul.bf16.vlgmr.msrb.gmra.mxu1 %v4790_v14  ;;  %v3766_v32 = vor.u32 %v4366_v22, %v3765_v21  ;;  %v3925_v17 = vld [vmem:[#allocation8 + $0x688] sm:$0xf]  ;;  %v4406_v18 = vld [vmem:[#allocation8 + $0x694] sm:$0xf0]  ;;  %v4212_v21 = vld [vmem:[#allocation8 + $0x8c] sm:$0xf] }
 0x119   :  { %2344 = vmatpush.bf16.msra.mxu1 %v3718_v30  ;;  %2310 = vmatmul.bf16.vlgmr.msrb.gmra.mxu2 %v4792_v15  ;;  %v3477_v30 = vld [vmem:[#allocation8 + $0x308] sm:$0xf]  ;;  %v3159_v22 = vld [vmem:[#allocation8 + $0x98] sm:$0xf0]  ;;  %v4240_v54 = vld [vmem:[#allocation8 + $0x16c] sm:$0xf] }
 0x11a   :  { %2358 = vmatpush.bf16.msra.mxu2 %v3846_v27  ;;  %2318 = vmatpush.bf16.msrb.mxu3 %v3430_v33  ;;  %v3349_v27 = vld [vmem:[#allocation8 + $0x208] sm:$0xf]  ;;  %v3478_v46 = vor.u32 %v4294_v31, %v3477_v30  ;;  %v3162_v30 = vor.u32 %v4212_v21, %v3159_v22  ;;  %v3399_v52 = vld [vmem:[#allocation8 + $0x278] sm:$0xf0]  ;;  %v4232_v22 = vld [vmem:[#allocation8 + $0x12c] sm:$0xf] }
 0x11b   :  { %2332 = vmatpush.bf16.msra.mxu0 %v3558_v36  ;;  %v3973_v33 = vld [vmem:[#allocation8 + $0x6e8] sm:$0xf]  ;;  %v3638_v36 = vor.u32 %v4334_v26, %v3637_v25  ;;  %v3350_v43 = vor.u32 %v4262_v29, %v3349_v27  ;;  %v4280_v25 = vld [vmem:[#allocation8 + $0x2ac] sm:$0xf]  ;;  %v3431_v26 = vld [vmem:[#allocation8 + $0x2b8] sm:$0xf0]  ;;  %v3926_v27 = vor.u32 %v4406_v18, %v3925_v17 }
 0x11c   :  { %v3974_v41 = vor.u32 %v4418_v34, %v3973_v33  ;;  %v3303_v29 = vld [vmem:[#allocation8 + $0x1b8] sm:$0xf0]  ;;  %v3909_v31 = vld [vmem:[#allocation8 + $0x668] sm:$0xf]  ;;  %v3434_v33 = vor.u32 %v4280_v25, %v3431_v26  ;;  %v4208_v34 = vld [vmem:[#allocation8 + $0x6c] sm:$0xf] }
 0x11d   :  { %2345 = vmatpush.bf16.msra.mxu1 %v3702_v40  ;;  %v4330_v40 = vld [vmem:[#allocation8 + $0x434] sm:$0xf0]  ;;  %v3877_v57 = vld [vmem:[#allocation8 + $0x628] sm:$0xf]  ;;  %v3719_v17 = vld [vmem:[#allocation8 + $0x4f8] sm:$0xf0] }
 0x11e   :  { %2359 = vmatpush.bf16.msra.mxu2 %v3830_v39  ;;  %2319 = vmatpush.bf16.msrb.mxu3 %v3414_v42  ;;  %v4362_v39 = vld [vmem:[#allocation8 + $0x534] sm:$0xf0]  ;;  %v3957_v42 = vld [vmem:[#allocation8 + $0x6c8] sm:$0xf]  ;;  %v4264_v18 = vld [vmem:[#allocation8 + $0x22c] sm:$0xf] }
 0x11f   :  { %2333 = vmatpush.bf16.msra.mxu0 %v3542_v50  ;;  %v3750_v48 = vor.u32 %v4362_v39, %v3749_v38  ;;  %v4414_v50 = vld [vmem:[#allocation8 + $0x6d4] sm:$0xf0]  ;;  %v3415_v38 = vld [vmem:[#allocation8 + $0x298] sm:$0xf0] }
 0x120   :  { %v3958_v60 = vor.u32 %v4414_v50, %v3957_v42  ;;  %v3418_v42 = vor.u32 %v4276_v37, %v3415_v38  ;;  %v3223_v37 = vld [vmem:[#allocation8 + $0x118] sm:$0xf0]  ;;  %v4416_v38 = vld [vmem:[#allocation8 + $0x6ec] sm:$0xf] }
 0x121   :  { %2346 = vmatpush.bf16.msra.mxu1 %v3686_v56  ;;  %v4358_v56 = vld [vmem:[#allocation8 + $0x514] sm:$0xf0] }
 0x122   :  { %2360 = vmatpush.bf16.msra.mxu2 %v3814_v53  ;;  %2320 = vmatpush.bf16.msrb.mxu3 %v3398_v59  ;;  %v3622_v53 = vor.u32 %v4330_v40, %v3621_v20  ;;  %v3463_v59 = vld [vmem:[#allocation8 + $0x2f8] sm:$0xf0]  ;;  %v3734_v0 = vor.u32 %v4358_v56, %v3733_v55  ;;  %v3146_v40 = vor.u32 %v4208_v34, %v3143_v35  ;;  %v4228_v34 = vld [vmem:[#allocation8 + $0x10c] sm:$0xf] }
 0x123   :  { %2334 = vmatpush.bf16.msra.mxu0 %v3526_v62  ;;  %v3335_v62 = vld [vmem:[#allocation8 + $0x1f8] sm:$0xf0]  ;;  %v4260_v35 = vld [vmem:[#allocation8 + $0x20c] sm:$0xf] }
 0x124   :  { %v3287_v20 = vld [vmem:[#allocation8 + $0x198] sm:$0xf0] }
 0x125   :  { %2347 = vmatpush.bf16.msra.mxu1 %v3670_v2  ;;  %v3466_v2 = vor.u32 %v4288_v58, %v3463_v59  ;;  %v3271_v55 = vld [vmem:[#allocation8 + $0x178] sm:$0xf0]  ;;  %v4394_v58 = vld [vmem:[#allocation8 + $0x634] sm:$0xf0]  ;;  %v3402_v59 = vor.u32 %v4272_v51, %v3399_v52  ;;  %v4344_v51 = vld [vmem:[#allocation8 + $0x4ac] sm:$0xf] }
 0x126   :  { %2361 = vmatpush.bf16.msra.mxu2 %v3798_v1  ;;  %2321 = vmatpush.bf16.msrb.mxu3 %v3382_v7  ;;  %v3941_v1 = vld [vmem:[#allocation8 + $0x6a8] sm:$0xf]  ;;  %v3338_v7 = vor.u32 %v4256_v61, %v3335_v62  ;;  %v3111_v61 = vld [vmem:[#allocation8 + $0x38] sm:$0xf0]  ;;  %v3274_v62 = vor.u32 %v4240_v54, %v3271_v55  ;;  %v4412_v54 = vld [vmem:[#allocation8 + $0x6cc] sm:$0xf] }
 0x127   :  { %2335 = vmatpush.bf16.msra.mxu0 %v3510_v10  ;;  %v3942_v10 = vor.u32 %v4410_v3, %v3941_v1  ;;  %v3878_v1 = vor.u32 %v4394_v58, %v3877_v57  ;;  %v4236_v3 = vld [vmem:[#allocation8 + $0x14c] sm:$0xf]  ;;  %v3687_v52 = vld [vmem:[#allocation8 + $0x4b8] sm:$0xf0] }
 0x128   :  { %v3959_v55 = vld [vmem:[#allocation8 + $0x6d8] sm:$0xf0]  ;;  %v4380_v57 = vld [vmem:[#allocation8 + $0x5cc] sm:$0xf] }
 0x129   :  { %2348 = vmatpush.bf16.msra.mxu1 %v3654_v19  ;;  %v3450_v19 = vor.u32 %v4284_v8, %v3447_v9  ;;  %v3095_v8 = vld [vmem:[#allocation8 + $0x18] sm:$0xf0] }
 0x12a   :  { %2362 = vmatpush.bf16.msra.mxu2 %v3782_v13  ;;  %2322 = vmatpush.bf16.msrb.mxu3 %v3366_v24  ;;  %v3178_v13 = vor.u32 %v4216_v5, %v3175_v6  ;;  %v3322_v24 = vor.u32 %v4252_v11, %v3319_v12  ;;  %v4390_v6 = vld [vmem:[#allocation8 + $0x614] sm:$0xf0]  ;;  %v3591_v11 = vld [vmem:[#allocation8 + $0x3f8] sm:$0xf0]  ;;  %v4352_v12 = vld [vmem:[#allocation8 + $0x4ec] sm:$0xf] }
 0x12b   :  { %2336 = vmatpush.bf16.msra.mxu0 %v3494_v28  ;;  %v4248_v28 = vld [vmem:[#allocation8 + $0x1ac] sm:$0xf]  ;;  %v3831_v58 = vld [vmem:[#allocation8 + $0x5d8] sm:$0xf0] }
 0x12d   :  { %2349 = vmatpush.bf16.msra.mxu1 %v3638_v36  ;;  %v3306_v36 = vor.u32 %v4248_v28, %v3303_v29  ;;  %v3722_v28 = vor.u32 %v4352_v12, %v3719_v17  ;;  %v3927_v17 = vld [vmem:[#allocation8 + $0x698] sm:$0xf0] }
 0x12e   :  { %2363 = vmatpush.bf16.msra.mxu2 %v3766_v32  ;;  %2323 = vmatpush.bf16.msrb.mxu3 %v3350_v43  ;;  %v4402_v32 = vld [vmem:[#allocation8 + $0x674] sm:$0xf0]  ;;  %v4244_v43 = vld [vmem:[#allocation8 + $0x18c] sm:$0xf] }
 0x12f   :  { %2337 = vmatpush.bf16.msra.mxu0 %v3478_v46  ;;  %v3910_v39 = vor.u32 %v4402_v32, %v3909_v31  ;;  %v3893_v46 = vld [vmem:[#allocation8 + $0x648] sm:$0xf]  ;;  %v3290_v50 = vor.u32 %v4244_v43, %v3287_v20  ;;  %v4348_v31 = vld [vmem:[#allocation8 + $0x4cc] sm:$0xf]  ;;  %v3703_v32 = vld [vmem:[#allocation8 + $0x4d8] sm:$0xf0] }
 0x130   :  { %v4384_v20 = vld [vmem:[#allocation8 + $0x5ec] sm:$0xf] }
 0x131   :  { %2350 = vmatpush.bf16.msra.mxu1 %v3622_v53  ;;  %2324 = vmatmul.bf16.vlgmr.msrb.gmra.mxu3 %v4796_v44 }
 0x132   :  { %2372 = vmatpush.bf16.msra.mxu3 %v3974_v41  ;;  %2364 = vmatpush.bf16.msra.mxu2 %v3750_v48  ;;  %v4398_v41 = vld [vmem:[#allocation8 + $0x654] sm:$0xf0]  ;;  %v3127_v48 = vld [vmem:[#allocation8 + $0x58] sm:$0xf0] }
 0x133   :  { %2386 = vmatpush.bf16.msrb.mxu0 %v3210_v47  ;;  %v4204_v47 = vld [vmem:[#allocation8 + $0x4c] sm:$0xf]  ;;  %v3894_v53 = vor.u32 %v4398_v41, %v3893_v46  ;;  %v3706_v46 = vor.u32 %v4348_v31, %v3703_v32  ;;  %v3783_v32 = vld [vmem:[#allocation8 + $0x578] sm:$0xf0] }
 0x134   :  { %2338 = vmatmul.bf16.vlgmr.msra.gmra.mxu0 %v4798_v45  ;;  %v3130_v56 = vor.u32 %v4204_v47, %v3127_v48  ;;  %v3559_v47 = vld [vmem:[#allocation8 + $0x3b8] sm:$0xf0]  ;;  %v3226_v48 = vor.u32 %v4228_v34, %v3223_v37  ;;  %v4368_v31 = vld [vmem:[#allocation8 + $0x56c] sm:$0xf] }
 0x135   :  { %2351 = vmatpush.bf16.msra.mxu1 %v3606_v4  ;;  %v3255_v4 = vld [vmem:[#allocation8 + $0x158] sm:$0xf0]  ;;  %v4296_v34 = vld [vmem:[#allocation8 + $0x32c] sm:$0xf] }
 0x136   :  { %2373 = vmatpush.bf16.msra.mxu3 %v3958_v60  ;;  %2365 = vmatpush.bf16.msra.mxu2 %v3734_v0  ;;  %v4200_v60 = vld [vmem:[#allocation8 + $0x2c] sm:$0xf]  ;;  %v3383_v0 = vld [vmem:[#allocation8 + $0x258] sm:$0xf0] }
 0x137   :  { %2387 = vmatpush.bf16.msrb.mxu0 %v3194_v63  ;;  %v4268_v63 = vld [vmem:[#allocation8 + $0x24c] sm:$0xf]  ;;  %v3114_v5 = vor.u32 %v4200_v60, %v3111_v61  ;;  %v3543_v61 = vld [vmem:[#allocation8 + $0x398] sm:$0xf0] }
 0x138   :  { %2352 = vmatmul.bf16.vlgmr.msra.gmra.mxu1 %v4813_v16  ;;  %v3386_v9 = vor.u32 %v4268_v63, %v3383_v0  ;;  %v4308_v60 = vld [vmem:[#allocation8 + $0x38c] sm:$0xf]  ;;  %v3671_v0 = vld [vmem:[#allocation8 + $0x498] sm:$0xf0] }
 0x139   :  { %2400 = vmatpush.bf16.msrb.mxu1 %v3338_v7  ;;  %2366 = vmatmul.bf16.vlgmr.msra.gmra.mxu2 %v4815_v23  ;;  %v4196_v7 = vld [vmem:[#allocation8 + $0xc] sm:$0xf] }
 0x13a   :  { %2414 = vmatpush.bf16.msrb.mxu2 %v3466_v2  ;;  %2374 = vmatpush.bf16.msra.mxu3 %v3942_v10  ;;  %v3861_v2 = vld [vmem:[#allocation8 + $0x608] sm:$0xf]  ;;  %v4320_v10 = vld [vmem:[#allocation8 + $0x3ec] sm:$0xf]  ;;  %v3098_v25 = vor.u32 %v4196_v7, %v3095_v8  ;;  %v3527_v8 = vld [vmem:[#allocation8 + $0x378] sm:$0xf0] }
 0x13b   :  { %2388 = vmatpush.bf16.msrb.mxu0 %v3178_v13  ;;  %v3258_v13 = vor.u32 %v4236_v3, %v3255_v4  ;;  %v3862_v21 = vor.u32 %v4390_v6, %v3861_v2  ;;  %v3594_v26 = vor.u32 %v4320_v10, %v3591_v11  ;;  %v4340_v63 = vld [vmem:[#allocation8 + $0x48c] sm:$0xf]  ;;  %v3943_v3 = vld [vmem:[#allocation8 + $0x6b8] sm:$0xf0]  ;;  %v3546_v4 = vor.u32 %v4308_v60, %v3543_v61 }
 0x13c   :  { %v4376_v2 = vld [vmem:[#allocation8 + $0x5ac] sm:$0xf]  ;;  %v3674_v6 = vor.u32 %v4340_v63, %v3671_v0  ;;  %v3655_v11 = vld [vmem:[#allocation8 + $0x478] sm:$0xf0] }
 0x13d   :  { %2401 = vmatpush.bf16.msrb.mxu1 %v3322_v24  ;;  %v3239_v24 = vld [vmem:[#allocation8 + $0x138] sm:$0xf0]  ;;  %v4304_v7 = vld [vmem:[#allocation8 + $0x36c] sm:$0xf] }
 0x13e   :  { %2415 = vmatpush.bf16.msrb.mxu2 %v3450_v19  ;;  %2375 = vmatpush.bf16.msra.mxu3 %v3926_v27  ;;  %v3367_v19 = vld [vmem:[#allocation8 + $0x238] sm:$0xf0]  ;;  %v4316_v27 = vld [vmem:[#allocation8 + $0x3cc] sm:$0xf] }
 0x13f   :  { %2389 = vmatpush.bf16.msrb.mxu0 %v3162_v30  ;;  %v3370_v29 = vor.u32 %v4264_v18, %v3367_v19  ;;  %v3575_v30 = vld [vmem:[#allocation8 + $0x3d8] sm:$0xf0]  ;;  %v4336_v10 = vld [vmem:[#allocation8 + $0x46c] sm:$0xf] }
 0x140   :  { %v3578_v43 = vor.u32 %v4316_v27, %v3575_v30  ;;  %v4372_v18 = vld [vmem:[#allocation8 + $0x58c] sm:$0xf]  ;;  %v3799_v19 = vld [vmem:[#allocation8 + $0x598] sm:$0xf0] }
 0x141   :  { %2402 = vmatpush.bf16.msrb.mxu1 %v3306_v36  ;;  %v3351_v36 = vld [vmem:[#allocation8 + $0x218] sm:$0xf0]  ;;  %v3802_v27 = vor.u32 %v4372_v18, %v3799_v19  ;;  %v4328_v37 = vld [vmem:[#allocation8 + $0x42c] sm:$0xf]  ;;  %v4433_v18 = vld [vmem:[#allocation11 + $0x70] sm:$0xff] }
 0x142   :  { %2416 = vmatpush.bf16.msrb.mxu2 %v3434_v33  ;;  %2376 = vmatpush.bf16.msra.mxu3 %v3910_v39  ;;  %v3242_v33 = vor.u32 %v4232_v22, %v3239_v24  ;;  %v3975_v39 = vld [vmem:[#allocation8 + $0x6f8] sm:$0xf0]  ;;  %v3354_v41 = vor.u32 %v4260_v35, %v3351_v36  ;;  %v4300_v22 = vld [vmem:[#allocation8 + $0x34c] sm:$0xf] }
 0x143   :  { %2390 = vmatpush.bf16.msrb.mxu0 %v3146_v40  ;;  %v3847_v40 = vld [vmem:[#allocation8 + $0x5f8] sm:$0xf0] }
 0x144   :  { %v3495_v35 = vld [vmem:[#allocation8 + $0x338] sm:$0xf0] }
 0x145   :  { %2403 = vmatpush.bf16.msrb.mxu1 %v3290_v50  ;;  %v3978_v50 = vor.u32 %v4416_v38, %v3975_v39  ;;  %v3623_v38 = vld [vmem:[#allocation8 + $0x438] sm:$0xf0] }
 0x146   :  { %2417 = vmatpush.bf16.msrb.mxu2 %v3418_v42  ;;  %2377 = vmatpush.bf16.msra.mxu3 %v3894_v53  ;;  %v4312_v42 = vld [vmem:[#allocation8 + $0x3ac] sm:$0xf]  ;;  %v3850_v53 = vor.u32 %v4384_v20, %v3847_v40  ;;  %v3895_v40 = vld [vmem:[#allocation8 + $0x658] sm:$0xf0] }
 0x147   :  { %2391 = vmatpush.bf16.msrb.mxu0 %v3130_v56  ;;  %v3562_v56 = vor.u32 %v4312_v42, %v3559_v47  ;;  %v4396_v20 = vld [vmem:[#allocation8 + $0x64c] sm:$0xf]  ;;  %v3767_v42 = vld [vmem:[#allocation8 + $0x558] sm:$0xf0]  ;;  %v3626_v47 = vor.u32 %v4328_v37, %v3623_v38  ;;  %v4429_v38 = vld [vmem:[#allocation11 + $0x50] sm:$0xff] }
 0x148   :  { %v3751_v60 = vld [vmem:[#allocation8 + $0x538] sm:$0xf0] }
 0x149   :  { %2404 = vmatpush.bf16.msrb.mxu1 %v3274_v62  ;;  %v3962_v62 = vor.u32 %v4412_v54, %v3959_v55  ;;  %v4841_v54 = vld [vmem:[#allocation10] sm:$0xf] }
 0x14a   :  { %2418 = vmatpush.bf16.msrb.mxu2 %v3402_v59  ;;  %2378 = vmatpush.bf16.msra.mxu3 %v3878_v1  ;;  %v3690_v59 = vor.u32 %v4344_v51, %v3687_v52  ;;  %v3834_v1 = vor.u32 %v4380_v57, %v3831_v58  ;;  %v3898_v51 = vor.u32 %v4396_v20, %v3895_v40  ;;  %v4324_v52 = vld [vmem:[#allocation8 + $0x40c] sm:$0xf]  ;;  %v3879_v57 = vld [vmem:[#allocation8 + $0x638] sm:$0xf0]  ;;  %v964_v0 = vperm.slane %v4841_v54, 0 }
 0x14b   :  { %2392 = vmatpush.bf16.msrb.mxu0 %v3114_v5  ;;  %v3815_v5 = vld [vmem:[#allocation8 + $0x5b8] sm:$0xf0] }
 0x14c   :  { %v3818_v12 = vor.u32 %v4376_v2, %v3815_v5  ;;  %v4426_v63 = vld [vmem:[#allocation11 + $0x38] sm:$0xff]  ;;  %v4356_v5 = vld [vmem:[#allocation8 + $0x50c] sm:$0xf] }
 0x14d   :  { %2405 = vmatpush.bf16.msrb.mxu1 %v3258_v13  ;;  %v4404_v13 = vld [vmem:[#allocation8 + $0x68c] sm:$0xf]  ;;  %v3863_v2 = vld [vmem:[#allocation8 + $0x618] sm:$0xf0] }
 0x14e   :  { %2419 = vmatpush.bf16.msrb.mxu2 %v3386_v9  ;;  %2379 = vmatpush.bf16.msra.mxu3 %v3862_v21  ;;  %v3658_v21 = vor.u32 %v4336_v10, %v3655_v11  ;;  %v3930_v24 = vor.u32 %v4404_v13, %v3927_v17  ;;  %v2115_v39 = vpop.f32.mrf.mxu0  ;;  %v4434_v11 = vld [vmem:[#allocation11 + $0x78] sm:$0xff]  ;;  %v4424_v17 = vld [vmem:[#allocation11 + $0x28] sm:$0xff] }
 0x14f   :  { %2393 = vmatpush.bf16.msrb.mxu0 %v3098_v25  ;;  %v4332_v25 = vld [vmem:[#allocation8 + $0x44c] sm:$0xf] }
 0x151   :  { %2406 = vmatpush.bf16.msrb.mxu1 %v3242_v33  ;;  %2380 = vmatmul.bf16.vlgmr.msra.gmra.mxu3 %v4822_v49 }
 0x152   :  { %2428 = vmatpush.bf16.msrb.mxu3 %v3594_v26  ;;  %2420 = vmatpush.bf16.msrb.mxu2 %v3370_v29  ;;  %v3639_v26 = vld [vmem:[#allocation8 + $0x458] sm:$0xf0] }
 0x153   :  { %2442 = vmatpush.bf16.msra.mxu0 %v3722_v28  ;;  %v4400_v28 = vld [vmem:[#allocation8 + $0x66c] sm:$0xf]  ;;  %v3911_v29 = vld [vmem:[#allocation8 + $0x678] sm:$0xf0]  ;;  %v3642_v33 = vor.u32 %v4332_v25, %v3639_v26  ;;  %v2101_v61 = vpop.f32.mrf.mxu3 }
 0x154   :  { %2394 = vmatmul.bf16.vlgmr.msrb.gmra.mxu0 %v4790_v14  ;;  %v4408_v14 = vld [vmem:[#allocation8 + $0x6ac] sm:$0xf]  ;;  %v3914_v36 = vor.u32 %v4400_v28, %v3911_v29  ;;  %v4422_v26 = vld [vmem:[#allocation11 + $0x18] sm:$0xff]  ;;  %v4431_v29 = vld [vmem:[#allocation11 + $0x60] sm:$0xff] }
 0x155   :  { %2407 = vmatpush.bf16.msrb.mxu1 %v3226_v48  ;;  %v3946_v9 = vor.u32 %v4408_v14, %v3943_v3  ;;  %v4292_v48 = vld [vmem:[#allocation8 + $0x30c] sm:$0xf]  ;;  %v2129_v14 = vpop.f32.mrf.mxu1 }
 0x156   :  { %2429 = vmatpush.bf16.msrb.mxu3 %v3578_v43  ;;  %2421 = vmatpush.bf16.msrb.mxu2 %v3354_v41  ;;  %v3786_v43 = vor.u32 %v4368_v31, %v3783_v32  ;;  %v4364_v41 = vld [vmem:[#allocation8 + $0x54c] sm:$0xf] }
 0x157   :  { %2443 = vmatpush.bf16.msra.mxu0 %v3706_v46  ;;  %v3498_v46 = vor.u32 %v4296_v34, %v3495_v35  ;;  %v3770_v55 = vor.u32 %v4364_v41, %v3767_v42  ;;  %v4430_v35 = vld [vmem:[#allocation11 + $0x58] sm:$0xff]  ;;  %v4428_v42 = vld [vmem:[#allocation11 + $0x48] sm:$0xff] }
 0x158   :  { %2408 = vmatmul.bf16.vlgmr.msrb.gmra.mxu1 %v4792_v15  ;;  %v3511_v15 = vld [vmem:[#allocation8 + $0x358] sm:$0xf0] }
 0x159   :  { %2456 = vmatpush.bf16.msra.mxu1 %v3850_v53  ;;  %2422 = vmatmul.bf16.vlgmr.msrb.gmra.mxu2 %v4796_v44  ;;  %v3530_v44 = vor.u32 %v4304_v7, %v3527_v8  ;;  %v3514_v30 = vor.u32 %v4300_v22, %v3511_v15  ;;  %v3607_v53 = vld [vmem:[#allocation8 + $0x418] sm:$0xf0]  ;;  %v2117_v7 = vpop.f32.mrf.mxu0  ;;  %v4425_v8 = vld [vmem:[#allocation11 + $0x30] sm:$0xff]  ;;  %v4423_v15 = vld [vmem:[#allocation11 + $0x20] sm:$0xff] }
 0x15a   :  { %2470 = vmatpush.bf16.msra.mxu2 %v3978_v50  ;;  %2430 = vmatpush.bf16.msrb.mxu3 %v3562_v56  ;;  %v3479_v50 = vld [vmem:[#allocation8 + $0x318] sm:$0xf0]  ;;  %v4392_v56 = vld [vmem:[#allocation8 + $0x62c] sm:$0xf] }
 0x15b   :  { %2444 = vmatpush.bf16.msra.mxu0 %v3690_v59  ;;  %v3482_v58 = vor.u32 %v4292_v48, %v3479_v50  ;;  %v4360_v59 = vld [vmem:[#allocation8 + $0x52c] sm:$0xf]  ;;  %v2103_v19 = vpop.f32.mrf.mxu3 }
 0x15c   :  { %v3754_v3 = vor.u32 %v4360_v59, %v3751_v60  ;;  %v2104_v25 = vadd.f32 %v2103_v19, %v964_v0 }
 0x15d   :  { %2457 = vmatpush.bf16.msra.mxu1 %v3834_v1  ;;  %v3882_v1 = vor.u32 %v4392_v56, %v3879_v57 }
 0x15e   :  { %2471 = vmatpush.bf16.msra.mxu2 %v3962_v62  ;;  %2431 = vmatpush.bf16.msrb.mxu3 %v3546_v4  ;;  %v3610_v62 = vor.u32 %v4324_v52, %v3607_v53  ;;  %v4388_v4 = vld [vmem:[#allocation8 + $0x60c] sm:$0xf]  ;;  %v2118_v28 = vadd.f32 %v2117_v7, %v2104_v25  ;;  %v965_v52 = vperm.slane %v4841_v54, 1  ;;  %v4441_v25 = vld [vmem:[#allocation11 + $0xb0] sm:$0xff] }
 0x15f   :  { %2445 = vmatpush.bf16.msra.mxu0 %v3674_v6  ;;  %v3735_v6 = vld [vmem:[#allocation8 + $0x518] sm:$0xf0]  ;;  %v3866_v10 = vor.u32 %v4388_v4, %v3863_v2 }
 0x160   :  { %v3738_v13 = vor.u32 %v4356_v5, %v3735_v6 }
 0x161   :  { %2458 = vmatpush.bf16.msra.mxu1 %v3818_v12  ;;  %v2143_v12 = vpop.f32.mrf.mxu2 }
 0x162   :  { %2472 = vmatpush.bf16.msra.mxu2 %v3946_v9  ;;  %2432 = vmatpush.bf16.msrb.mxu3 %v3530_v44  ;;  %v2102_v9 = vadd.f32 %v2101_v61, %v964_v0 }
 0x163   :  { %2446 = vmatpush.bf16.msra.mxu0 %v3658_v21  ;;  %v2131_v21 = vpop.f32.mrf.mxu1 }
 0x164   :  { %v2116_v44 = vadd.f32 %v2115_v39, %v2102_v9  ;;  %v2132_v34 = vadd.f32 %v2131_v21, %v2118_v28  ;;  %v4440_v28 = vld [vmem:[#allocation11 + $0xa8] sm:$0xff] }
 0x165   :  { %2459 = vmatpush.bf16.msra.mxu1 %v3802_v27 }
 0x166   :  { %2473 = vmatpush.bf16.msra.mxu2 %v3930_v24  ;;  %2433 = vmatpush.bf16.msrb.mxu3 %v3514_v30  ;;  %v2130_v24 = vadd.f32 %v2129_v14, %v2116_v44 }
 0x167   :  { %2447 = vmatpush.bf16.msra.mxu0 %v3642_v33  ;;  %v4421_v33 = vld [vmem:[#allocation11 + $0x10] sm:$0xff] }
 0x168   :  { %v2144_v27 = vadd.f32 %v2143_v12, %v2130_v24 }
 0x169   :  { %2460 = vmatpush.bf16.msra.mxu1 %v3786_v43 }
 0x16a   :  { %2474 = vmatpush.bf16.msra.mxu2 %v3914_v36  ;;  %2434 = vmatpush.bf16.msrb.mxu3 %v3498_v46  ;;  %v4419_v46 = vld [vmem:[#allocation11] sm:$0xff] }
 0x16b   :  { %2448 = vmatpush.bf16.msra.mxu0 %v3626_v47 }
 0x16d   :  { %2461 = vmatpush.bf16.msra.mxu1 %v3770_v55  ;;  %v4427_v55 = vld [vmem:[#allocation11 + $0x40] sm:$0xff] }
 0x16e   :  { %2475 = vmatpush.bf16.msra.mxu2 %v3898_v51  ;;  %2435 = vmatpush.bf16.msrb.mxu3 %v3482_v58  ;;  %v2171_v22 = vpop.f32.mrf.mxu0 }
 0x16f   :  { %2449 = vmatpush.bf16.msra.mxu0 %v3610_v62 }
 0x171   :  { %2462 = vmatpush.bf16.msra.mxu1 %v3754_v3  ;;  %2436 = vmatmul.bf16.vlgmr.msrb.gmra.mxu3 %v4798_v45  ;;  %v4432_v45 = vld [vmem:[#allocation11 + $0x68] sm:$0xff] }
 0x172   :  { %2707 = vmatpush.bf16.msra.mxu3 %v4426_v63  ;;  %2476 = vmatpush.bf16.msra.mxu2 %v3882_v1 }
 0x173   :  { %2450 = vmatmul.bf16.vlgmr.msra.gmra.mxu0 %v4813_v16  ;;  %v2145_v16 = vpop.f32.mrf.mxu2  ;;  %v2157_v30 = vpop.f32.mrf.mxu3 }
 0x174   :  { %2721 = vmatpush.bf16.msrb.mxu0 %v4434_v11  ;;  %v2158_v31 = vadd.f32 %v2157_v30, %v2144_v27  ;;  %v2146_v37 = vadd.f32 %v2145_v16, %v2132_v34  ;;  %v4438_v30 = vld [vmem:[#allocation11 + $0x98] sm:$0xff]  ;;  %v4435_v34 = vld [vmem:[#allocation11 + $0x80] sm:$0xff] }
 0x175   :  { %2463 = vmatpush.bf16.msra.mxu1 %v3738_v13  ;;  %v2185_v32 = vpop.f32.mrf.mxu1 }
 0x176   :  { %2708 = vmatpush.bf16.msra.mxu3 %v4425_v8  ;;  %2477 = vmatpush.bf16.msra.mxu2 %v3866_v10  ;;  %v2172_v36 = vadd.f32 %v2171_v22, %v2158_v31  ;;  %v4442_v22 = vld [vmem:[#allocation11 + $0xb8] sm:$0xff]  ;;  %v4437_v31 = vld [vmem:[#allocation11 + $0x90] sm:$0xff] }
 0x178   :  { %2464 = vmatmul.bf16.vlgmr.msra.gmra.mxu1 %v4815_v23  ;;  %2722 = vmatpush.bf16.msrb.mxu0 %v4433_v18  ;;  %v4420_v23 = vld [vmem:[#allocation11 + $0x8] sm:$0xff]  ;;  %v2186_v20 = vadd.f32 %v2185_v32, %v2172_v36  ;;  %v966_v36 = vperm.slane %v4841_v54, 2 }
 0x179   :  { %2478 = vmatmul.bf16.vlgmr.msra.gmra.mxu2 %v4822_v49  ;;  %v2173_v49 = vpop.f32.mrf.mxu0  ;;  %2735 = vmatpush.bf16.msrb.mxu1 %v4442_v22 }
 0x17a   :  { %2709 = vmatpush.bf16.msra.mxu3 %v4424_v17  ;;  %v2492_v50 = vmul.f32 0.2, %v2186_v20  ;;  %vm2484_vm14 = vcmp.gt.f32.partialorder %v2186_v20, 0.0 }
 0x17b   :  { %v2199_v39 = vpop.f32.mrf.mxu2  ;;  %v2159_v43 = vpop.f32.mrf.mxu3 }
 0x17c   :  { %2723 = vmatpush.bf16.msrb.mxu0 %v4432_v45  ;;  %v2160_v40 = vadd.f32 %v2159_v43, %v2146_v37  ;;  %v2500_v57 = vsel %vm2484_vm14, %v2186_v20, %v2492_v50  ;;  %v2200_v61 = vadd.f32 %v2199_v39, %v965_v52  ;;  %v4450_v37 = vld [vmem:[#allocation11 + $0xf8] sm:$0xff]  ;;  %v4448_v50 = vld [vmem:[#allocation11 + $0xe8] sm:$0xff] }
 0x17d   :  { %v2187_v47 = vpop.f32.mrf.mxu1  ;;  %2736 = vmatpush.bf16.msrb.mxu1 %v4441_v25  ;;  %2749 = vmatpush.bf16.msrb.mxu2 %v4450_v37 }
 0x17e   :  { %2710 = vmatpush.bf16.msra.mxu3 %v4423_v15  ;;  %v2174_v41 = vadd.f32 %v2173_v49, %v2160_v40 }
 0x180   :  { %2724 = vmatpush.bf16.msrb.mxu0 %v4431_v29  ;;  %v2188_v51 = vadd.f32 %v2187_v47, %v2174_v41  ;;  %v4439_v29 = vld [vmem:[#allocation11 + $0xa0] sm:$0xff]  ;;  %v4449_v41 = vld [vmem:[#allocation11 + $0xf0] sm:$0xff] }
 0x181   :  { %v2227_v48 = vpop.f32.mrf.mxu0  ;;  %2737 = vmatpush.bf16.msrb.mxu1 %v4440_v28  ;;  %2750 = vmatpush.bf16.msrb.mxu2 %v4449_v41  ;;  %v4458_v41 = vld [vmem:[#allocation13 + $0x38] sm:$0xff] }
 0x182   :  { %2711 = vmatpush.bf16.msra.mxu3 %v4422_v26  ;;  %vm2488_vm15 = vcmp.gt.f32.partialorder %v2188_v51, 0.0  ;;  %v2496_v53 = vmul.f32 0.2, %v2188_v51 }
 0x183   :  { %v2213_v56 = vpop.f32.mrf.mxu3  ;;  %v2201_v59 = vpop.f32.mrf.mxu2 }
 0x184   :  { %2725 = vmatpush.bf16.msrb.mxu0 %v4430_v35  ;;  %v2504_v58 = vsel %vm2488_vm15, %v2188_v51, %v2496_v53  ;;  %v2214_v62 = vadd.f32 %v2213_v56, %v2200_v61  ;;  %v2202_v14 = vadd.f32 %v2201_v59, %v965_v52 }
 0x185   :  { %v2508_v60 = vpack.c.bf16 %v2504_v58, %v2500_v57  ;;  %v2241_v0 = vpop.f32.mrf.mxu1  ;;  %2738 = vmatpush.bf16.msrb.mxu1 %v4439_v29  ;;  %2751 = vmatpush.bf16.msrb.mxu2 %v4448_v50  ;;  %v4447_v58 = vld [vmem:[#allocation11 + $0xe0] sm:$0xff]  ;;  %v4454_v50 = vld [vmem:[#allocation13 + $0x18] sm:$0xff] }
 0x186   :  { %2712 = vmatpush.bf16.msra.mxu3 %v4421_v33  ;;  %v2228_v3 = vadd.f32 %v2227_v48, %v2214_v62  ;;  %v4436_v33 = vld [vmem:[#allocation11 + $0x88] sm:$0xff] }
 0x188   :  { %2726 = vmatpush.bf16.msrb.mxu0 %v4429_v38  ;;  %v2242_v5 = vadd.f32 %v2241_v0, %v2228_v3  ;;  %v4445_v3 = vld [vmem:[#allocation11 + $0xd0] sm:$0xff] }
 0x189   :  { %v2229_v63 = vpop.f32.mrf.mxu0  ;;  %2739 = vmatpush.bf16.msrb.mxu1 %v4438_v30  ;;  %2752 = vmatpush.bf16.msrb.mxu2 %v4447_v58  ;;  %v4475_v58 = vld [vmem:[%s4869_s6] ss:$0 sm:$0xff] }
 0x18a   :  { %2713 = vmatpush.bf16.msra.mxu3 %v4420_v23 }
 0x18b   :  { %v2215_v1 = vpop.f32.mrf.mxu3  ;;  %v2255_v2 = vpop.f32.mrf.mxu2 }
 0x18c   :  { %2727 = vmatpush.bf16.msrb.mxu0 %v4428_v42  ;;  %v2216_v4 = vadd.f32 %v2215_v1, %v2202_v14  ;;  %v2256_v9 = vadd.f32 %v2255_v2, %v2242_v5 }
 0x18d   :  { %v2243_v10 = vpop.f32.mrf.mxu1  ;;  %2740 = vmatpush.bf16.msrb.mxu1 %v4437_v31 }
 0x18e   :  { %2714 = vmatpush.bf16.msra.mxu3 %v4419_v46  ;;  %v2230_v6 = vadd.f32 %v2229_v63, %v2216_v4  ;;  %v4446_v63 = vld [vmem:[#allocation11 + $0xd8] sm:$0xff] }
 0x18f   :  { %2753 = vmatpush.bf16.msrb.mxu2 %v4446_v63 }
 0x190   :  { %2728 = vmatpush.bf16.msrb.mxu0 %v4427_v55  ;;  %v2244_v11 = vadd.f32 %v2243_v10, %v2230_v6 }
 0x191   :  { %2715 = vmatmul.bf16.vlgmr.msra.gmra.mxu3 %v2508_v60  ;;  %v2283_v7 = vpop.f32.mrf.mxu0  ;;  %2741 = vmatpush.bf16.msrb.mxu1 %v4436_v33 }
 0x192   :  { %2821 = vmatpush.bf16.msrb.mxu3 %v4458_v41 }
 0x193   :  { %v2257_v13 = vpop.f32.mrf.mxu2  ;;  %2754 = vmatpush.bf16.msrb.mxu2 %v4445_v3 }
 0x194   :  { %v2269_v8 = vpop.f32.mrf.mxu3  ;;  %v2258_v44 = vadd.f32 %v2257_v13, %v2244_v11  ;;  %v4443_v13 = vld [vmem:[#allocation11 + $0xc0] sm:$0xff] }
 0x195   :  { %v2270_v12 = vadd.f32 %v2269_v8, %v2256_v9  ;;  %v2297_v32 = vpop.f32.mrf.mxu1  ;;  %2742 = vmatpush.bf16.msrb.mxu1 %v4435_v34  ;;  %v4444_v8 = vld [vmem:[#allocation11 + $0xc8] sm:$0xff] }
 0x196   :  { %v2298_v39 = vadd.f32 %v2297_v32, %v966_v36 }
 0x197   :  { %v2284_v17 = vadd.f32 %v2283_v7, %v2270_v12  ;;  %2755 = vmatpush.bf16.msrb.mxu2 %v4444_v8 }
 0x199   :  { %v2285_v21 = vpop.f32.mrf.mxu0  ;;  %v2493_v15 = vmul.f32 0.2, %v2284_v17  ;;  %vm2485_vm0 = vcmp.gt.f32.partialorder %v2284_v17, 0.0 }
 0x19b   :  { %v2501_v16 = vsel %vm2485_vm0, %v2284_v17, %v2493_v15  ;;  %2756 = vmatpush.bf16.msrb.mxu2 %v4443_v13 }
 0x19c   :  { %v2271_v18 = vpop.f32.mrf.mxu3  ;;  %v2311_v49 = vpop.f32.mrf.mxu2 }
 0x19d   :  { %v2272_v19 = vadd.f32 %v2271_v18, %v2258_v44  ;;  %v2299_v23 = vpop.f32.mrf.mxu1  ;;  %v2312_v20 = vadd.f32 %v2311_v49, %v2298_v39  ;;  %v967_v44 = vperm.slane %v4841_v54, 3 }
 0x19e   :  { %v2300_v40 = vadd.f32 %v2299_v23, %v966_v36 }
 0x19f   :  { %v2286_v24 = vadd.f32 %v2285_v21, %v2272_v19 }
 0x1a1   :  { %vm2489_vm1 = vcmp.gt.f32.partialorder %v2286_v24, 0.0  ;;  %v2497_v45 = vmul.f32 0.2, %v2286_v24 }
 0x1a3   :  { %v2505_v26 = vsel %vm2489_vm1, %v2286_v24, %v2497_v45 }
 0x1a4   :  { %v2509_v27 = vpack.c.bf16 %v2505_v26, %v2501_v16  ;;  %v2313_v38 = vpop.f32.mrf.mxu2 }
 0x1a5   :  { %v2314_v48 = vadd.f32 %v2313_v38, %v2300_v40 }
 0x1a6   :  { %2729 = vmatmul.bf16.vlgmr.msrb.gmra.mxu0 %v2509_v27 }
 0x1b1   :  { %v2339_v43 = vpop.f32.mrf.mxu0 }
 0x1b4   :  { %v2325_v35 = vpop.f32.mrf.mxu3 }
 0x1b5   :  { %v2326_v46 = vadd.f32 %v2325_v35, %v2312_v20  ;;  %v2353_v42 = vpop.f32.mrf.mxu1 }
 0x1b7   :  { %v2340_v52 = vadd.f32 %v2339_v43, %v2326_v46 }
 0x1b9   :  { %v2341_v55 = vpop.f32.mrf.mxu0  ;;  %v2354_v56 = vadd.f32 %v2353_v42, %v2340_v52  ;;  %v4457_v42 = vld [vmem:[#allocation13 + $0x30] sm:$0xff]  ;;  %v4452_v52 = vld [vmem:[#allocation13 + $0x8] sm:$0xff] }
 0x1ba   :  { %2822 = vmatpush.bf16.msrb.mxu3 %v4457_v42 }
 0x1bc   :  { %v2327_v47 = vpop.f32.mrf.mxu3  ;;  %v2367_v51 = vpop.f32.mrf.mxu2 }
 0x1bd   :  { %v2328_v53 = vadd.f32 %v2327_v47, %v2314_v48  ;;  %v2355_v60 = vpop.f32.mrf.mxu1  ;;  %v2368_v61 = vadd.f32 %v2367_v51, %v2354_v56  ;;  %v4456_v47 = vld [vmem:[#allocation13 + $0x28] sm:$0xff]  ;;  %v4455_v48 = vld [vmem:[#allocation13 + $0x20] sm:$0xff]  ;;  %v4453_v51 = vld [vmem:[#allocation13 + $0x10] sm:$0xff] }
 0x1be   :  { %2823 = vmatpush.bf16.msrb.mxu3 %v4456_v47 }
 0x1bf   :  { %v2342_v57 = vadd.f32 %v2341_v55, %v2328_v53  ;;  %v4451_v53 = vld [vmem:[#allocation13] sm:$0xff] }
 0x1c1   :  { %v2356_v62 = vadd.f32 %v2355_v60, %v2342_v57 }
 0x1c2   :  { %2824 = vmatpush.bf16.msrb.mxu3 %v4455_v48 }
 0x1c4   :  { %v2369_v0 = vpop.f32.mrf.mxu2 }
 0x1c5   :  { %v2370_v14 = vadd.f32 %v2369_v0, %v2356_v62 }
 0x1c6   :  { %2825 = vmatpush.bf16.msrb.mxu3 %v4454_v50 }
 0x1ca   :  { %2826 = vmatpush.bf16.msrb.mxu3 %v4453_v51 }
 0x1ce   :  { %2827 = vmatpush.bf16.msrb.mxu3 %v4452_v52 }
 0x1d1   :  { %v2395_v6 = vpop.f32.mrf.mxu0 }
 0x1d2   :  { %v2396_v21 = vadd.f32 %v2395_v6, %v967_v44  ;;  %2828 = vmatpush.bf16.msrb.mxu3 %v4451_v53 }
 0x1d4   :  { %v2381_v59 = vpop.f32.mrf.mxu3 }
 0x1d5   :  { %v2382_v1 = vadd.f32 %v2381_v59, %v2368_v61  ;;  %v2409_v10 = vpop.f32.mrf.mxu1 }
 0x1d6   :  { %v2410_v22 = vadd.f32 %v2409_v10, %v2396_v21 }
 0x1d7   :  { %v2494_v2 = vmul.f32 0.2, %v2382_v1  ;;  %vm2486_vm2 = vcmp.gt.f32.partialorder %v2382_v1, 0.0 }
 0x1d9   :  { %v2502_v9 = vsel %vm2486_vm2, %v2382_v1, %v2494_v2  ;;  %v2397_v18 = vpop.f32.mrf.mxu0 }
 0x1da   :  { %v2398_v27 = vadd.f32 %v2397_v18, %v967_v44 }
 0x1dc   :  { %v2383_v4 = vpop.f32.mrf.mxu3  ;;  %v2423_v17 = vpop.f32.mrf.mxu2 }
 0x1dd   :  { %v2384_v5 = vadd.f32 %v2383_v4, %v2370_v14  ;;  %v2411_v19 = vpop.f32.mrf.mxu1  ;;  %v2424_v24 = vadd.f32 %v2423_v17, %v2410_v22 }
 0x1de   :  { %v2412_v29 = vadd.f32 %v2411_v19, %v2398_v27 }
 0x1df   :  { %vm2490_vm3 = vcmp.gt.f32.partialorder %v2384_v5, 0.0  ;;  %v2498_v7 = vmul.f32 0.2, %v2384_v5 }
 0x1e1   :  { %v2506_v11 = vsel %vm2490_vm3, %v2384_v5, %v2498_v7 }
 0x1e2   :  { %v2510_v12 = vpack.c.bf16 %v2506_v11, %v2502_v9 }
 0x1e4   :  { %2743 = vmatmul.bf16.vlgmr.msrb.gmra.mxu1 %v2510_v12  ;;  %v2425_v15 = vpop.f32.mrf.mxu2  ;;  %v4476_v12 = vld [vmem:[%s4871_s8] ss:$0 sm:$0xff] }
 0x1e5   :  { %v2426_v31 = vadd.f32 %v2425_v15, %v2412_v29 }
 0x1f0   :  { %v2451_v25 = vpop.f32.mrf.mxu0 }
 0x1f4   :  { %v2437_v45 = vpop.f32.mrf.mxu3 }
 0x1f5   :  { %v2438_v16 = vadd.f32 %v2437_v45, %v2424_v24  ;;  %v2465_v26 = vpop.f32.mrf.mxu1 }
 0x1f7   :  { %v2452_v28 = vadd.f32 %v2451_v25, %v2438_v16 }
 0x1f8   :  { %v2453_v34 = vpop.f32.mrf.mxu0 }
 0x1f9   :  { %v2466_v32 = vadd.f32 %v2465_v26, %v2452_v28 }
 0x1fc   :  { %v2479_v30 = vpop.f32.mrf.mxu2  ;;  %v2439_v49 = vpop.f32.mrf.mxu3 }
 0x1fd   :  { %v2440_v33 = vadd.f32 %v2439_v49, %v2426_v31  ;;  %v2480_v54 = vadd.f32 %v2479_v30, %v2466_v32  ;;  %v2467_v36 = vpop.f32.mrf.mxu1 }
 0x1ff   :  { %v2454_v35 = vadd.f32 %v2453_v34, %v2440_v33  ;;  %v2495_v38 = vmul.f32 0.2, %v2480_v54  ;;  %vm2487_vm4 = vcmp.gt.f32.partialorder %v2480_v54, 0.0 }
 0x201   :  { %v2468_v23 = vadd.f32 %v2467_v36, %v2454_v35  ;;  %v2503_v20 = vsel %vm2487_vm4, %v2480_v54, %v2495_v38 }
 0x204   :  { %v2481_v37 = vpop.f32.mrf.mxu2 }
 0x205   :  { %v2482_v39 = vadd.f32 %v2481_v37, %v2468_v23 }
 0x207   :  { %vm2491_vm5 = vcmp.gt.f32.partialorder %v2482_v39, 0.0  ;;  %v2499_v43 = vmul.f32 0.2, %v2482_v39 }
 0x209   :  { %v2507_v40 = vsel %vm2491_vm5, %v2482_v39, %v2499_v43 }
 0x20a   :  { %v2511_v46 = vpack.c.bf16 %v2507_v40, %v2503_v20 }
 0x20c   :  { %2757 = vmatmul.bf16.vlgmr.msrb.gmra.mxu2 %v2511_v46 }
 0x214   :  { %v2716_v55 = vpop.f32.mrf.mxu3 }
 0x215   :  { %v2717_v59 = vadd.f32 %v4475_v58, %v2716_v55 }
 0x21c   :  { %v2718_v60 = vpop.f32.mrf.mxu3 }
 0x21d   :  { %v2719_v0 = vadd.f32 %v4475_v58, %v2718_v60 }
 0x223   :  { %v2730_v56 = vpop.f32.mrf.mxu0 }
 0x224   :  { %v2731_v62 = vadd.f32 %v2730_v56, %v2717_v59 }
 0x22b   :  { %v2732_v63 = vpop.f32.mrf.mxu0 }
 0x22c   :  { %v2733_v3 = vadd.f32 %v2732_v63, %v2719_v0 }
 0x261   :  { %v2744_v57 = vpop.f32.mrf.mxu1 }
 0x262   :  { %v2745_v1 = vadd.f32 %v2744_v57, %v2731_v62 }
 0x269   :  { %v2746_v14 = vpop.f32.mrf.mxu1 }
 0x26a   :  { %v2747_v2 = vadd.f32 %v2746_v14, %v2733_v3 }
 0x28f   :  { %v2758_v61 = vpop.f32.mrf.mxu2 }
 0x290   :  { %v2759_v4 = vadd.f32 %v2758_v61, %v2745_v1 }
 0x292   :  { %v2765_v6 = vmul.f32 0.2, %v2759_v4  ;;  %vm2763_vm6 = vcmp.gt.f32.partialorder %v2759_v4, 0.0 }
 0x294   :  { %v2767_v9 = vsel %vm2763_vm6, %v2759_v4, %v2765_v6 }
 0x297   :  { %v2760_v5 = vpop.f32.mrf.mxu2 }
 0x298   :  { %v2761_v7 = vadd.f32 %v2760_v5, %v2747_v2 }
 0x29a   :  { %vm2764_vm7 = vcmp.gt.f32.partialorder %v2761_v7, 0.0  ;;  %v2766_v8 = vmul.f32 0.2, %v2761_v7 }
 0x29c   :  { %v2768_v10 = vsel %vm2764_vm7, %v2761_v7, %v2766_v8 }
 0x29d   :  { %v2769_v11 = vpack.c.bf16 %v2768_v10, %v2767_v9 }
 0x29f   :  { %2829 = vmatmul.bf16.vlgmr.msrb.gmra.mxu3 %v2769_v11 }
 0x322   :  { %v2830_v13 = vpop.f32.mrf.mxu3 }
 0x323   :  { %v2831_v17 = vadd.f32 %v4476_v12, %v2830_v13 }
 0x325   :  { %2835 = vst [vmem:[#allocation14] sm:$0xff] %v2831_v17 }
 0x32a   :  { %v2832_v44 = vpop.f32.mrf.mxu3 }
 0x32b   :  { %v2833_v18 = vadd.f32 %v4476_v12, %v2832_v44 }
 0x32d   :  { %2836 = vst [vmem:[#allocation14 + $0x8] sm:$0xff] %v2833_v18 }
 0x32e   :  { %2849 = dma.vmem_to_hbm [thread:$0]  %s2842_s27, 256, %s2844_s29, [#allocation4], %s4689_s12, %s4689_s12, %s4690_s5  }
 0x32f   :  { %4677 = dma.done.wait [#allocation4], 256  }
 0x330   :  { %4678 = vsyncadd [#allocation4], 4294967040 }
 0x331   :  { %2854 = vsyncpa [#allocation3], 1 }
 0x332   :  { %2855 = vsyncpa [#allocation6], 1 }
 0x333   :  { %2856 = vsyncpa [#allocation9], 1 }
 0x334   :  { %2857 = vsyncpa [#allocation12], 1 }
 0x335   :  { %2858 = vsyncpa [#allocation4], 1 }

</bundles_post_ra>
